<compile_context>
chip_gen: v7x
topology: tpu7x:2x2x1
jax: 0.10.0
libtpu: 0.0.40
codegen_flags: <defaults>
</compile_context>

<pallas_src>
import jax
import jax.numpy as jnp
from jax.experimental import pallas as pl
from jax.experimental.pallas import tpu as pltpu


def relu_conv2d(x_nchw, weight_oihw):
    """ReLU followed by 3x3 same-padding conv (no bias). NCHW in / NCHW out."""
    N, Cin, H, W = x_nchw.shape
    Cout, Cin_w, KH, KW = weight_oihw.shape
    assert Cin == Cin_w and (KH, KW) == (3, 3)

    WP = W + 2                      # padded width
    M = H * WP                      # rows of the flat output slab (incl. 2 junk cols/row)
    rows_needed = M + 2 * WP + 2    # max flat row index touched + 1
    PR = ((rows_needed + 7) // 8) * 8   # round padded-row count up to sublane multiple

    # NCHW -> NHWC, zero-pad spatial by 1, flatten (H+2, W+2) rows, pad rows to PR.
    x_nhwc = jnp.transpose(x_nchw, (0, 2, 3, 1))
    x_pad = jnp.pad(x_nhwc, ((0, 0), (1, 1), (1, 1), (0, 0)))
    x_flat = x_pad.reshape(N, (H + 2) * WP, Cin)
    x_flat = jnp.pad(x_flat, ((0, 0), (0, PR - (H + 2) * WP), (0, 0)))

    # OIHW -> (tap = kh*3+kw, Cin, Cout) in bf16 (MXU-native on v6e/v7x).
    # TODO(synk): in a real model, hoist this weight transpose/cast out of the hot path.
    w_taps = jnp.transpose(weight_oihw, (2, 3, 1, 0)).reshape(9, Cin, Cout)
    w_taps = w_taps.astype(jnp.bfloat16)

    # Split Cout over a parallel grid axis when it stays lane-aligned (128).
    CB = 2 if (Cout % 256 == 0) else 1
    Cb = Cout // CB

    def kernel(x_ref, w_ref, o_ref, xr_ref):
        # x_ref : (PR, Cin)      f32  flattened zero-padded rows, one image
        # w_ref : (9, Cin, Cb)   bf16 per-tap weights
        # o_ref : (M, Cb)        output slab (f32)
        # xr_ref: (PR, Cin)      f32 scratch holding ReLU(x) (computed once)
        xr_ref[...] = jnp.maximum(x_ref[...], 0.0)
        acc = jnp.zeros((M, Cb), jnp.float32)
        for kh in range(3):
            for kw in range(3):
                off = kh * WP + kw
                patch = xr_ref[off:off + M, :].astype(jnp.bfloat16)
                acc = acc + jnp.dot(patch, w_ref[kh * 3 + kw],
                                    preferred_element_type=jnp.float32)
        o_ref[...] = acc.astype(o_ref.dtype)

    out_flat = pl.pallas_call(
        kernel,
        out_shape=jax.ShapeDtypeStruct((N, M, Cout), x_nchw.dtype),
        grid_spec=pltpu.PrefetchScalarGridSpec(
            num_scalar_prefetch=0,
            grid=(N, CB),
            in_specs=[
                pl.BlockSpec((None, PR, Cin), lambda n, j: (n, 0, 0)),
                pl.BlockSpec((9, Cin, Cb), lambda n, j: (0, 0, j)),
            ],
            out_specs=pl.BlockSpec((None, M, Cb), lambda n, j: (n, 0, j)),
            scratch_shapes=[pltpu.VMEM((PR, Cin), jnp.float32)],
        ),
        compiler_params=pltpu.CompilerParams(
            dimension_semantics=("parallel", "parallel")),
    )(x_flat, w_taps)

    # (N, H*(W+2), Cout) -> (N, H, W+2, Cout) -> drop the 2 junk columns -> NCHW
    out = out_flat.reshape(N, H, WP, Cout)[:, :, :W, :]
    return jnp.transpose(out, (0, 3, 1, 2))


if __name__ == "__main__":
    key = jax.random.PRNGKey(0)
    kx, kw = jax.random.split(key)

    # Shapes implied by the module: x432 = randn(1, 256, 14, 14),
    # Conv2d(256, 256, kernel_size=3, stride=1, padding=1, bias=False).
    x = jax.random.normal(kx, (1, 256, 14, 14), dtype=jnp.float32)
    w = jax.random.normal(kw, (256, 256, 3, 3), dtype=jnp.float32) * 0.02

    fn = jax.jit(relu_conv2d)
    out = jax.block_until_ready(fn(x, w))
    assert out.shape == (1, 256, 14, 14)

    # Reference: XLA conv on the ReLU'd input (f32).
    ref = jax.lax.conv_general_dilated(
        jnp.maximum(x, 0.0), w,
        window_strides=(1, 1), padding=((1, 1), (1, 1)),
        dimension_numbers=("NCHW", "OIHW", "NCHW"))
    max_err = float(jnp.max(jnp.abs(out - ref)))
    # bf16 MXU operands with f32 accumulation over K=2304 -> ~1e-2-level error.
    assert jnp.allclose(out, ref, atol=2e-2, rtol=2e-2), max_err

    print("KERNEL_OK")
</pallas_src>

<mosaic_0001>
module attributes {stable_mosaic.version = 11 : i64} {
  func.func @kernel(%arg0: i32, %arg1: i32, %arg2: memref<1x264x256xf32, #tpu.memory_space<vmem>>, %arg3: memref<9x256x128xbf16, #tpu.memory_space<vmem>>, %arg4: memref<1x224x128xf32, #tpu.memory_space<vmem>>, %arg5: memref<264x256xf32, #tpu.memory_space<vmem>>) attributes {dimension_semantics = [#tpu.dimension_semantics<parallel>, #tpu.dimension_semantics<parallel>], iteration_bounds = array<i64: 1, 2>, scalar_prefetch = 0 : i64, scratch_operands = 1 : i64, tpu.core_type = #tpu.core_type<tc>, window_params = [{transform_indices = @transform_0, window_bounds = array<i64: 1, 264, 256>}, {transform_indices = @transform_1, window_bounds = array<i64: 9, 256, 128>}, {transform_indices = @transform_2, window_bounds = array<i64: 1, 224, 128>}]} {
    %c0 = arith.constant 0 : index
    %c0_0 = arith.constant 0 : index
    %c0_1 = arith.constant 0 : index
    %0 = vector.load %arg2[%c0, %c0_0, %c0_1] : memref<1x264x256xf32, #tpu.memory_space<vmem>>, vector<1x264x256xf32>
    %1 = vector.shape_cast %0 : vector<1x264x256xf32> to vector<264x256xf32>
    %cst = arith.constant 0.000000e+00 : f32
    %2 = vector.broadcast %cst : f32 to vector<264x256xf32>
    %3 = arith.maximumf %1, %2 : vector<264x256xf32>
    %c0_2 = arith.constant 0 : index
    %c0_3 = arith.constant 0 : index
    %4 = vector.load %arg5[%c0_2, %c0_3] : memref<264x256xf32, #tpu.memory_space<vmem>>, vector<264x256xf32>
    tpu.vector_store %arg5[%c0_2, %c0_3], %3 {strides = array<i32>} : memref<264x256xf32, #tpu.memory_space<vmem>>, vector<264x256xf32>,
    %cst_4 = arith.constant 0.000000e+00 : f32
    %5 = vector.broadcast %cst_4 : f32 to vector<224x128xf32>
    %c0_5 = arith.constant 0 : index
    %c0_6 = arith.constant 0 : index
    %6 = vector.load %arg5[%c0_5, %c0_6] : memref<264x256xf32, #tpu.memory_space<vmem>>, vector<224x256xf32>
    %7 = arith.truncf %6 : vector<224x256xf32> to vector<224x256xbf16>
    %c0_7 = arith.constant 0 : index
    %c0_8 = arith.constant 0 : index
    %c0_9 = arith.constant 0 : index
    %8 = vector.load %arg3[%c0_7, %c0_8, %c0_9] : memref<9x256x128xbf16, #tpu.memory_space<vmem>>, vector<1x256x128xbf16>
    %9 = vector.shape_cast %8 : vector<1x256x128xbf16> to vector<256x128xbf16>
    %cst_10 = arith.constant dense<0.000000e+00> : vector<224x128xf32>
    %10 = tpu.matmul %7, %9, %cst_10 {dimension_numbers = #tpu.dot_dimension_numbers<[1], [0], [0], [1], [0, 0, 1, 1], [], []>} : vector<224x256xbf16>, vector<256x128xbf16>, vector<224x128xf32> -> vector<224x128xf32>
    %11 = arith.addf %5, %10 : vector<224x128xf32>
    %c1 = arith.constant 1 : index
    %c0_11 = arith.constant 0 : index
    %12 = vector.load %arg5[%c1, %c0_11] : memref<264x256xf32, #tpu.memory_space<vmem>>, vector<224x256xf32>
    %13 = arith.truncf %12 : vector<224x256xf32> to vector<224x256xbf16>
    %c1_12 = arith.constant 1 : index
    %c0_13 = arith.constant 0 : index
    %c0_14 = arith.constant 0 : index
    %14 = vector.load %arg3[%c1_12, %c0_13, %c0_14] : memref<9x256x128xbf16, #tpu.memory_space<vmem>>, vector<1x256x128xbf16>
    %15 = vector.shape_cast %14 : vector<1x256x128xbf16> to vector<256x128xbf16>
    %cst_15 = arith.constant dense<0.000000e+00> : vector<224x128xf32>
    %16 = tpu.matmul %13, %15, %cst_15 {dimension_numbers = #tpu.dot_dimension_numbers<[1], [0], [0], [1], [0, 0, 1, 1], [], []>} : vector<224x256xbf16>, vector<256x128xbf16>, vector<224x128xf32> -> vector<224x128xf32>
    %17 = arith.addf %11, %16 : vector<224x128xf32>
    %c2 = arith.constant 2 : index
    %c0_16 = arith.constant 0 : index
    %18 = vector.load %arg5[%c2, %c0_16] : memref<264x256xf32, #tpu.memory_space<vmem>>, vector<224x256xf32>
    %19 = arith.truncf %18 : vector<224x256xf32> to vector<224x256xbf16>
    %c2_17 = arith.constant 2 : index
    %c0_18 = arith.constant 0 : index
    %c0_19 = arith.constant 0 : index
    %20 = vector.load %arg3[%c2_17, %c0_18, %c0_19] : memref<9x256x128xbf16, #tpu.memory_space<vmem>>, vector<1x256x128xbf16>
    %21 = vector.shape_cast %20 : vector<1x256x128xbf16> to vector<256x128xbf16>
    %cst_20 = arith.constant dense<0.000000e+00> : vector<224x128xf32>
    %22 = tpu.matmul %19, %21, %cst_20 {dimension_numbers = #tpu.dot_dimension_numbers<[1], [0], [0], [1], [0, 0, 1, 1], [], []>} : vector<224x256xbf16>, vector<256x128xbf16>, vector<224x128xf32> -> vector<224x128xf32>
    %23 = arith.addf %17, %22 : vector<224x128xf32>
    %c16 = arith.constant 16 : index
    %c0_21 = arith.constant 0 : index
    %24 = vector.load %arg5[%c16, %c0_21] : memref<264x256xf32, #tpu.memory_space<vmem>>, vector<224x256xf32>
    %25 = arith.truncf %24 : vector<224x256xf32> to vector<224x256xbf16>
    %c3 = arith.constant 3 : index
    %c0_22 = arith.constant 0 : index
    %c0_23 = arith.constant 0 : index
    %26 = vector.load %arg3[%c3, %c0_22, %c0_23] : memref<9x256x128xbf16, #tpu.memory_space<vmem>>, vector<1x256x128xbf16>
    %27 = vector.shape_cast %26 : vector<1x256x128xbf16> to vector<256x128xbf16>
    %cst_24 = arith.constant dense<0.000000e+00> : vector<224x128xf32>
    %28 = tpu.matmul %25, %27, %cst_24 {dimension_numbers = #tpu.dot_dimension_numbers<[1], [0], [0], [1], [0, 0, 1, 1], [], []>} : vector<224x256xbf16>, vector<256x128xbf16>, vector<224x128xf32> -> vector<224x128xf32>
    %29 = arith.addf %23, %28 : vector<224x128xf32>
    %c17 = arith.constant 17 : index
    %c0_25 = arith.constant 0 : index
    %30 = vector.load %arg5[%c17, %c0_25] : memref<264x256xf32, #tpu.memory_space<vmem>>, vector<224x256xf32>
    %31 = arith.truncf %30 : vector<224x256xf32> to vector<224x256xbf16>
    %c4 = arith.constant 4 : index
    %c0_26 = arith.constant 0 : index
    %c0_27 = arith.constant 0 : index
    %32 = vector.load %arg3[%c4, %c0_26, %c0_27] : memref<9x256x128xbf16, #tpu.memory_space<vmem>>, vector<1x256x128xbf16>
    %33 = vector.shape_cast %32 : vector<1x256x128xbf16> to vector<256x128xbf16>
    %cst_28 = arith.constant dense<0.000000e+00> : vector<224x128xf32>
    %34 = tpu.matmul %31, %33, %cst_28 {dimension_numbers = #tpu.dot_dimension_numbers<[1], [0], [0], [1], [0, 0, 1, 1], [], []>} : vector<224x256xbf16>, vector<256x128xbf16>, vector<224x128xf32> -> vector<224x128xf32>
    %35 = arith.addf %29, %34 : vector<224x128xf32>
    %c18 = arith.constant 18 : index
    %c0_29 = arith.constant 0 : index
    %36 = vector.load %arg5[%c18, %c0_29] : memref<264x256xf32, #tpu.memory_space<vmem>>, vector<224x256xf32>
    %37 = arith.truncf %36 : vector<224x256xf32> to vector<224x256xbf16>
    %c5 = arith.constant 5 : index
    %c0_30 = arith.constant 0 : index
    %c0_31 = arith.constant 0 : index
    %38 = vector.load %arg3[%c5, %c0_30, %c0_31] : memref<9x256x128xbf16, #tpu.memory_space<vmem>>, vector<1x256x128xbf16>
    %39 = vector.shape_cast %38 : vector<1x256x128xbf16> to vector<256x128xbf16>
    %cst_32 = arith.constant dense<0.000000e+00> : vector<224x128xf32>
    %40 = tpu.matmul %37, %39, %cst_32 {dimension_numbers = #tpu.dot_dimension_numbers<[1], [0], [0], [1], [0, 0, 1, 1], [], []>} : vector<224x256xbf16>, vector<256x128xbf16>, vector<224x128xf32> -> vector<224x128xf32>
    %41 = arith.addf %35, %40 : vector<224x128xf32>
    %c32 = arith.constant 32 : index
    %c0_33 = arith.constant 0 : index
    %42 = vector.load %arg5[%c32, %c0_33] : memref<264x256xf32, #tpu.memory_space<vmem>>, vector<224x256xf32>
    %43 = arith.truncf %42 : vector<224x256xf32> to vector<224x256xbf16>
    %c6 = arith.constant 6 : index
    %c0_34 = arith.constant 0 : index
    %c0_35 = arith.constant 0 : index
    %44 = vector.load %arg3[%c6, %c0_34, %c0_35] : memref<9x256x128xbf16, #tpu.memory_space<vmem>>, vector<1x256x128xbf16>
    %45 = vector.shape_cast %44 : vector<1x256x128xbf16> to vector<256x128xbf16>
    %cst_36 = arith.constant dense<0.000000e+00> : vector<224x128xf32>
    %46 = tpu.matmul %43, %45, %cst_36 {dimension_numbers = #tpu.dot_dimension_numbers<[1], [0], [0], [1], [0, 0, 1, 1], [], []>} : vector<224x256xbf16>, vector<256x128xbf16>, vector<224x128xf32> -> vector<224x128xf32>
    %47 = arith.addf %41, %46 : vector<224x128xf32>
    %c33 = arith.constant 33 : index
    %c0_37 = arith.constant 0 : index
    %48 = vector.load %arg5[%c33, %c0_37] : memref<264x256xf32, #tpu.memory_space<vmem>>, vector<224x256xf32>
    %49 = arith.truncf %48 : vector<224x256xf32> to vector<224x256xbf16>
    %c7 = arith.constant 7 : index
    %c0_38 = arith.constant 0 : index
    %c0_39 = arith.constant 0 : index
    %50 = vector.load %arg3[%c7, %c0_38, %c0_39] : memref<9x256x128xbf16, #tpu.memory_space<vmem>>, vector<1x256x128xbf16>
    %51 = vector.shape_cast %50 : vector<1x256x128xbf16> to vector<256x128xbf16>
    %cst_40 = arith.constant dense<0.000000e+00> : vector<224x128xf32>
    %52 = tpu.matmul %49, %51, %cst_40 {dimension_numbers = #tpu.dot_dimension_numbers<[1], [0], [0], [1], [0, 0, 1, 1], [], []>} : vector<224x256xbf16>, vector<256x128xbf16>, vector<224x128xf32> -> vector<224x128xf32>
    %53 = arith.addf %47, %52 : vector<224x128xf32>
    %c34 = arith.constant 34 : index
    %c0_41 = arith.constant 0 : index
    %54 = vector.load %arg5[%c34, %c0_41] : memref<264x256xf32, #tpu.memory_space<vmem>>, vector<224x256xf32>
    %55 = arith.truncf %54 : vector<224x256xf32> to vector<224x256xbf16>
    %c8 = arith.constant 8 : index
    %c0_42 = arith.constant 0 : index
    %c0_43 = arith.constant 0 : index
    %56 = vector.load %arg3[%c8, %c0_42, %c0_43] : memref<9x256x128xbf16, #tpu.memory_space<vmem>>, vector<1x256x128xbf16>
    %57 = vector.shape_cast %56 : vector<1x256x128xbf16> to vector<256x128xbf16>
    %cst_44 = arith.constant dense<0.000000e+00> : vector<224x128xf32>
    %58 = tpu.matmul %55, %57, %cst_44 {dimension_numbers = #tpu.dot_dimension_numbers<[1], [0], [0], [1], [0, 0, 1, 1], [], []>} : vector<224x256xbf16>, vector<256x128xbf16>, vector<224x128xf32> -> vector<224x128xf32>
    %59 = arith.addf %53, %58 : vector<224x128xf32>
    %c0_45 = arith.constant 0 : index
    %c0_46 = arith.constant 0 : index
    %c0_47 = arith.constant 0 : index
    %60 = vector.load %arg4[%c0_45, %c0_46, %c0_47] : memref<1x224x128xf32, #tpu.memory_space<vmem>>, vector<1x224x128xf32>
    %61 = vector.shape_cast %60 : vector<1x224x128xf32> to vector<224x128xf32>
    %62 = vector.shape_cast %59 : vector<224x128xf32> to vector<1x224x128xf32>
    tpu.vector_store %arg4[%c0_45, %c0_46, %c0_47], %62 {strides = array<i32>} : memref<1x224x128xf32, #tpu.memory_space<vmem>>, vector<1x224x128xf32>,
    return
  }
  func.func @transform_0(%arg0: i32, %arg1: i32) -> (i32, i32, i32) {
    %c0_i32 = arith.constant 0 : i32
    %c0_i32_0 = arith.constant 0 : i32
    %c0_i32_1 = arith.constant 0 : i32
    return %arg0, %c0_i32, %c0_i32_0 : i32, i32, i32
  }
  func.func @transform_1(%arg0: i32, %arg1: i32) -> (i32, i32, i32) {
    %c0_i32 = arith.constant 0 : i32
    %c0_i32_0 = arith.constant 0 : i32
    %c0_i32_1 = arith.constant 0 : i32
    return %c0_i32, %c0_i32_0, %arg1 : i32, i32, i32
  }
  func.func @transform_2(%arg0: i32, %arg1: i32) -> (i32, i32, i32) {
    %c0_i32 = arith.constant 0 : i32
    %c0_i32_0 = arith.constant 0 : i32
    return %arg0, %c0_i32, %arg1 : i32, i32, i32
  }
}

</mosaic_0001>

<bundles_post_ra>
// kernel: relu_conv2d.1
= control target key start
LH: loop header
LB: loop body
LE: loop exit
PB: predicated region body
PF: predicated region fallthrough
CT: control target
= control target key end

     0   :  { %s7646_s9 = smov 0   ;;  %s7648_s10 = smov 0   ;;  %s9846_s0 = inlined_call_operand.vmem [shape: f32[1,264,256], index: 0, kind: input, shape index: {}]   ;;  %s9847_s1 = inlined_call_operand.vmem [shape: bf16[9,256,256], index: 1, kind: input, shape index: {}]   ;;  %s9848_s2 = inlined_call_operand.vmem [shape: f32[1,224,256], index: 2, kind: output, shape index: {}]  }
   0x1   :  { %s7650_s11 = smov 0   ;;  %s7652_s12 = smov 0  }
   0x2   :  { %s7654_s13 = smov 0  }
   0x3 LB: > { %s21_s14 = sadd.s32 1, %s7625_s12  ;;  %s6072_s15 = sadd.s32 4294967295, %s7629_s13   ;;  %s7629_s13 = sphi %s7654_s13, %s12_s13   ;;  %s7625_s12 = sphi %s7652_s12, %s9916_s12   ;;  %s7621_s11 = sphi %s7650_s11, %s9915_s11   ;;  %s7617_s10 = sphi %s7648_s10, %s9914_s10   ;;  %s7613_s9 = sphi %s7646_s9, %s9913_s9  }
   0x4   : > { %p22_p0 = scmp.ge.s32.totalorder %s21_s14, 2  ;;  %p64_p1 = scmp.ne.s32.totalorder %s7617_s10, %s7613_s9 }
   0x5   : > { %p65_p2 = scmp.eq.s32.totalorder %s7629_s13, 0  ;;  %p96_p4 = scmp.eq.s32.totalorder %s6072_s15, 1 }
   0x6   : > { %s9918_s14 = smov (%p22_p0, %s21_s14), 0  ;;  %s57_s17 = sadd.s32 1, %s7617_s10 }
   0x7   : > { %p66_p3 = por %p65_p2, %p64_p1  ;;  %s54_s16 = ssub.s32 %s7625_s12, %s9918_s14 }
   0x8   : > { %p55_p5 = scmp.eq.s32.totalorder %s54_s16, 0  ;;  %p7681_p6 = por %p96_p4, %p64_p1 }
   0x9   : > { %p6076_p7 = scmp.ge.s32.totalorder %s7629_s13, 2 }
   0xa   : > { %s7686_s19 = scalar_select %p55_p5, %s7617_s10, %s57_s17  }
   0xb   : > { %126 = sbr.rel (%p6076_p7) target bundleno = 214 (0xd6), region = 20 }
  0x12   : > { %129 = sbr.rel (!%p66_p3) target bundleno = 214 (0xd6), region = 24  ;;  %s131_s20 = sand.u32 (%p66_p3), 1, %s7617_s10  }
  0x13   : > { %s6077_s21 = sshll.u32 (%p66_p3), %s7625_s12, 2  ;;  %s7398_s22 = smul.u32 (%p66_p3), 1152, %s131_s20 }
  0x14   : > { %s7694_s25 = scalar_lea.vmem (%p66_p3), %s9847_s1, %s6077_s21 }
  0x15   : > { %v151_v0 = vld [vmem:[%s7694_s25] sm:$0xf] (%p66_p3)  ;;  %v153_v1 = vld [vmem:[%s7694_s25 + $0x8] sm:$0xf] (%p66_p3)  ;;  %v155_v2 = vld [vmem:[%s7694_s25 + $0x10] sm:$0xf] (%p66_p3) }
  0x16   : > { %v157_v3 = vld [vmem:[%s7694_s25 + $0x18] sm:$0xf] (%p66_p3)  ;;  %v159_v4 = vld [vmem:[%s7694_s25 + $0x20] sm:$0xf] (%p66_p3)  ;;  %s7701_s26 = scalar_lea.vmem (%p66_p3), [#allocation3], %s7398_s22 }
  0x17   : > { %152 = vst [vmem:[%s7701_s26] sm:$0xf] (%p66_p3), %v151_v0  ;;  %154 = vst [vmem:[%s7701_s26 + $0x4] sm:$0xf] (%p66_p3), %v153_v1  ;;  %v161_v5 = vld [vmem:[%s7694_s25 + $0x28] sm:$0xf] (%p66_p3) }
  0x18   : > { %156 = vst [vmem:[%s7701_s26 + $0x8] sm:$0xf] (%p66_p3), %v155_v2  ;;  %158 = vst [vmem:[%s7701_s26 + $0xc] sm:$0xf] (%p66_p3), %v157_v3  ;;  %v163_v6 = vld [vmem:[%s7694_s25 + $0x30] sm:$0xf] (%p66_p3) }
  0x19   : > { %160 = vst [vmem:[%s7701_s26 + $0x10] sm:$0xf] %v159_v4  ;;  %v165_v7 = vld [vmem:[%s7694_s25 + $0x38] sm:$0xf]  ;;  %162 = vst [vmem:[%s7701_s26 + $0x14] sm:$0xf] %v161_v5 }
  0x1a   : > { %164 = vst [vmem:[%s7701_s26 + $0x18] sm:$0xf] %v163_v6  ;;  %166 = vst [vmem:[%s7701_s26 + $0x1c] sm:$0xf] %v165_v7  ;;  %v167_v8 = vld [vmem:[%s7694_s25 + $0x40] sm:$0xf] }
  0x1b   : > { %v169_v9 = vld [vmem:[%s7694_s25 + $0x48] sm:$0xf]  ;;  %v171_v10 = vld [vmem:[%s7694_s25 + $0x50] sm:$0xf]  ;;  %168 = vst [vmem:[%s7701_s26 + $0x20] sm:$0xf] %v167_v8 }
  0x1c   : > { %170 = vst [vmem:[%s7701_s26 + $0x24] sm:$0xf] %v169_v9  ;;  %172 = vst [vmem:[%s7701_s26 + $0x28] sm:$0xf] %v171_v10  ;;  %v173_v11 = vld [vmem:[%s7694_s25 + $0x58] sm:$0xf] }
  0x1d   : > { %v175_v12 = vld [vmem:[%s7694_s25 + $0x60] sm:$0xf]  ;;  %v177_v13 = vld [vmem:[%s7694_s25 + $0x68] sm:$0xf]  ;;  %174 = vst [vmem:[%s7701_s26 + $0x2c] sm:$0xf] %v173_v11 }
  0x1e   : > { %176 = vst [vmem:[%s7701_s26 + $0x30] sm:$0xf] %v175_v12  ;;  %178 = vst [vmem:[%s7701_s26 + $0x34] sm:$0xf] %v177_v13  ;;  %v179_v14 = vld [vmem:[%s7694_s25 + $0x70] sm:$0xf] }
  0x1f   : > { %v181_v15 = vld [vmem:[%s7694_s25 + $0x78] sm:$0xf]  ;;  %v183_v16 = vld [vmem:[%s7694_s25 + $0x80] sm:$0xf]  ;;  %180 = vst [vmem:[%s7701_s26 + $0x38] sm:$0xf] %v179_v14 }
  0x20   : > { %182 = vst [vmem:[%s7701_s26 + $0x3c] sm:$0xf] %v181_v15  ;;  %184 = vst [vmem:[%s7701_s26 + $0x40] sm:$0xf] %v183_v16  ;;  %v185_v17 = vld [vmem:[%s7694_s25 + $0x88] sm:$0xf] }
  0x21   : > { %v187_v18 = vld [vmem:[%s7694_s25 + $0x90] sm:$0xf]  ;;  %v189_v19 = vld [vmem:[%s7694_s25 + $0x98] sm:$0xf]  ;;  %186 = vst [vmem:[%s7701_s26 + $0x44] sm:$0xf] %v185_v17 }
  0x22   : > { %188 = vst [vmem:[%s7701_s26 + $0x48] sm:$0xf] %v187_v18  ;;  %190 = vst [vmem:[%s7701_s26 + $0x4c] sm:$0xf] %v189_v19  ;;  %v191_v20 = vld [vmem:[%s7694_s25 + $0xa0] sm:$0xf] }
  0x23   : > { %v193_v21 = vld [vmem:[%s7694_s25 + $0xa8] sm:$0xf]  ;;  %v195_v22 = vld [vmem:[%s7694_s25 + $0xb0] sm:$0xf]  ;;  %192 = vst [vmem:[%s7701_s26 + $0x50] sm:$0xf] %v191_v20 }
  0x24   : > { %194 = vst [vmem:[%s7701_s26 + $0x54] sm:$0xf] %v193_v21  ;;  %196 = vst [vmem:[%s7701_s26 + $0x58] sm:$0xf] %v195_v22  ;;  %v197_v23 = vld [vmem:[%s7694_s25 + $0xb8] sm:$0xf] }
  0x25   : > { %v199_v24 = vld [vmem:[%s7694_s25 + $0xc0] sm:$0xf]  ;;  %v201_v25 = vld [vmem:[%s7694_s25 + $0xc8] sm:$0xf]  ;;  %198 = vst [vmem:[%s7701_s26 + $0x5c] sm:$0xf] %v197_v23 }
  0x26   : > { %200 = vst [vmem:[%s7701_s26 + $0x60] sm:$0xf] %v199_v24  ;;  %202 = vst [vmem:[%s7701_s26 + $0x64] sm:$0xf] %v201_v25  ;;  %v203_v26 = vld [vmem:[%s7694_s25 + $0xd0] sm:$0xf] }
  0x27   : > { %v205_v27 = vld [vmem:[%s7694_s25 + $0xd8] sm:$0xf]  ;;  %v207_v28 = vld [vmem:[%s7694_s25 + $0xe0] sm:$0xf]  ;;  %204 = vst [vmem:[%s7701_s26 + $0x68] sm:$0xf] %v203_v26 }
  0x28   : > { %206 = vst [vmem:[%s7701_s26 + $0x6c] sm:$0xf] %v205_v27  ;;  %208 = vst [vmem:[%s7701_s26 + $0x70] sm:$0xf] %v207_v28  ;;  %v209_v29 = vld [vmem:[%s7694_s25 + $0xe8] sm:$0xf] }
  0x29   : > { %v211_v30 = vld [vmem:[%s7694_s25 + $0xf0] sm:$0xf]  ;;  %v213_v31 = vld [vmem:[%s7694_s25 + $0xf8] sm:$0xf]  ;;  %210 = vst [vmem:[%s7701_s26 + $0x74] sm:$0xf] %v209_v29 }
  0x2a   : > { %212 = vst [vmem:[%s7701_s26 + $0x78] sm:$0xf] %v211_v30  ;;  %214 = vst [vmem:[%s7701_s26 + $0x7c] sm:$0xf] %v213_v31  ;;  %v215_v32 = vld [vmem:[%s7694_s25 + $0x100] sm:$0xf] }
  0x2b   : > { %v217_v33 = vld [vmem:[%s7694_s25 + $0x108] sm:$0xf]  ;;  %v219_v34 = vld [vmem:[%s7694_s25 + $0x110] sm:$0xf]  ;;  %216 = vst [vmem:[%s7701_s26 + $0x80] sm:$0xf] %v215_v32 }
  0x2c   : > { %218 = vst [vmem:[%s7701_s26 + $0x84] sm:$0xf] %v217_v33  ;;  %220 = vst [vmem:[%s7701_s26 + $0x88] sm:$0xf] %v219_v34  ;;  %v221_v35 = vld [vmem:[%s7694_s25 + $0x118] sm:$0xf] }
  0x2d   : > { %v223_v36 = vld [vmem:[%s7694_s25 + $0x120] sm:$0xf]  ;;  %v225_v37 = vld [vmem:[%s7694_s25 + $0x128] sm:$0xf]  ;;  %222 = vst [vmem:[%s7701_s26 + $0x8c] sm:$0xf] %v221_v35 }
  0x2e   : > { %224 = vst [vmem:[%s7701_s26 + $0x90] sm:$0xf] %v223_v36  ;;  %226 = vst [vmem:[%s7701_s26 + $0x94] sm:$0xf] %v225_v37  ;;  %v227_v38 = vld [vmem:[%s7694_s25 + $0x130] sm:$0xf] }
  0x2f   : > { %v229_v39 = vld [vmem:[%s7694_s25 + $0x138] sm:$0xf]  ;;  %v231_v40 = vld [vmem:[%s7694_s25 + $0x140] sm:$0xf]  ;;  %228 = vst [vmem:[%s7701_s26 + $0x98] sm:$0xf] %v227_v38 }
  0x30   : > { %230 = vst [vmem:[%s7701_s26 + $0x9c] sm:$0xf] %v229_v39  ;;  %232 = vst [vmem:[%s7701_s26 + $0xa0] sm:$0xf] %v231_v40  ;;  %v233_v41 = vld [vmem:[%s7694_s25 + $0x148] sm:$0xf] }
  0x31   : > { %v235_v42 = vld [vmem:[%s7694_s25 + $0x150] sm:$0xf]  ;;  %v237_v43 = vld [vmem:[%s7694_s25 + $0x158] sm:$0xf]  ;;  %234 = vst [vmem:[%s7701_s26 + $0xa4] sm:$0xf] %v233_v41 }
  0x32   : > { %236 = vst [vmem:[%s7701_s26 + $0xa8] sm:$0xf] %v235_v42  ;;  %238 = vst [vmem:[%s7701_s26 + $0xac] sm:$0xf] %v237_v43  ;;  %v239_v44 = vld [vmem:[%s7694_s25 + $0x160] sm:$0xf] }
  0x33   : > { %v241_v45 = vld [vmem:[%s7694_s25 + $0x168] sm:$0xf]  ;;  %v243_v46 = vld [vmem:[%s7694_s25 + $0x170] sm:$0xf]  ;;  %240 = vst [vmem:[%s7701_s26 + $0xb0] sm:$0xf] %v239_v44 }
  0x34   : > { %242 = vst [vmem:[%s7701_s26 + $0xb4] sm:$0xf] %v241_v45  ;;  %244 = vst [vmem:[%s7701_s26 + $0xb8] sm:$0xf] %v243_v46  ;;  %v245_v47 = vld [vmem:[%s7694_s25 + $0x178] sm:$0xf] }
  0x35   : > { %v247_v48 = vld [vmem:[%s7694_s25 + $0x180] sm:$0xf]  ;;  %v249_v49 = vld [vmem:[%s7694_s25 + $0x188] sm:$0xf]  ;;  %246 = vst [vmem:[%s7701_s26 + $0xbc] sm:$0xf] %v245_v47 }
  0x36   : > { %248 = vst [vmem:[%s7701_s26 + $0xc0] sm:$0xf] %v247_v48  ;;  %250 = vst [vmem:[%s7701_s26 + $0xc4] sm:$0xf] %v249_v49  ;;  %v251_v50 = vld [vmem:[%s7694_s25 + $0x190] sm:$0xf] }
  0x37   : > { %v253_v51 = vld [vmem:[%s7694_s25 + $0x198] sm:$0xf]  ;;  %v255_v52 = vld [vmem:[%s7694_s25 + $0x1a0] sm:$0xf]  ;;  %252 = vst [vmem:[%s7701_s26 + $0xc8] sm:$0xf] %v251_v50 }
  0x38   : > { %254 = vst [vmem:[%s7701_s26 + $0xcc] sm:$0xf] %v253_v51  ;;  %256 = vst [vmem:[%s7701_s26 + $0xd0] sm:$0xf] %v255_v52  ;;  %v257_v53 = vld [vmem:[%s7694_s25 + $0x1a8] sm:$0xf] }
  0x39   : > { %v259_v54 = vld [vmem:[%s7694_s25 + $0x1b0] sm:$0xf]  ;;  %v261_v55 = vld [vmem:[%s7694_s25 + $0x1b8] sm:$0xf]  ;;  %258 = vst [vmem:[%s7701_s26 + $0xd4] sm:$0xf] %v257_v53 }
  0x3a   : > { %260 = vst [vmem:[%s7701_s26 + $0xd8] sm:$0xf] %v259_v54  ;;  %262 = vst [vmem:[%s7701_s26 + $0xdc] sm:$0xf] %v261_v55  ;;  %v263_v56 = vld [vmem:[%s7694_s25 + $0x1c0] sm:$0xf] }
  0x3b   : > { %v265_v57 = vld [vmem:[%s7694_s25 + $0x1c8] sm:$0xf]  ;;  %v267_v58 = vld [vmem:[%s7694_s25 + $0x1d0] sm:$0xf]  ;;  %264 = vst [vmem:[%s7701_s26 + $0xe0] sm:$0xf] %v263_v56 }
  0x3c   : > { %266 = vst [vmem:[%s7701_s26 + $0xe4] sm:$0xf] %v265_v57  ;;  %268 = vst [vmem:[%s7701_s26 + $0xe8] sm:$0xf] %v267_v58  ;;  %v269_v59 = vld [vmem:[%s7694_s25 + $0x1d8] sm:$0xf] }
  0x3d   : > { %v271_v60 = vld [vmem:[%s7694_s25 + $0x1e0] sm:$0xf]  ;;  %v273_v61 = vld [vmem:[%s7694_s25 + $0x1e8] sm:$0xf]  ;;  %270 = vst [vmem:[%s7701_s26 + $0xec] sm:$0xf] %v269_v59 }
  0x3e   : > { %272 = vst [vmem:[%s7701_s26 + $0xf0] sm:$0xf] %v271_v60  ;;  %274 = vst [vmem:[%s7701_s26 + $0xf4] sm:$0xf] %v273_v61  ;;  %v275_v62 = vld [vmem:[%s7694_s25 + $0x1f0] sm:$0xf] }
  0x3f   : > { %v277_v63 = vld [vmem:[%s7694_s25 + $0x1f8] sm:$0xf]  ;;  %v279_v0 = vld [vmem:[%s7694_s25 + $0x200] sm:$0xf]  ;;  %276 = vst [vmem:[%s7701_s26 + $0xf8] sm:$0xf] %v275_v62 }
  0x40   : > { %278 = vst [vmem:[%s7701_s26 + $0xfc] sm:$0xf] %v277_v63  ;;  %280 = vst [vmem:[%s7701_s26 + $0x100] sm:$0xf] %v279_v0  ;;  %v281_v1 = vld [vmem:[%s7694_s25 + $0x208] sm:$0xf] }
  0x41   : > { %v283_v2 = vld [vmem:[%s7694_s25 + $0x210] sm:$0xf]  ;;  %v285_v3 = vld [vmem:[%s7694_s25 + $0x218] sm:$0xf]  ;;  %282 = vst [vmem:[%s7701_s26 + $0x104] sm:$0xf] %v281_v1 }
  0x42   : > { %284 = vst [vmem:[%s7701_s26 + $0x108] sm:$0xf] %v283_v2  ;;  %286 = vst [vmem:[%s7701_s26 + $0x10c] sm:$0xf] %v285_v3  ;;  %v287_v4 = vld [vmem:[%s7694_s25 + $0x220] sm:$0xf] }
  0x43   : > { %v289_v5 = vld [vmem:[%s7694_s25 + $0x228] sm:$0xf]  ;;  %v291_v6 = vld [vmem:[%s7694_s25 + $0x230] sm:$0xf]  ;;  %288 = vst [vmem:[%s7701_s26 + $0x110] sm:$0xf] %v287_v4 }
  0x44   : > { %290 = vst [vmem:[%s7701_s26 + $0x114] sm:$0xf] %v289_v5  ;;  %292 = vst [vmem:[%s7701_s26 + $0x118] sm:$0xf] %v291_v6  ;;  %v293_v7 = vld [vmem:[%s7694_s25 + $0x238] sm:$0xf] }
  0x45   : > { %v295_v8 = vld [vmem:[%s7694_s25 + $0x240] sm:$0xf]  ;;  %v297_v9 = vld [vmem:[%s7694_s25 + $0x248] sm:$0xf]  ;;  %294 = vst [vmem:[%s7701_s26 + $0x11c] sm:$0xf] %v293_v7 }
  0x46   : > { %296 = vst [vmem:[%s7701_s26 + $0x120] sm:$0xf] %v295_v8  ;;  %298 = vst [vmem:[%s7701_s26 + $0x124] sm:$0xf] %v297_v9  ;;  %v299_v10 = vld [vmem:[%s7694_s25 + $0x250] sm:$0xf] }
  0x47   : > { %v301_v11 = vld [vmem:[%s7694_s25 + $0x258] sm:$0xf]  ;;  %v303_v12 = vld [vmem:[%s7694_s25 + $0x260] sm:$0xf]  ;;  %300 = vst [vmem:[%s7701_s26 + $0x128] sm:$0xf] %v299_v10 }
  0x48   : > { %302 = vst [vmem:[%s7701_s26 + $0x12c] sm:$0xf] %v301_v11  ;;  %304 = vst [vmem:[%s7701_s26 + $0x130] sm:$0xf] %v303_v12  ;;  %v305_v13 = vld [vmem:[%s7694_s25 + $0x268] sm:$0xf] }
  0x49   : > { %v307_v14 = vld [vmem:[%s7694_s25 + $0x270] sm:$0xf]  ;;  %v309_v15 = vld [vmem:[%s7694_s25 + $0x278] sm:$0xf]  ;;  %306 = vst [vmem:[%s7701_s26 + $0x134] sm:$0xf] %v305_v13 }
  0x4a   : > { %308 = vst [vmem:[%s7701_s26 + $0x138] sm:$0xf] %v307_v14  ;;  %310 = vst [vmem:[%s7701_s26 + $0x13c] sm:$0xf] %v309_v15  ;;  %v311_v16 = vld [vmem:[%s7694_s25 + $0x280] sm:$0xf] }
  0x4b   : > { %v313_v17 = vld [vmem:[%s7694_s25 + $0x288] sm:$0xf]  ;;  %v315_v18 = vld [vmem:[%s7694_s25 + $0x290] sm:$0xf]  ;;  %312 = vst [vmem:[%s7701_s26 + $0x140] sm:$0xf] %v311_v16 }
  0x4c   : > { %314 = vst [vmem:[%s7701_s26 + $0x144] sm:$0xf] %v313_v17  ;;  %316 = vst [vmem:[%s7701_s26 + $0x148] sm:$0xf] %v315_v18  ;;  %v317_v19 = vld [vmem:[%s7694_s25 + $0x298] sm:$0xf] }
  0x4d   : > { %v319_v20 = vld [vmem:[%s7694_s25 + $0x2a0] sm:$0xf]  ;;  %v321_v21 = vld [vmem:[%s7694_s25 + $0x2a8] sm:$0xf]  ;;  %318 = vst [vmem:[%s7701_s26 + $0x14c] sm:$0xf] %v317_v19 }
  0x4e   : > { %320 = vst [vmem:[%s7701_s26 + $0x150] sm:$0xf] %v319_v20  ;;  %322 = vst [vmem:[%s7701_s26 + $0x154] sm:$0xf] %v321_v21  ;;  %v323_v22 = vld [vmem:[%s7694_s25 + $0x2b0] sm:$0xf] }
  0x4f   : > { %v325_v23 = vld [vmem:[%s7694_s25 + $0x2b8] sm:$0xf]  ;;  %v327_v24 = vld [vmem:[%s7694_s25 + $0x2c0] sm:$0xf]  ;;  %324 = vst [vmem:[%s7701_s26 + $0x158] sm:$0xf] %v323_v22 }
  0x50   : > { %326 = vst [vmem:[%s7701_s26 + $0x15c] sm:$0xf] %v325_v23  ;;  %328 = vst [vmem:[%s7701_s26 + $0x160] sm:$0xf] %v327_v24  ;;  %v329_v25 = vld [vmem:[%s7694_s25 + $0x2c8] sm:$0xf] }
  0x51   : > { %v331_v26 = vld [vmem:[%s7694_s25 + $0x2d0] sm:$0xf]  ;;  %v333_v27 = vld [vmem:[%s7694_s25 + $0x2d8] sm:$0xf]  ;;  %330 = vst [vmem:[%s7701_s26 + $0x164] sm:$0xf] %v329_v25 }
  0x52   : > { %332 = vst [vmem:[%s7701_s26 + $0x168] sm:$0xf] %v331_v26  ;;  %334 = vst [vmem:[%s7701_s26 + $0x16c] sm:$0xf] %v333_v27  ;;  %v335_v28 = vld [vmem:[%s7694_s25 + $0x2e0] sm:$0xf] }
  0x53   : > { %v337_v29 = vld [vmem:[%s7694_s25 + $0x2e8] sm:$0xf]  ;;  %v339_v30 = vld [vmem:[%s7694_s25 + $0x2f0] sm:$0xf]  ;;  %336 = vst [vmem:[%s7701_s26 + $0x170] sm:$0xf] %v335_v28 }
  0x54   : > { %338 = vst [vmem:[%s7701_s26 + $0x174] sm:$0xf] %v337_v29  ;;  %340 = vst [vmem:[%s7701_s26 + $0x178] sm:$0xf] %v339_v30  ;;  %v341_v31 = vld [vmem:[%s7694_s25 + $0x2f8] sm:$0xf] }
  0x55   : > { %v343_v32 = vld [vmem:[%s7694_s25 + $0x300] sm:$0xf]  ;;  %v345_v33 = vld [vmem:[%s7694_s25 + $0x308] sm:$0xf]  ;;  %342 = vst [vmem:[%s7701_s26 + $0x17c] sm:$0xf] %v341_v31 }
  0x56   : > { %344 = vst [vmem:[%s7701_s26 + $0x180] sm:$0xf] %v343_v32  ;;  %346 = vst [vmem:[%s7701_s26 + $0x184] sm:$0xf] %v345_v33  ;;  %v347_v34 = vld [vmem:[%s7694_s25 + $0x310] sm:$0xf] }
  0x57   : > { %v349_v35 = vld [vmem:[%s7694_s25 + $0x318] sm:$0xf]  ;;  %v351_v36 = vld [vmem:[%s7694_s25 + $0x320] sm:$0xf]  ;;  %348 = vst [vmem:[%s7701_s26 + $0x188] sm:$0xf] %v347_v34 }
  0x58   : > { %350 = vst [vmem:[%s7701_s26 + $0x18c] sm:$0xf] %v349_v35  ;;  %352 = vst [vmem:[%s7701_s26 + $0x190] sm:$0xf] %v351_v36  ;;  %v353_v37 = vld [vmem:[%s7694_s25 + $0x328] sm:$0xf] }
  0x59   : > { %v355_v38 = vld [vmem:[%s7694_s25 + $0x330] sm:$0xf]  ;;  %v357_v39 = vld [vmem:[%s7694_s25 + $0x338] sm:$0xf]  ;;  %354 = vst [vmem:[%s7701_s26 + $0x194] sm:$0xf] %v353_v37 }
  0x5a   : > { %356 = vst [vmem:[%s7701_s26 + $0x198] sm:$0xf] %v355_v38  ;;  %358 = vst [vmem:[%s7701_s26 + $0x19c] sm:$0xf] %v357_v39  ;;  %v359_v40 = vld [vmem:[%s7694_s25 + $0x340] sm:$0xf] }
  0x5b   : > { %v361_v41 = vld [vmem:[%s7694_s25 + $0x348] sm:$0xf]  ;;  %v363_v42 = vld [vmem:[%s7694_s25 + $0x350] sm:$0xf]  ;;  %360 = vst [vmem:[%s7701_s26 + $0x1a0] sm:$0xf] %v359_v40 }
  0x5c   : > { %362 = vst [vmem:[%s7701_s26 + $0x1a4] sm:$0xf] %v361_v41  ;;  %364 = vst [vmem:[%s7701_s26 + $0x1a8] sm:$0xf] %v363_v42  ;;  %v365_v43 = vld [vmem:[%s7694_s25 + $0x358] sm:$0xf] }
  0x5d   : > { %v367_v44 = vld [vmem:[%s7694_s25 + $0x360] sm:$0xf]  ;;  %v369_v45 = vld [vmem:[%s7694_s25 + $0x368] sm:$0xf]  ;;  %366 = vst [vmem:[%s7701_s26 + $0x1ac] sm:$0xf] %v365_v43 }
  0x5e   : > { %368 = vst [vmem:[%s7701_s26 + $0x1b0] sm:$0xf] %v367_v44  ;;  %370 = vst [vmem:[%s7701_s26 + $0x1b4] sm:$0xf] %v369_v45  ;;  %v371_v46 = vld [vmem:[%s7694_s25 + $0x370] sm:$0xf] }
  0x5f   : > { %v373_v47 = vld [vmem:[%s7694_s25 + $0x378] sm:$0xf]  ;;  %v375_v48 = vld [vmem:[%s7694_s25 + $0x380] sm:$0xf]  ;;  %372 = vst [vmem:[%s7701_s26 + $0x1b8] sm:$0xf] %v371_v46 }
  0x60   : > { %374 = vst [vmem:[%s7701_s26 + $0x1bc] sm:$0xf] %v373_v47  ;;  %376 = vst [vmem:[%s7701_s26 + $0x1c0] sm:$0xf] %v375_v48  ;;  %v377_v49 = vld [vmem:[%s7694_s25 + $0x388] sm:$0xf] }
  0x61   : > { %v379_v50 = vld [vmem:[%s7694_s25 + $0x390] sm:$0xf]  ;;  %v381_v51 = vld [vmem:[%s7694_s25 + $0x398] sm:$0xf]  ;;  %378 = vst [vmem:[%s7701_s26 + $0x1c4] sm:$0xf] %v377_v49 }
  0x62   : > { %380 = vst [vmem:[%s7701_s26 + $0x1c8] sm:$0xf] %v379_v50  ;;  %382 = vst [vmem:[%s7701_s26 + $0x1cc] sm:$0xf] %v381_v51  ;;  %v383_v52 = vld [vmem:[%s7694_s25 + $0x3a0] sm:$0xf] }
  0x63   : > { %v385_v53 = vld [vmem:[%s7694_s25 + $0x3a8] sm:$0xf]  ;;  %v387_v54 = vld [vmem:[%s7694_s25 + $0x3b0] sm:$0xf]  ;;  %384 = vst [vmem:[%s7701_s26 + $0x1d0] sm:$0xf] %v383_v52 }
  0x64   : > { %386 = vst [vmem:[%s7701_s26 + $0x1d4] sm:$0xf] %v385_v53  ;;  %388 = vst [vmem:[%s7701_s26 + $0x1d8] sm:$0xf] %v387_v54  ;;  %v389_v55 = vld [vmem:[%s7694_s25 + $0x3b8] sm:$0xf] }
  0x65   : > { %v391_v56 = vld [vmem:[%s7694_s25 + $0x3c0] sm:$0xf]  ;;  %v393_v57 = vld [vmem:[%s7694_s25 + $0x3c8] sm:$0xf]  ;;  %390 = vst [vmem:[%s7701_s26 + $0x1dc] sm:$0xf] %v389_v55 }
  0x66   : > { %392 = vst [vmem:[%s7701_s26 + $0x1e0] sm:$0xf] %v391_v56  ;;  %394 = vst [vmem:[%s7701_s26 + $0x1e4] sm:$0xf] %v393_v57  ;;  %v395_v58 = vld [vmem:[%s7694_s25 + $0x3d0] sm:$0xf] }
  0x67   : > { %v397_v59 = vld [vmem:[%s7694_s25 + $0x3d8] sm:$0xf]  ;;  %v399_v60 = vld [vmem:[%s7694_s25 + $0x3e0] sm:$0xf]  ;;  %396 = vst [vmem:[%s7701_s26 + $0x1e8] sm:$0xf] %v395_v58 }
  0x68   : > { %398 = vst [vmem:[%s7701_s26 + $0x1ec] sm:$0xf] %v397_v59  ;;  %400 = vst [vmem:[%s7701_s26 + $0x1f0] sm:$0xf] %v399_v60  ;;  %v401_v61 = vld [vmem:[%s7694_s25 + $0x3e8] sm:$0xf] }
  0x69   : > { %v403_v62 = vld [vmem:[%s7694_s25 + $0x3f0] sm:$0xf]  ;;  %v405_v63 = vld [vmem:[%s7694_s25 + $0x3f8] sm:$0xf]  ;;  %402 = vst [vmem:[%s7701_s26 + $0x1f4] sm:$0xf] %v401_v61 }
  0x6a   : > { %404 = vst [vmem:[%s7701_s26 + $0x1f8] sm:$0xf] %v403_v62  ;;  %406 = vst [vmem:[%s7701_s26 + $0x1fc] sm:$0xf] %v405_v63  ;;  %v407_v0 = vld [vmem:[%s7694_s25 + $0x400] sm:$0xf] }
  0x6b   : > { %v409_v1 = vld [vmem:[%s7694_s25 + $0x408] sm:$0xf]  ;;  %v411_v2 = vld [vmem:[%s7694_s25 + $0x410] sm:$0xf]  ;;  %408 = vst [vmem:[%s7701_s26 + $0x200] sm:$0xf] %v407_v0 }
  0x6c   : > { %410 = vst [vmem:[%s7701_s26 + $0x204] sm:$0xf] %v409_v1  ;;  %412 = vst [vmem:[%s7701_s26 + $0x208] sm:$0xf] %v411_v2  ;;  %v413_v3 = vld [vmem:[%s7694_s25 + $0x418] sm:$0xf] }
  0x6d   : > { %v415_v4 = vld [vmem:[%s7694_s25 + $0x420] sm:$0xf]  ;;  %v417_v5 = vld [vmem:[%s7694_s25 + $0x428] sm:$0xf]  ;;  %414 = vst [vmem:[%s7701_s26 + $0x20c] sm:$0xf] %v413_v3 }
  0x6e   : > { %416 = vst [vmem:[%s7701_s26 + $0x210] sm:$0xf] %v415_v4  ;;  %418 = vst [vmem:[%s7701_s26 + $0x214] sm:$0xf] %v417_v5  ;;  %v419_v6 = vld [vmem:[%s7694_s25 + $0x430] sm:$0xf] }
  0x6f   : > { %v421_v7 = vld [vmem:[%s7694_s25 + $0x438] sm:$0xf]  ;;  %v423_v8 = vld [vmem:[%s7694_s25 + $0x440] sm:$0xf]  ;;  %420 = vst [vmem:[%s7701_s26 + $0x218] sm:$0xf] %v419_v6 }
  0x70   : > { %422 = vst [vmem:[%s7701_s26 + $0x21c] sm:$0xf] %v421_v7  ;;  %424 = vst [vmem:[%s7701_s26 + $0x220] sm:$0xf] %v423_v8  ;;  %v425_v9 = vld [vmem:[%s7694_s25 + $0x448] sm:$0xf] }
  0x71   : > { %v427_v10 = vld [vmem:[%s7694_s25 + $0x450] sm:$0xf]  ;;  %v429_v11 = vld [vmem:[%s7694_s25 + $0x458] sm:$0xf]  ;;  %426 = vst [vmem:[%s7701_s26 + $0x224] sm:$0xf] %v425_v9 }
  0x72   : > { %428 = vst [vmem:[%s7701_s26 + $0x228] sm:$0xf] %v427_v10  ;;  %430 = vst [vmem:[%s7701_s26 + $0x22c] sm:$0xf] %v429_v11  ;;  %v431_v12 = vld [vmem:[%s7694_s25 + $0x460] sm:$0xf] }
  0x73   : > { %v433_v13 = vld [vmem:[%s7694_s25 + $0x468] sm:$0xf]  ;;  %v435_v14 = vld [vmem:[%s7694_s25 + $0x470] sm:$0xf]  ;;  %432 = vst [vmem:[%s7701_s26 + $0x230] sm:$0xf] %v431_v12 }
  0x74   : > { %434 = vst [vmem:[%s7701_s26 + $0x234] sm:$0xf] %v433_v13  ;;  %436 = vst [vmem:[%s7701_s26 + $0x238] sm:$0xf] %v435_v14  ;;  %v437_v15 = vld [vmem:[%s7694_s25 + $0x478] sm:$0xf] }
  0x75   : > { %v439_v16 = vld [vmem:[%s7694_s25 + $0x480] sm:$0xf]  ;;  %v441_v17 = vld [vmem:[%s7694_s25 + $0x488] sm:$0xf]  ;;  %438 = vst [vmem:[%s7701_s26 + $0x23c] sm:$0xf] %v437_v15 }
  0x76   : > { %440 = vst [vmem:[%s7701_s26 + $0x240] sm:$0xf] %v439_v16  ;;  %442 = vst [vmem:[%s7701_s26 + $0x244] sm:$0xf] %v441_v17  ;;  %v443_v18 = vld [vmem:[%s7694_s25 + $0x490] sm:$0xf] }
  0x77   : > { %v445_v19 = vld [vmem:[%s7694_s25 + $0x498] sm:$0xf]  ;;  %v447_v20 = vld [vmem:[%s7694_s25 + $0x4a0] sm:$0xf]  ;;  %444 = vst [vmem:[%s7701_s26 + $0x248] sm:$0xf] %v443_v18 }
  0x78   : > { %446 = vst [vmem:[%s7701_s26 + $0x24c] sm:$0xf] %v445_v19  ;;  %448 = vst [vmem:[%s7701_s26 + $0x250] sm:$0xf] %v447_v20  ;;  %v449_v21 = vld [vmem:[%s7694_s25 + $0x4a8] sm:$0xf] }
  0x79   : > { %v451_v22 = vld [vmem:[%s7694_s25 + $0x4b0] sm:$0xf]  ;;  %v453_v23 = vld [vmem:[%s7694_s25 + $0x4b8] sm:$0xf]  ;;  %450 = vst [vmem:[%s7701_s26 + $0x254] sm:$0xf] %v449_v21 }
  0x7a   : > { %452 = vst [vmem:[%s7701_s26 + $0x258] sm:$0xf] %v451_v22  ;;  %454 = vst [vmem:[%s7701_s26 + $0x25c] sm:$0xf] %v453_v23  ;;  %v455_v24 = vld [vmem:[%s7694_s25 + $0x4c0] sm:$0xf] }
  0x7b   : > { %v457_v25 = vld [vmem:[%s7694_s25 + $0x4c8] sm:$0xf]  ;;  %v459_v26 = vld [vmem:[%s7694_s25 + $0x4d0] sm:$0xf]  ;;  %456 = vst [vmem:[%s7701_s26 + $0x260] sm:$0xf] %v455_v24 }
  0x7c   : > { %458 = vst [vmem:[%s7701_s26 + $0x264] sm:$0xf] %v457_v25  ;;  %460 = vst [vmem:[%s7701_s26 + $0x268] sm:$0xf] %v459_v26  ;;  %v461_v27 = vld [vmem:[%s7694_s25 + $0x4d8] sm:$0xf] }
  0x7d   : > { %v463_v28 = vld [vmem:[%s7694_s25 + $0x4e0] sm:$0xf]  ;;  %v465_v29 = vld [vmem:[%s7694_s25 + $0x4e8] sm:$0xf]  ;;  %462 = vst [vmem:[%s7701_s26 + $0x26c] sm:$0xf] %v461_v27 }
  0x7e   : > { %464 = vst [vmem:[%s7701_s26 + $0x270] sm:$0xf] %v463_v28  ;;  %466 = vst [vmem:[%s7701_s26 + $0x274] sm:$0xf] %v465_v29  ;;  %v467_v30 = vld [vmem:[%s7694_s25 + $0x4f0] sm:$0xf] }
  0x7f   : > { %v469_v31 = vld [vmem:[%s7694_s25 + $0x4f8] sm:$0xf]  ;;  %v471_v32 = vld [vmem:[%s7694_s25 + $0x500] sm:$0xf]  ;;  %468 = vst [vmem:[%s7701_s26 + $0x278] sm:$0xf] %v467_v30 }
  0x80   : > { %470 = vst [vmem:[%s7701_s26 + $0x27c] sm:$0xf] %v469_v31  ;;  %472 = vst [vmem:[%s7701_s26 + $0x280] sm:$0xf] %v471_v32  ;;  %v473_v33 = vld [vmem:[%s7694_s25 + $0x508] sm:$0xf] }
  0x81   : > { %v475_v34 = vld [vmem:[%s7694_s25 + $0x510] sm:$0xf]  ;;  %v477_v35 = vld [vmem:[%s7694_s25 + $0x518] sm:$0xf]  ;;  %474 = vst [vmem:[%s7701_s26 + $0x284] sm:$0xf] %v473_v33 }
  0x82   : > { %476 = vst [vmem:[%s7701_s26 + $0x288] sm:$0xf] %v475_v34  ;;  %478 = vst [vmem:[%s7701_s26 + $0x28c] sm:$0xf] %v477_v35  ;;  %v479_v36 = vld [vmem:[%s7694_s25 + $0x520] sm:$0xf] }
  0x83   : > { %v481_v37 = vld [vmem:[%s7694_s25 + $0x528] sm:$0xf]  ;;  %v483_v38 = vld [vmem:[%s7694_s25 + $0x530] sm:$0xf]  ;;  %480 = vst [vmem:[%s7701_s26 + $0x290] sm:$0xf] %v479_v36 }
  0x84   : > { %482 = vst [vmem:[%s7701_s26 + $0x294] sm:$0xf] %v481_v37  ;;  %484 = vst [vmem:[%s7701_s26 + $0x298] sm:$0xf] %v483_v38  ;;  %v485_v39 = vld [vmem:[%s7694_s25 + $0x538] sm:$0xf] }
  0x85   : > { %v487_v40 = vld [vmem:[%s7694_s25 + $0x540] sm:$0xf]  ;;  %v489_v41 = vld [vmem:[%s7694_s25 + $0x548] sm:$0xf]  ;;  %486 = vst [vmem:[%s7701_s26 + $0x29c] sm:$0xf] %v485_v39 }
  0x86   : > { %488 = vst [vmem:[%s7701_s26 + $0x2a0] sm:$0xf] %v487_v40  ;;  %490 = vst [vmem:[%s7701_s26 + $0x2a4] sm:$0xf] %v489_v41  ;;  %v491_v42 = vld [vmem:[%s7694_s25 + $0x550] sm:$0xf] }
  0x87   : > { %v493_v43 = vld [vmem:[%s7694_s25 + $0x558] sm:$0xf]  ;;  %v495_v44 = vld [vmem:[%s7694_s25 + $0x560] sm:$0xf]  ;;  %492 = vst [vmem:[%s7701_s26 + $0x2a8] sm:$0xf] %v491_v42 }
  0x88   : > { %494 = vst [vmem:[%s7701_s26 + $0x2ac] sm:$0xf] %v493_v43  ;;  %496 = vst [vmem:[%s7701_s26 + $0x2b0] sm:$0xf] %v495_v44  ;;  %v497_v45 = vld [vmem:[%s7694_s25 + $0x568] sm:$0xf] }
  0x89   : > { %v499_v46 = vld [vmem:[%s7694_s25 + $0x570] sm:$0xf]  ;;  %v501_v47 = vld [vmem:[%s7694_s25 + $0x578] sm:$0xf]  ;;  %498 = vst [vmem:[%s7701_s26 + $0x2b4] sm:$0xf] %v497_v45 }
  0x8a   : > { %500 = vst [vmem:[%s7701_s26 + $0x2b8] sm:$0xf] %v499_v46  ;;  %502 = vst [vmem:[%s7701_s26 + $0x2bc] sm:$0xf] %v501_v47  ;;  %v503_v48 = vld [vmem:[%s7694_s25 + $0x580] sm:$0xf] }
  0x8b   : > { %v505_v49 = vld [vmem:[%s7694_s25 + $0x588] sm:$0xf]  ;;  %v507_v50 = vld [vmem:[%s7694_s25 + $0x590] sm:$0xf]  ;;  %504 = vst [vmem:[%s7701_s26 + $0x2c0] sm:$0xf] %v503_v48 }
  0x8c   : > { %506 = vst [vmem:[%s7701_s26 + $0x2c4] sm:$0xf] %v505_v49  ;;  %508 = vst [vmem:[%s7701_s26 + $0x2c8] sm:$0xf] %v507_v50  ;;  %v509_v51 = vld [vmem:[%s7694_s25 + $0x598] sm:$0xf] }
  0x8d   : > { %v511_v52 = vld [vmem:[%s7694_s25 + $0x5a0] sm:$0xf]  ;;  %v513_v53 = vld [vmem:[%s7694_s25 + $0x5a8] sm:$0xf]  ;;  %510 = vst [vmem:[%s7701_s26 + $0x2cc] sm:$0xf] %v509_v51 }
  0x8e   : > { %512 = vst [vmem:[%s7701_s26 + $0x2d0] sm:$0xf] %v511_v52  ;;  %514 = vst [vmem:[%s7701_s26 + $0x2d4] sm:$0xf] %v513_v53  ;;  %v515_v54 = vld [vmem:[%s7694_s25 + $0x5b0] sm:$0xf] }
  0x8f   : > { %v517_v55 = vld [vmem:[%s7694_s25 + $0x5b8] sm:$0xf]  ;;  %v519_v56 = vld [vmem:[%s7694_s25 + $0x5c0] sm:$0xf]  ;;  %516 = vst [vmem:[%s7701_s26 + $0x2d8] sm:$0xf] %v515_v54 }
  0x90   : > { %518 = vst [vmem:[%s7701_s26 + $0x2dc] sm:$0xf] %v517_v55  ;;  %520 = vst [vmem:[%s7701_s26 + $0x2e0] sm:$0xf] %v519_v56  ;;  %v521_v57 = vld [vmem:[%s7694_s25 + $0x5c8] sm:$0xf] }
  0x91   : > { %v523_v58 = vld [vmem:[%s7694_s25 + $0x5d0] sm:$0xf]  ;;  %v525_v59 = vld [vmem:[%s7694_s25 + $0x5d8] sm:$0xf]  ;;  %522 = vst [vmem:[%s7701_s26 + $0x2e4] sm:$0xf] %v521_v57 }
  0x92   : > { %524 = vst [vmem:[%s7701_s26 + $0x2e8] sm:$0xf] %v523_v58  ;;  %526 = vst [vmem:[%s7701_s26 + $0x2ec] sm:$0xf] %v525_v59  ;;  %v527_v60 = vld [vmem:[%s7694_s25 + $0x5e0] sm:$0xf] }
  0x93   : > { %v529_v61 = vld [vmem:[%s7694_s25 + $0x5e8] sm:$0xf]  ;;  %v531_v62 = vld [vmem:[%s7694_s25 + $0x5f0] sm:$0xf]  ;;  %528 = vst [vmem:[%s7701_s26 + $0x2f0] sm:$0xf] %v527_v60 }
  0x94   : > { %530 = vst [vmem:[%s7701_s26 + $0x2f4] sm:$0xf] %v529_v61  ;;  %532 = vst [vmem:[%s7701_s26 + $0x2f8] sm:$0xf] %v531_v62  ;;  %v533_v63 = vld [vmem:[%s7694_s25 + $0x5f8] sm:$0xf] }
  0x95   : > { %v535_v0 = vld [vmem:[%s7694_s25 + $0x600] sm:$0xf]  ;;  %v537_v1 = vld [vmem:[%s7694_s25 + $0x608] sm:$0xf]  ;;  %534 = vst [vmem:[%s7701_s26 + $0x2fc] sm:$0xf] %v533_v63 }
  0x96   : > { %536 = vst [vmem:[%s7701_s26 + $0x300] sm:$0xf] %v535_v0  ;;  %538 = vst [vmem:[%s7701_s26 + $0x304] sm:$0xf] %v537_v1  ;;  %v539_v2 = vld [vmem:[%s7694_s25 + $0x610] sm:$0xf] }
  0x97   : > { %v541_v3 = vld [vmem:[%s7694_s25 + $0x618] sm:$0xf]  ;;  %v543_v4 = vld [vmem:[%s7694_s25 + $0x620] sm:$0xf]  ;;  %540 = vst [vmem:[%s7701_s26 + $0x308] sm:$0xf] %v539_v2 }
  0x98   : > { %542 = vst [vmem:[%s7701_s26 + $0x30c] sm:$0xf] %v541_v3  ;;  %544 = vst [vmem:[%s7701_s26 + $0x310] sm:$0xf] %v543_v4  ;;  %v545_v5 = vld [vmem:[%s7694_s25 + $0x628] sm:$0xf] }
  0x99   : > { %v547_v6 = vld [vmem:[%s7694_s25 + $0x630] sm:$0xf]  ;;  %v549_v7 = vld [vmem:[%s7694_s25 + $0x638] sm:$0xf]  ;;  %546 = vst [vmem:[%s7701_s26 + $0x314] sm:$0xf] %v545_v5 }
  0x9a   : > { %548 = vst [vmem:[%s7701_s26 + $0x318] sm:$0xf] %v547_v6  ;;  %550 = vst [vmem:[%s7701_s26 + $0x31c] sm:$0xf] %v549_v7  ;;  %v551_v8 = vld [vmem:[%s7694_s25 + $0x640] sm:$0xf] }
  0x9b   : > { %v553_v9 = vld [vmem:[%s7694_s25 + $0x648] sm:$0xf]  ;;  %v555_v10 = vld [vmem:[%s7694_s25 + $0x650] sm:$0xf]  ;;  %552 = vst [vmem:[%s7701_s26 + $0x320] sm:$0xf] %v551_v8 }
  0x9c   : > { %554 = vst [vmem:[%s7701_s26 + $0x324] sm:$0xf] %v553_v9  ;;  %556 = vst [vmem:[%s7701_s26 + $0x328] sm:$0xf] %v555_v10  ;;  %v557_v11 = vld [vmem:[%s7694_s25 + $0x658] sm:$0xf] }
  0x9d   : > { %v559_v12 = vld [vmem:[%s7694_s25 + $0x660] sm:$0xf]  ;;  %v561_v13 = vld [vmem:[%s7694_s25 + $0x668] sm:$0xf]  ;;  %558 = vst [vmem:[%s7701_s26 + $0x32c] sm:$0xf] %v557_v11 }
  0x9e   : > { %560 = vst [vmem:[%s7701_s26 + $0x330] sm:$0xf] %v559_v12  ;;  %562 = vst [vmem:[%s7701_s26 + $0x334] sm:$0xf] %v561_v13  ;;  %v563_v14 = vld [vmem:[%s7694_s25 + $0x670] sm:$0xf] }
  0x9f   : > { %v565_v15 = vld [vmem:[%s7694_s25 + $0x678] sm:$0xf]  ;;  %v567_v16 = vld [vmem:[%s7694_s25 + $0x680] sm:$0xf]  ;;  %564 = vst [vmem:[%s7701_s26 + $0x338] sm:$0xf] %v563_v14 }
  0xa0   : > { %566 = vst [vmem:[%s7701_s26 + $0x33c] sm:$0xf] %v565_v15  ;;  %568 = vst [vmem:[%s7701_s26 + $0x340] sm:$0xf] %v567_v16  ;;  %v569_v17 = vld [vmem:[%s7694_s25 + $0x688] sm:$0xf] }
  0xa1   : > { %v571_v18 = vld [vmem:[%s7694_s25 + $0x690] sm:$0xf]  ;;  %v573_v19 = vld [vmem:[%s7694_s25 + $0x698] sm:$0xf]  ;;  %570 = vst [vmem:[%s7701_s26 + $0x344] sm:$0xf] %v569_v17 }
  0xa2   : > { %572 = vst [vmem:[%s7701_s26 + $0x348] sm:$0xf] %v571_v18  ;;  %574 = vst [vmem:[%s7701_s26 + $0x34c] sm:$0xf] %v573_v19  ;;  %v575_v20 = vld [vmem:[%s7694_s25 + $0x6a0] sm:$0xf] }
  0xa3   : > { %v577_v21 = vld [vmem:[%s7694_s25 + $0x6a8] sm:$0xf]  ;;  %v579_v22 = vld [vmem:[%s7694_s25 + $0x6b0] sm:$0xf]  ;;  %576 = vst [vmem:[%s7701_s26 + $0x350] sm:$0xf] %v575_v20 }
  0xa4   : > { %578 = vst [vmem:[%s7701_s26 + $0x354] sm:$0xf] %v577_v21  ;;  %580 = vst [vmem:[%s7701_s26 + $0x358] sm:$0xf] %v579_v22  ;;  %v581_v23 = vld [vmem:[%s7694_s25 + $0x6b8] sm:$0xf] }
  0xa5   : > { %v583_v24 = vld [vmem:[%s7694_s25 + $0x6c0] sm:$0xf]  ;;  %v585_v25 = vld [vmem:[%s7694_s25 + $0x6c8] sm:$0xf]  ;;  %582 = vst [vmem:[%s7701_s26 + $0x35c] sm:$0xf] %v581_v23 }
  0xa6   : > { %584 = vst [vmem:[%s7701_s26 + $0x360] sm:$0xf] %v583_v24  ;;  %586 = vst [vmem:[%s7701_s26 + $0x364] sm:$0xf] %v585_v25  ;;  %v587_v26 = vld [vmem:[%s7694_s25 + $0x6d0] sm:$0xf] }
  0xa7   : > { %v589_v27 = vld [vmem:[%s7694_s25 + $0x6d8] sm:$0xf]  ;;  %v591_v28 = vld [vmem:[%s7694_s25 + $0x6e0] sm:$0xf]  ;;  %588 = vst [vmem:[%s7701_s26 + $0x368] sm:$0xf] %v587_v26 }
  0xa8   : > { %590 = vst [vmem:[%s7701_s26 + $0x36c] sm:$0xf] %v589_v27  ;;  %592 = vst [vmem:[%s7701_s26 + $0x370] sm:$0xf] %v591_v28  ;;  %v593_v29 = vld [vmem:[%s7694_s25 + $0x6e8] sm:$0xf] }
  0xa9   : > { %v595_v30 = vld [vmem:[%s7694_s25 + $0x6f0] sm:$0xf]  ;;  %v597_v31 = vld [vmem:[%s7694_s25 + $0x6f8] sm:$0xf]  ;;  %594 = vst [vmem:[%s7701_s26 + $0x374] sm:$0xf] %v593_v29 }
  0xaa   : > { %596 = vst [vmem:[%s7701_s26 + $0x378] sm:$0xf] %v595_v30  ;;  %598 = vst [vmem:[%s7701_s26 + $0x37c] sm:$0xf] %v597_v31  ;;  %v599_v32 = vld [vmem:[%s7694_s25 + $0x700] sm:$0xf] }
  0xab   : > { %v601_v33 = vld [vmem:[%s7694_s25 + $0x708] sm:$0xf]  ;;  %v603_v34 = vld [vmem:[%s7694_s25 + $0x710] sm:$0xf]  ;;  %600 = vst [vmem:[%s7701_s26 + $0x380] sm:$0xf] %v599_v32 }
  0xac   : > { %602 = vst [vmem:[%s7701_s26 + $0x384] sm:$0xf] %v601_v33  ;;  %604 = vst [vmem:[%s7701_s26 + $0x388] sm:$0xf] %v603_v34  ;;  %v605_v35 = vld [vmem:[%s7694_s25 + $0x718] sm:$0xf] }
  0xad   : > { %v607_v36 = vld [vmem:[%s7694_s25 + $0x720] sm:$0xf]  ;;  %v609_v37 = vld [vmem:[%s7694_s25 + $0x728] sm:$0xf]  ;;  %606 = vst [vmem:[%s7701_s26 + $0x38c] sm:$0xf] %v605_v35 }
  0xae   : > { %608 = vst [vmem:[%s7701_s26 + $0x390] sm:$0xf] %v607_v36  ;;  %610 = vst [vmem:[%s7701_s26 + $0x394] sm:$0xf] %v609_v37  ;;  %v611_v38 = vld [vmem:[%s7694_s25 + $0x730] sm:$0xf] }
  0xaf   : > { %v613_v39 = vld [vmem:[%s7694_s25 + $0x738] sm:$0xf]  ;;  %v615_v40 = vld [vmem:[%s7694_s25 + $0x740] sm:$0xf]  ;;  %612 = vst [vmem:[%s7701_s26 + $0x398] sm:$0xf] %v611_v38 }
  0xb0   : > { %614 = vst [vmem:[%s7701_s26 + $0x39c] sm:$0xf] %v613_v39  ;;  %616 = vst [vmem:[%s7701_s26 + $0x3a0] sm:$0xf] %v615_v40  ;;  %v617_v41 = vld [vmem:[%s7694_s25 + $0x748] sm:$0xf] }
  0xb1   : > { %v619_v42 = vld [vmem:[%s7694_s25 + $0x750] sm:$0xf]  ;;  %v621_v43 = vld [vmem:[%s7694_s25 + $0x758] sm:$0xf]  ;;  %618 = vst [vmem:[%s7701_s26 + $0x3a4] sm:$0xf] %v617_v41 }
  0xb2   : > { %620 = vst [vmem:[%s7701_s26 + $0x3a8] sm:$0xf] %v619_v42  ;;  %622 = vst [vmem:[%s7701_s26 + $0x3ac] sm:$0xf] %v621_v43  ;;  %v623_v44 = vld [vmem:[%s7694_s25 + $0x760] sm:$0xf] }
  0xb3   : > { %v625_v45 = vld [vmem:[%s7694_s25 + $0x768] sm:$0xf]  ;;  %v627_v46 = vld [vmem:[%s7694_s25 + $0x770] sm:$0xf]  ;;  %624 = vst [vmem:[%s7701_s26 + $0x3b0] sm:$0xf] %v623_v44 }
  0xb4   : > { %626 = vst [vmem:[%s7701_s26 + $0x3b4] sm:$0xf] %v625_v45  ;;  %628 = vst [vmem:[%s7701_s26 + $0x3b8] sm:$0xf] %v627_v46  ;;  %v629_v47 = vld [vmem:[%s7694_s25 + $0x778] sm:$0xf] }
  0xb5   : > { %v631_v48 = vld [vmem:[%s7694_s25 + $0x780] sm:$0xf]  ;;  %v633_v49 = vld [vmem:[%s7694_s25 + $0x788] sm:$0xf]  ;;  %630 = vst [vmem:[%s7701_s26 + $0x3bc] sm:$0xf] %v629_v47 }
  0xb6   : > { %632 = vst [vmem:[%s7701_s26 + $0x3c0] sm:$0xf] %v631_v48  ;;  %634 = vst [vmem:[%s7701_s26 + $0x3c4] sm:$0xf] %v633_v49  ;;  %v635_v50 = vld [vmem:[%s7694_s25 + $0x790] sm:$0xf] }
  0xb7   : > { %v637_v51 = vld [vmem:[%s7694_s25 + $0x798] sm:$0xf]  ;;  %v639_v52 = vld [vmem:[%s7694_s25 + $0x7a0] sm:$0xf]  ;;  %636 = vst [vmem:[%s7701_s26 + $0x3c8] sm:$0xf] %v635_v50 }
  0xb8   : > { %638 = vst [vmem:[%s7701_s26 + $0x3cc] sm:$0xf] %v637_v51  ;;  %640 = vst [vmem:[%s7701_s26 + $0x3d0] sm:$0xf] %v639_v52  ;;  %v641_v53 = vld [vmem:[%s7694_s25 + $0x7a8] sm:$0xf] }
  0xb9   : > { %v643_v54 = vld [vmem:[%s7694_s25 + $0x7b0] sm:$0xf]  ;;  %v645_v55 = vld [vmem:[%s7694_s25 + $0x7b8] sm:$0xf]  ;;  %642 = vst [vmem:[%s7701_s26 + $0x3d4] sm:$0xf] %v641_v53 }
  0xba   : > { %644 = vst [vmem:[%s7701_s26 + $0x3d8] sm:$0xf] %v643_v54  ;;  %646 = vst [vmem:[%s7701_s26 + $0x3dc] sm:$0xf] %v645_v55  ;;  %v647_v56 = vld [vmem:[%s7694_s25 + $0x7c0] sm:$0xf] }
  0xbb   : > { %v649_v57 = vld [vmem:[%s7694_s25 + $0x7c8] sm:$0xf]  ;;  %v651_v58 = vld [vmem:[%s7694_s25 + $0x7d0] sm:$0xf]  ;;  %648 = vst [vmem:[%s7701_s26 + $0x3e0] sm:$0xf] %v647_v56 }
  0xbc   : > { %650 = vst [vmem:[%s7701_s26 + $0x3e4] sm:$0xf] %v649_v57  ;;  %652 = vst [vmem:[%s7701_s26 + $0x3e8] sm:$0xf] %v651_v58  ;;  %v653_v59 = vld [vmem:[%s7694_s25 + $0x7d8] sm:$0xf] }
  0xbd   : > { %v655_v60 = vld [vmem:[%s7694_s25 + $0x7e0] sm:$0xf]  ;;  %v657_v61 = vld [vmem:[%s7694_s25 + $0x7e8] sm:$0xf]  ;;  %654 = vst [vmem:[%s7701_s26 + $0x3ec] sm:$0xf] %v653_v59 }
  0xbe   : > { %656 = vst [vmem:[%s7701_s26 + $0x3f0] sm:$0xf] %v655_v60  ;;  %658 = vst [vmem:[%s7701_s26 + $0x3f4] sm:$0xf] %v657_v61  ;;  %v659_v62 = vld [vmem:[%s7694_s25 + $0x7f0] sm:$0xf] }
  0xbf   : > { %v661_v63 = vld [vmem:[%s7694_s25 + $0x7f8] sm:$0xf]  ;;  %v663_v0 = vld [vmem:[%s7694_s25 + $0x800] sm:$0xf]  ;;  %660 = vst [vmem:[%s7701_s26 + $0x3f8] sm:$0xf] %v659_v62 }
  0xc0   : > { %662 = vst [vmem:[%s7701_s26 + $0x3fc] sm:$0xf] %v661_v63  ;;  %664 = vst [vmem:[%s7701_s26 + $0x400] sm:$0xf] %v663_v0  ;;  %v665_v1 = vld [vmem:[%s7694_s25 + $0x808] sm:$0xf] }
  0xc1   : > { %v667_v2 = vld [vmem:[%s7694_s25 + $0x810] sm:$0xf]  ;;  %v669_v3 = vld [vmem:[%s7694_s25 + $0x818] sm:$0xf]  ;;  %666 = vst [vmem:[%s7701_s26 + $0x404] sm:$0xf] %v665_v1 }
  0xc2   : > { %668 = vst [vmem:[%s7701_s26 + $0x408] sm:$0xf] %v667_v2  ;;  %670 = vst [vmem:[%s7701_s26 + $0x40c] sm:$0xf] %v669_v3  ;;  %v671_v4 = vld [vmem:[%s7694_s25 + $0x820] sm:$0xf] }
  0xc3   : > { %v673_v5 = vld [vmem:[%s7694_s25 + $0x828] sm:$0xf]  ;;  %v675_v6 = vld [vmem:[%s7694_s25 + $0x830] sm:$0xf]  ;;  %672 = vst [vmem:[%s7701_s26 + $0x410] sm:$0xf] %v671_v4 }
  0xc4   : > { %674 = vst [vmem:[%s7701_s26 + $0x414] sm:$0xf] %v673_v5  ;;  %676 = vst [vmem:[%s7701_s26 + $0x418] sm:$0xf] %v675_v6  ;;  %v677_v7 = vld [vmem:[%s7694_s25 + $0x838] sm:$0xf] }
  0xc5   : > { %v679_v8 = vld [vmem:[%s7694_s25 + $0x840] sm:$0xf]  ;;  %v681_v9 = vld [vmem:[%s7694_s25 + $0x848] sm:$0xf]  ;;  %678 = vst [vmem:[%s7701_s26 + $0x41c] sm:$0xf] %v677_v7 }
  0xc6   : > { %680 = vst [vmem:[%s7701_s26 + $0x420] sm:$0xf] %v679_v8  ;;  %682 = vst [vmem:[%s7701_s26 + $0x424] sm:$0xf] %v681_v9  ;;  %v683_v10 = vld [vmem:[%s7694_s25 + $0x850] sm:$0xf] }
  0xc7   : > { %v685_v11 = vld [vmem:[%s7694_s25 + $0x858] sm:$0xf]  ;;  %v687_v12 = vld [vmem:[%s7694_s25 + $0x860] sm:$0xf]  ;;  %684 = vst [vmem:[%s7701_s26 + $0x428] sm:$0xf] %v683_v10 }
  0xc8   : > { %686 = vst [vmem:[%s7701_s26 + $0x42c] sm:$0xf] %v685_v11  ;;  %688 = vst [vmem:[%s7701_s26 + $0x430] sm:$0xf] %v687_v12  ;;  %v689_v13 = vld [vmem:[%s7694_s25 + $0x868] sm:$0xf] }
  0xc9   : > { %v691_v14 = vld [vmem:[%s7694_s25 + $0x870] sm:$0xf]  ;;  %v693_v15 = vld [vmem:[%s7694_s25 + $0x878] sm:$0xf]  ;;  %690 = vst [vmem:[%s7701_s26 + $0x434] sm:$0xf] %v689_v13 }
  0xca   : > { %692 = vst [vmem:[%s7701_s26 + $0x438] sm:$0xf] %v691_v14  ;;  %694 = vst [vmem:[%s7701_s26 + $0x43c] sm:$0xf] %v693_v15  ;;  %v695_v16 = vld [vmem:[%s7694_s25 + $0x880] sm:$0xf] }
  0xcb   : > { %v697_v17 = vld [vmem:[%s7694_s25 + $0x888] sm:$0xf]  ;;  %v699_v18 = vld [vmem:[%s7694_s25 + $0x890] sm:$0xf]  ;;  %696 = vst [vmem:[%s7701_s26 + $0x440] sm:$0xf] %v695_v16 }
  0xcc   : > { %698 = vst [vmem:[%s7701_s26 + $0x444] sm:$0xf] %v697_v17  ;;  %700 = vst [vmem:[%s7701_s26 + $0x448] sm:$0xf] %v699_v18  ;;  %v701_v19 = vld [vmem:[%s7694_s25 + $0x898] sm:$0xf] }
  0xcd   : > { %v703_v20 = vld [vmem:[%s7694_s25 + $0x8a0] sm:$0xf]  ;;  %v705_v21 = vld [vmem:[%s7694_s25 + $0x8a8] sm:$0xf]  ;;  %702 = vst [vmem:[%s7701_s26 + $0x44c] sm:$0xf] %v701_v19 }
  0xce   : > { %704 = vst [vmem:[%s7701_s26 + $0x450] sm:$0xf] %v703_v20  ;;  %706 = vst [vmem:[%s7701_s26 + $0x454] sm:$0xf] %v705_v21  ;;  %v707_v22 = vld [vmem:[%s7694_s25 + $0x8b0] sm:$0xf] }
  0xcf   : > { %v709_v23 = vld [vmem:[%s7694_s25 + $0x8b8] sm:$0xf]  ;;  %v711_v24 = vld [vmem:[%s7694_s25 + $0x8c0] sm:$0xf]  ;;  %708 = vst [vmem:[%s7701_s26 + $0x458] sm:$0xf] %v707_v22 }
  0xd0   : > { %710 = vst [vmem:[%s7701_s26 + $0x45c] sm:$0xf] %v709_v23  ;;  %712 = vst [vmem:[%s7701_s26 + $0x460] sm:$0xf] %v711_v24  ;;  %v713_v25 = vld [vmem:[%s7694_s25 + $0x8c8] sm:$0xf] }
  0xd1   : > { %v715_v26 = vld [vmem:[%s7694_s25 + $0x8d0] sm:$0xf]  ;;  %v717_v27 = vld [vmem:[%s7694_s25 + $0x8d8] sm:$0xf]  ;;  %714 = vst [vmem:[%s7701_s26 + $0x464] sm:$0xf] %v713_v25 }
  0xd2   : > { %716 = vst [vmem:[%s7701_s26 + $0x468] sm:$0xf] %v715_v26  ;;  %718 = vst [vmem:[%s7701_s26 + $0x46c] sm:$0xf] %v717_v27  ;;  %v719_v28 = vld [vmem:[%s7694_s25 + $0x8e0] sm:$0xf] }
  0xd3   : > { %v721_v29 = vld [vmem:[%s7694_s25 + $0x8e8] sm:$0xf]  ;;  %v723_v30 = vld [vmem:[%s7694_s25 + $0x8f0] sm:$0xf]  ;;  %720 = vst [vmem:[%s7701_s26 + $0x470] sm:$0xf] %v719_v28 }
  0xd4   : > { %722 = vst [vmem:[%s7701_s26 + $0x474] sm:$0xf] %v721_v29  ;;  %724 = vst [vmem:[%s7701_s26 + $0x478] sm:$0xf] %v723_v30  ;;  %v725_v31 = vld [vmem:[%s7694_s25 + $0x8f8] sm:$0xf] }
  0xd5   : > { %726 = vst [vmem:[%s7701_s26 + $0x47c] sm:$0xf] %v725_v31 }
  0xd6 PF: > { %p6078_p8 = scmp.ge.s32.totalorder %s7629_s13, 1  ;;  %p1324_p9 = scmp.lt.s32.totalorder %s7629_s13, 3 }
  0xd8   : > { %p1325_p10 = pnand %p6078_p8, %p1324_p9 }
  0xda   : > { %1328 = sbr.rel (%p1325_p10) target bundleno = 991 (0x3df), region = 65 }
  0xe1   : > { %s1331_s27 = sand.u32 1, %s7613_s9   ;;  %v1363_v32 = vld [vmem:[%s9846_s0 + $0x8] sm:$0xff]  ;;  %v8283_v33 = vld [vmem:[%s9846_s0 + $0x18] sm:$0xff]  ;;  %v1362_v48 = vld [vmem:[%s9846_s0] sm:$0xff]  ;;  %vm1717_vm0 = vsmask.f32 7424 }
  0xe2   : > { %v1367_v34 = vld [vmem:[%s9846_s0 + $0x28] sm:$0xff]  ;;  %s7399_s6 = smul.u32 1152, %s1331_s27  ;;  %v1369_v35 = vld [vmem:[%s9846_s0 + $0x38] sm:$0xff]  ;;  %v1429_v36 = vmax.f32 %v1363_v32, 0.0  ;;  %v1431_v37 = vmax.f32 %v8283_v33, 0.0  ;;  %v8314_v49 = vld [vmem:[%s9846_s0 + $0x10] sm:$0xff] }
  0xe3   : > { %v1433_v38 = vmax.f32 %v1367_v34, 0.0  ;;  %v1391_v39 = vld [vmem:[%s9846_s0 + $0xe8] sm:$0xff]  ;;  %v1435_v40 = vmax.f32 %v1369_v35, 0.0  ;;  %v1393_v41 = vld [vmem:[%s9846_s0 + $0xf8] sm:$0xff]  ;;  %v1428_v51 = vmax.f32 %v1362_v48, 0.0  ;;  %v1430_v54 = vmax.f32 %v8314_v49, 0.0 }
  0xe4   : > { %v1395_v42 = vld [vmem:[%s9846_s0 + $0x108] sm:$0xff]  ;;  %v1397_v43 = vld [vmem:[%s9846_s0 + $0x118] sm:$0xff]  ;;  %v1457_v44 = vmax.f32 %v1391_v39, 0.0  ;;  %1495 = vst [vmem:[#allocation2 + $0x8] sm:$0xff] %v1429_v36  ;;  %1497 = vst [vmem:[#allocation2 + $0x18] sm:$0xff] %v1431_v37  ;;  %v1459_v45 = vmax.f32 %v1393_v41, 0.0 }
  0xe5   : > { %1499 = vst [vmem:[#allocation2 + $0x28] sm:$0xff] %v1433_v38  ;;  %v1461_v46 = vmax.f32 %v1395_v42, 0.0  ;;  %v1463_v47 = vmax.f32 %v1397_v43, 0.0  ;;  %s8316_s30 = scalar_lea.vmem [#allocation3], %s7399_s6  ;;  %1501 = vst [vmem:[#allocation2 + $0x38] sm:$0xff] %v1435_v40  ;;  %v8335_v1 = vpack.c.bf16 %v1435_v40, %v1433_v38  ;;  %v1366_v12 = vld [vmem:[%s9846_s0 + $0x20] sm:$0xff] }
  0xe6   : > { %v7441_v50 = vld [vmem:[%s8316_s30 + $0xc0] sm:$0xff]   ;;  %1523 = vst [vmem:[#allocation2 + $0xe8] sm:$0xff] %v1457_v44  ;;  %1525 = vst [vmem:[#allocation2 + $0xf8] sm:$0xff] %v1459_v45  ;;  %v8320_v53 = vpack.c.bf16 %v1459_v45, %v1457_v44  ;;  %v7443_v55 = vld [vmem:[%s8316_s30 + $0xc8] sm:$0xff]   ;;  %v1432_v16 = vmax.f32 %v1366_v12, 0.0  ;;  %vm2531_vm1 = vcmask 1046528  }
  0xe7   : > { %v7442_v52 = vld [vmem:[%s8316_s30 + $0x80] sm:$0xff]   ;;  %1527 = vst [vmem:[#allocation2 + $0x108] sm:$0xff] %v1461_v46  ;;  %1529 = vst [vmem:[#allocation2 + $0x118] sm:$0xff] %v1463_v47  ;;  %6482 = vmatprep.subr.bf16.mxu0 %v7441_v50  ;;  %7382 = vmatprep.subr.bf16.mxu1 %v7441_v50  ;;  %v7444_v56 = vld [vmem:[%s8316_s30 + $0x88] sm:$0xff]   ;;  %v8325_v57 = vpack.c.bf16 %v1463_v47, %v1461_v46  ;;  %v1738_v7 = vshll.u32 %v8335_v1, 16  ;;  %v1750_v14 = vshrl.u32 %v8335_v1, 16 }
  0xe8   : > { %1494 = vst [vmem:[#allocation2] sm:$0xff] %v1428_v51  ;;  %6483 = vmatpush3.bf16.msra.mxu0 %v7442_v52  ;;  %7390 = vmatpush3.bf16.msra.mxu1 %v7442_v52  ;;  %v1834_v58 = vshll.u32 %v8320_v53, 16  ;;  %1496 = vst [vmem:[#allocation2 + $0x10] sm:$0xff] %v1430_v54  ;;  %v7445_v59 = vld [vmem:[%s8316_s30 + $0xd0] sm:$0xff]   ;;  %v1846_v61 = vshrl.u32 %v8320_v53, 16  ;;  %v7447_v0 = vld [vmem:[%s8316_s30 + $0xd8] sm:$0xff]  }
  0xe9   : > { %6484 = vmatprep.subr.bf16.mxu0 %v7443_v55  ;;  %7383 = vmatprep.subr.bf16.mxu1 %v7443_v55  ;;  %v7446_v62 = vld [vmem:[%s8316_s30 + $0x90] sm:$0xff]   ;;  %v1850_v63 = vshll.u32 %v8325_v57, 16  ;;  %v7448_v4 = vld [vmem:[%s8316_s30 + $0x98] sm:$0xff]   ;;  %v7449_v6 = vld [vmem:[%s8316_s30 + $0xe0] sm:$0xff]   ;;  %v8347_v11 = vrot.slane %v1738_v7, 1  ;;  %1498 = vst [vmem:[#allocation2 + $0x20] sm:$0xff] %v1432_v16 }
  0xea   : > { %v8329_v60 = vrot.slane %v1834_v58, 1  ;;  %v7450_v8 = vld [vmem:[%s8316_s30 + $0xa0] sm:$0xff]   ;;  %v7451_v9 = vld [vmem:[%s8316_s30 + $0xe8] sm:$0xff]   ;;  %v1390_v19 = vld [vmem:[%s9846_s0 + $0xe0] sm:$0xff]  ;;  %v1862_v45 = vshrl.u32 %v8325_v57, 16  ;;  %s7400_s6 = smul.u32 224, %s1331_s27 }
  0xeb   : > { %v8338_v3 = vrot.slane %v1850_v63, 1  ;;  %v1677_v10 = vld [vmem:[#allocation2 + $0x8] sm:$0xfe]  ;;  %v1368_v13 = vld [vmem:[%s9846_s0 + $0x30] sm:$0xff]  ;;  %v1394_v22 = vld [vmem:[%s9846_s0 + $0x100] sm:$0xff]  ;;  %v1456_v24 = vmax.f32 %v1390_v19, 0.0  ;;  %v1752_v19 = vor.u32 %v1750_v14, %v8347_v11 }
  0xec   : > { %6485 = vmatpush3.bf16.msra.mxu0 %v7444_v56  ;;  %7391 = vmatpush3.bf16.msra.mxu1 %v7444_v56  ;;  %v1848_v2 = vor.u32 %v1846_v61, %v8329_v60  ;;  %v1681_v15 = vpack.c.bf16 %v1431_v37, %v1677_v10  ;;  %v1434_v17 = vmax.f32 %v1368_v13, 0.0  ;;  %v1392_v20 = vld [vmem:[%s9846_s0 + $0xf0] sm:$0xff]  ;;  %v7452_v26 = vld [vmem:[%s8316_s30 + $0xa8] sm:$0xff]   ;;  %v1460_v30 = vmax.f32 %v1394_v22, 0.0  ;;  %v7453_v31 = vld [vmem:[%s8316_s30 + $0xf0] sm:$0xff]   ;;  %s9711_s7 = scalar_lea.vmem [#allocation4], %s7400_s6 }
  0xed   : > { %6486 = vmatprep.subr.bf16.mxu0 %v7445_v59  ;;  %7384 = vmatprep.subr.bf16.mxu1 %v7445_v59  ;;  %v1396_v23 = vld [vmem:[%s9846_s0 + $0x110] sm:$0xff]  ;;  %v1458_v25 = vmax.f32 %v1392_v20, 0.0  ;;  %1522 = vst [vmem:[#allocation2 + $0xe0] sm:$0xff] %v1456_v24  ;;  %v7454_v38 = vld [vmem:[%s8316_s30 + $0xb0] sm:$0xff]   ;;  %v7455_v43 = vld [vmem:[%s8316_s30 + $0xf8] sm:$0xff]   ;;  %s6479_s9 = sshll.u32 (%p7681_p6), %s7621_s11, 3 }
  0xee   : > { %v1853_v5 = vsel %vm1717_vm0, %v1848_v2, %v8338_v3  ;;  %v1731_v27 = vshrl.u32 %v1681_v15, 16  ;;  %v1733_v28 = vshll.u32 %v1681_v15, 16  ;;  %1500 = vst [vmem:[#allocation2 + $0x30] sm:$0xff] %v1434_v17  ;;  %v8371_v29 = vpack.c.bf16 %v1434_v17, %v1432_v16  ;;  %1526 = vst [vmem:[#allocation2 + $0x100] sm:$0xff] %v1460_v30  ;;  %v1371_v49 = vld [vmem:[%s9846_s0 + $0x48] sm:$0xff]  ;;  %v1373_v50 = vld [vmem:[%s9846_s0 + $0x58] sm:$0xff]  ;;  %s9776_s15 = scalar_lea.vmem (%p7681_p6), %s9848_s2, %s6479_s9 }
  0xef   : > { %2162 = vmatprep.mubr.bf16.mxu1 %v1853_v5  ;;  %v1676_v18 = vld [vmem:[#allocation2] sm:$0xfe]  ;;  %v1462_v34 = vmax.f32 %v1396_v23, 0.0  ;;  %1524 = vst [vmem:[#allocation2 + $0xf0] sm:$0xff] %v1458_v25  ;;  %v8374_v35 = vpack.c.bf16 %v1458_v25, %v1456_v24  ;;  %v1399_v51 = vld [vmem:[%s9846_s0 + $0x128] sm:$0xff]  ;;  %v1437_v55 = vmax.f32 %v1371_v49, 0.0  ;;  %v1864_v23 = vor.u32 %v1862_v45, %v8338_v3 }
  0xf0   : > { %6487 = vmatpush3.bf16.msra.mxu0 %v7446_v62  ;;  %7392 = vmatpush3.bf16.msra.mxu1 %v7446_v62  ;;  %v1680_v21 = vpack.c.bf16 %v1430_v54, %v1676_v18  ;;  %v1735_v36 = vrot.slane %v1733_v28, 1  ;;  %v1726_v37 = vshll.u32 %v8371_v29, 16  ;;  %v7456_v52 = vld [vmem:[%s8316_s30 + $0xb8] sm:$0xff]   ;;  %v1439_v56 = vmax.f32 %v1373_v50, 0.0  ;;  %v1401_v58 = vld [vmem:[%s9846_s0 + $0x138] sm:$0xff]  ;;  %v7457_v63 = vld [vmem:[%s8316_s30 + $0x40] sm:$0xff]  }
  0xf1   : > { %6488 = vmatprep.subr.bf16.mxu0 %v7447_v0  ;;  %7385 = vmatprep.subr.bf16.mxu1 %v7447_v0  ;;  %1528 = vst [vmem:[#allocation2 + $0x110] sm:$0xff] %v1462_v34  ;;  %v8378_v40 = vpack.c.bf16 %v1462_v34, %v1460_v30  ;;  %v1826_v41 = vshll.u32 %v8374_v35, 16  ;;  %v1838_v42 = vshrl.u32 %v8374_v35, 16  ;;  %v1465_v59 = vmax.f32 %v1399_v51, 0.0  ;;  %v7459_v0 = vld [vmem:[%s8316_s30 + $0x140] sm:$0xff]   ;;  %1503 = vst [vmem:[#allocation2 + $0x48] sm:$0xff] %v1437_v55 }
  0xf2   : > { %v1719_v32 = vshrl.u32 %v1680_v21, 16  ;;  %v1721_v33 = vshll.u32 %v1680_v21, 16  ;;  %v1736_v44 = vor.u32 %v1735_v36, %v1731_v27  ;;  %v1728_v46 = vrot.slane %v1726_v37, 1  ;;  %1505 = vst [vmem:[#allocation2 + $0x58] sm:$0xff] %v1439_v56  ;;  %v1398_v10 = vld [vmem:[%s9846_s0 + $0x120] sm:$0xff]  ;;  %v1400_v12 = vld [vmem:[%s9846_s0 + $0x130] sm:$0xff] }
  0xf3   : > { %v8384_v47 = vrot.slane %v1826_v41, 1  ;;  %v1842_v48 = vshll.u32 %v8378_v40, 16  ;;  %v1467_v2 = vmax.f32 %v1401_v58, 0.0  ;;  %v1742_v5 = vshrl.u32 %v8371_v29, 16  ;;  %1531 = vst [vmem:[#allocation2 + $0x128] sm:$0xff] %v1465_v59  ;;  %v7458_v18 = vld [vmem:[%s8316_s30] sm:$0xff]  }
  0xf4   : > { %6489 = vmatpush3.bf16.msra.mxu0 %v7448_v4  ;;  %7393 = vmatpush3.bf16.msra.mxu1 %v7448_v4  ;;  %v1723_v39 = vrot.slane %v1721_v33, 1  ;;  %v1741_v54 = vsel %vm1717_vm0, %v1736_v44, %v8347_v11  ;;  %v1370_v4 = vld [vmem:[%s9846_s0 + $0x40] sm:$0xff]  ;;  %v8409_v7 = vpack.c.bf16 %v1439_v56, %v1437_v55  ;;  %v1854_v13 = vshrl.u32 %v8378_v40, 16  ;;  %v7460_v22 = vld [vmem:[%s8316_s30 + $0x100] sm:$0xff]   ;;  %v7461_v27 = vld [vmem:[%s8316_s30 + $0x48] sm:$0xff]  }
  0xf5   : > { %6490 = vmatprep.subr.bf16.mxu0 %v7449_v6  ;;  %7386 = vmatprep.subr.bf16.mxu1 %v7449_v6  ;;  %v1840_v62 = vor.u32 %v1838_v42, %v8384_v47  ;;  %v1844_v6 = vrot.slane %v1842_v48, 1  ;;  %1533 = vst [vmem:[#allocation2 + $0x138] sm:$0xff] %v1467_v2  ;;  %v8421_v15 = vpack.c.bf16 %v1467_v2, %v1465_v59  ;;  %v1464_v17 = vmax.f32 %v1398_v10, 0.0  ;;  %v7463_v3 = vld [vmem:[%s8316_s30 + $0x148] sm:$0xff]   ;;  %v1375_v34 = vld [vmem:[%s9846_s0 + $0x68] sm:$0xff]  ;;  %v7465_v49 = vld [vmem:[%s8316_s30 + $0x50] sm:$0xff]  }
  0xf6   : > { %2106 = vmatprep.mubr.bf16.mxu0 %v1741_v54  ;;  %v1724_v61 = vor.u32 %v1723_v39, %v1719_v32  ;;  %v1754_v20 = vshll.u32 %v8409_v7, 16  ;;  %v1466_v21 = vmax.f32 %v1400_v12, 0.0  ;;  %v1377_v36 = vld [vmem:[%s9846_s0 + $0x78] sm:$0xff]  ;;  %v1441_v42 = vmax.f32 %v1375_v34, 0.0  ;;  %v1403_v44 = vld [vmem:[%s9846_s0 + $0x148] sm:$0xff]  ;;  %v1376_v59 = vld [vmem:[%s9846_s0 + $0x70] sm:$0xff] }
  0xf7   : > { %v1866_v24 = vshll.u32 %v8421_v15, 16  ;;  %1530 = vst [vmem:[#allocation2 + $0x120] sm:$0xff] %v1464_v17  ;;  %v1845_v11 = vsel %vm1717_vm0, %v1840_v62, %v1844_v6  ;;  %v1856_v33 = vor.u32 %v1854_v13, %v1844_v6  ;;  %v7462_v39 = vld [vmem:[%s8316_s30 + $0x8] sm:$0xff]   ;;  %v1766_v50 = vshrl.u32 %v8409_v7, 16  ;;  %v1404_v2 = vld [vmem:[%s9846_s0 + $0x150] sm:$0xff]  ;;  %v7466_v10 = vld [vmem:[%s8316_s30 + $0x10] sm:$0xff]  }
  0xf8   : > { %6491 = vmatpush3.bf16.msra.mxu0 %v7450_v8  ;;  %7394 = vmatpush3.bf16.msra.mxu1 %v7450_v8  ;;  %v1372_v8 = vld [vmem:[%s9846_s0 + $0x50] sm:$0xff]  ;;  %v1756_v14 = vrot.slane %v1754_v20, 1  ;;  %1532 = vst [vmem:[#allocation2 + $0x130] sm:$0xff] %v1466_v21  ;;  %v8436_v28 = vpack.c.bf16 %v1466_v21, %v1464_v17  ;;  %v7464_v41 = vld [vmem:[%s8316_s30 + $0x108] sm:$0xff]   ;;  %v1469_v51 = vmax.f32 %v1403_v44, 0.0  ;;  %1507 = vst [vmem:[#allocation2 + $0x68] sm:$0xff] %v1441_v42 }
  0xf9   : > { %6492 = vmatprep.subr.bf16.mxu0 %v7451_v9  ;;  %7387 = vmatprep.subr.bf16.mxu1 %v7451_v9  ;;  %v1436_v9 = vmax.f32 %v1370_v4, 0.0  ;;  %v1438_v16 = vmax.f32 %v1372_v8, 0.0  ;;  %v1868_v30 = vrot.slane %v1866_v24, 1  ;;  %v1405_v45 = vld [vmem:[%s9846_s0 + $0x158] sm:$0xff]  ;;  %v1878_v58 = vshrl.u32 %v8421_v15, 16 }
  0xfa   : > { %v1757_v37 = vsel %vm1717_vm0, %v1752_v19, %v1756_v14  ;;  %v1471_v56 = vmax.f32 %v1405_v45, 0.0  ;;  %1535 = vst [vmem:[#allocation2 + $0x148] sm:$0xff] %v1469_v51  ;;  %v1470_v17 = vmax.f32 %v1404_v2, 0.0  ;;  %v1870_v21 = vshrl.u32 %v8436_v28, 16 }
  0xfb   : > { %1502 = vst [vmem:[#allocation2 + $0x40] sm:$0xff] %v1436_v9  ;;  %1504 = vst [vmem:[#allocation2 + $0x50] sm:$0xff] %v1438_v16  ;;  %v8431_v25 = vpack.c.bf16 %v1438_v16, %v1436_v9  ;;  %v7467_v9 = vld [vmem:[%s8316_s30 + $0x150] sm:$0xff]   ;;  %v1880_v19 = vor.u32 %v1878_v58, %v1868_v30 }
  0xfc   : > { %6493 = vmatpush3.bf16.msra.mxu0 %v7452_v26  ;;  %7395 = vmatpush3.bf16.msra.mxu1 %v7452_v26  ;;  %v1729_v26 = vsel %vm1717_vm0, %v1724_v61, %v1728_v46  ;;  %1537 = vst [vmem:[#allocation2 + $0x158] sm:$0xff] %v1471_v56  ;;  %v8477_v8 = vpack.c.bf16 %v1471_v56, %v1469_v51  ;;  %1536 = vst [vmem:[#allocation2 + $0x150] sm:$0xff] %v1470_v17  ;;  %v1378_v51 = vld [vmem:[%s9846_s0 + $0x80] sm:$0xff] }
  0xfd   : > { %6494 = vmatprep.subr.bf16.mxu0 %v7453_v31  ;;  %7388 = vmatprep.subr.bf16.mxu1 %v7453_v31  ;;  %v1744_v31 = vor.u32 %v1742_v5, %v1728_v46  ;;  %v1746_v32 = vshll.u32 %v8431_v25, 16  ;;  %v1869_v46 = vsel %vm1717_vm0, %v1864_v23, %v1868_v30  ;;  %v1768_v5 = vor.u32 %v1766_v50, %v1756_v14  ;;  %v7470_v30 = vld [vmem:[%s8316_s30 + $0x18] sm:$0xff]  }
  0xfe   : > { %v1758_v13 = vshrl.u32 %v8431_v25, 16  ;;  %v1882_v20 = vshll.u32 %v8477_v8, 16  ;;  %v7471_v50 = vld [vmem:[%s8316_s30 + $0x158] sm:$0xff]   ;;  %v1444_v56 = vmax.f32 %v1378_v51, 0.0 }
  0xff   : > { %v1748_v48 = vrot.slane %v1746_v32, 1  ;;  %v1381_v32 = vld [vmem:[%s9846_s0 + $0x98] sm:$0xff] }
 0x100   : > { %6495 = vmatpush3.bf16.msra.mxu0 %v7454_v38  ;;  %7396 = vmatpush3.bf16.msra.mxu1 %v7454_v38  ;;  %v1858_v38 = vshll.u32 %v8436_v28, 16  ;;  %1510 = vst [vmem:[#allocation2 + $0x80] sm:$0xff] %v1444_v56 }
 0x101   : > { %6496 = vmatprep.subr.bf16.mxu0 %v7455_v43  ;;  %7389 = vmatprep.subr.bf16.mxu1 %v7455_v43  ;;  %v1443_v43 = vmax.f32 %v1377_v36, 0.0  ;;  %v1749_v61 = vsel %vm1717_vm0, %v1744_v31, %v1748_v48  ;;  %v1760_v23 = vor.u32 %v1758_v13, %v1748_v48  ;;  %v1379_v31 = vld [vmem:[%s9846_s0 + $0x88] sm:$0xff] }
 0x102   : > { %v1860_v54 = vrot.slane %v1858_v38, 1  ;;  %v1447_v38 = vmax.f32 %v1381_v32, 0.0 }
 0x103   : > { %1509 = vst [vmem:[#allocation2 + $0x78] sm:$0xff] %v1443_v43  ;;  %v8462_v55 = vpack.c.bf16 %v1443_v43, %v1441_v42 }
 0x104   : > { %6497 = vmatpush3.bf16.msra.mxu0 %v7456_v52  ;;  %7397 = vmatpush3.bf16.msra.mxu1 %v7456_v52  ;;  %v1374_v52 = vld [vmem:[%s9846_s0 + $0x60] sm:$0xff]  ;;  %v1861_v4 = vsel %vm1717_vm0, %v1856_v33, %v1860_v54  ;;  %1513 = vst [vmem:[#allocation2 + $0x98] sm:$0xff] %v1447_v38 }
 0x105   : > { %6582 = vmatprep.subr.bf16.mxu1 %v7457_v63  ;;  %6682 = vmatprep.subr.bf16.mxu0 %v7459_v0  ;;  %v1440_v62 = vmax.f32 %v1374_v52, 0.0  ;;  %v1442_v63 = vmax.f32 %v1376_v59, 0.0  ;;  %v1402_v0 = vld [vmem:[%s9846_s0 + $0x140] sm:$0xff]  ;;  %v1770_v6 = vshll.u32 %v8462_v55, 16  ;;  %v1782_v33 = vshrl.u32 %v8462_v55, 16  ;;  %v1380_v52 = vld [vmem:[%s9846_s0 + $0x90] sm:$0xff] }
 0x106   : > { %v1468_v16 = vmax.f32 %v1402_v0, 0.0  ;;  %v1446_v58 = vmax.f32 %v1380_v52, 0.0 }
 0x107   : > { %2107 = vmatmul.mubr.bf16.vlgmr.msra.gmra.mrb[0].mxu0 %v1729_v26  ;;  %2163 = vmatmul.mubr.bf16.vlgmr.msra.gmra.mrb[0].mxu1 %v1845_v11  ;;  %1506 = vst [vmem:[#allocation2 + $0x60] sm:$0xff] %v1440_v62  ;;  %1508 = vst [vmem:[#allocation2 + $0x70] sm:$0xff] %v1442_v63  ;;  %v8481_v12 = vpack.c.bf16 %v1442_v63, %v1440_v62  ;;  %v7469_v11 = vld [vmem:[%s8316_s30 + $0x58] sm:$0xff]   ;;  %v1408_v62 = vld [vmem:[%s9846_s0 + $0x170] sm:$0xff] }
 0x108   : > { %6583 = vmatpush3.bf16.msra.mxu1 %v7458_v18  ;;  %6683 = vmatpush3.bf16.msra.mxu0 %v7460_v22  ;;  %v1772_v18 = vrot.slane %v1770_v6, 1  ;;  %v7468_v22 = vld [vmem:[%s8316_s30 + $0x110] sm:$0xff]   ;;  %1534 = vst [vmem:[#allocation2 + $0x140] sm:$0xff] %v1468_v16  ;;  %v8488_v26 = vpack.c.bf16 %v1470_v17, %v1468_v16  ;;  %v7472_v63 = vld [vmem:[%s8316_s30 + $0x118] sm:$0xff]   ;;  %1512 = vst [vmem:[#allocation2 + $0x90] sm:$0xff] %v1446_v58  ;;  %v1474_v13 = vmax.f32 %v1408_v62, 0.0 }
 0x109   : > { %2114 = vmatprep.mubr.bf16.mxu0 %v1757_v37  ;;  %2170 = vmatprep.mubr.bf16.mxu1 %v1869_v46  ;;  %v1762_v24 = vshll.u32 %v8481_v12, 16  ;;  %v1445_v37 = vmax.f32 %v1379_v31, 0.0  ;;  %v1774_v59 = vshrl.u32 %v8481_v12, 16  ;;  %v1412_v62 = vld [vmem:[%s9846_s0 + $0x190] sm:$0xff] }
 0x10a   : > { %6584 = vmatprep.subr.bf16.mxu1 %v7461_v27  ;;  %6684 = vmatprep.subr.bf16.mxu0 %v7463_v3  ;;  %v1773_v14 = vsel %vm1717_vm0, %v1768_v5, %v1772_v18  ;;  %v1884_v27 = vrot.slane %v1882_v20, 1  ;;  %v1872_v3 = vor.u32 %v1870_v21, %v1860_v54  ;;  %v1874_v36 = vshll.u32 %v8488_v26, 16  ;;  %1540 = vst [vmem:[#allocation2 + $0x170] sm:$0xff] %v1474_v13 }
 0x10b   : > { %v1764_v34 = vrot.slane %v1762_v24, 1  ;;  %1511 = vst [vmem:[#allocation2 + $0x88] sm:$0xff] %v1445_v37  ;;  %v8508_v46 = vpack.c.bf16 %v1447_v38, %v1445_v37  ;;  %v1784_v48 = vor.u32 %v1782_v33, %v1772_v18  ;;  %v1886_v17 = vshrl.u32 %v8488_v26, 16  ;;  %v7473_v18 = vld [vmem:[%s8316_s30 + $0x60] sm:$0xff]   ;;  %v1411_v37 = vld [vmem:[%s9846_s0 + $0x188] sm:$0xff]  ;;  %v1413_v38 = vld [vmem:[%s9846_s0 + $0x198] sm:$0xff] }
 0x10c   : > { %6585 = vmatpush3.bf16.msra.mxu1 %v7462_v39  ;;  %6685 = vmatpush3.bf16.msra.mxu0 %v7464_v41  ;;  %v1407_v39 = vld [vmem:[%s9846_s0 + $0x168] sm:$0xff]  ;;  %v1409_v41 = vld [vmem:[%s9846_s0 + $0x178] sm:$0xff]  ;;  %v1885_v42 = vsel %vm1717_vm0, %v1880_v19, %v1884_v27  ;;  %v1876_v45 = vrot.slane %v1874_v36, 1  ;;  %v7474_v19 = vld [vmem:[%s8316_s30 + $0x20] sm:$0xff]  }
 0x10d   : > { %6586 = vmatprep.subr.bf16.mxu1 %v7465_v49  ;;  %6686 = vmatprep.subr.bf16.mxu0 %v7467_v9  ;;  %v1473_v43 = vmax.f32 %v1407_v39, 0.0  ;;  %v1475_v44 = vmax.f32 %v1409_v41, 0.0  ;;  %v1894_v49 = vshrl.u32 %v8477_v8, 16  ;;  %v1765_v0 = vsel %vm1717_vm0, %v1760_v23, %v1764_v34 }
 0x10e   : > { %v1877_v2 = vsel %vm1717_vm0, %v1872_v3, %v1876_v45  ;;  %v1776_v21 = vor.u32 %v1774_v59, %v1764_v34  ;;  %v1798_v3 = vshrl.u32 %v8508_v46, 16  ;;  %v1385_v34 = vld [vmem:[%s9846_s0 + $0xb8] sm:$0xff]  ;;  %v1477_v41 = vmax.f32 %v1411_v37, 0.0  ;;  %v1415_v37 = vld [vmem:[%s9846_s0 + $0x1a8] sm:$0xff] }
 0x10f   : > { %2115 = vmatmul.mubr.bf16.gmra.mrb[4].mxu0 %v1749_v61  ;;  %2171 = vmatmul.mubr.bf16.gmra.mrb[4].mxu1 %v1861_v4  ;;  %1539 = vst [vmem:[#allocation2 + $0x168] sm:$0xff] %v1473_v43  ;;  %1541 = vst [vmem:[#allocation2 + $0x178] sm:$0xff] %v1475_v44  ;;  %v8518_v54 = vpack.c.bf16 %v1475_v44, %v1473_v43  ;;  %v1406_v61 = vld [vmem:[%s9846_s0 + $0x160] sm:$0xff]  ;;  %v1786_v4 = vshll.u32 %v8508_v46, 16  ;;  %v1896_v6 = vor.u32 %v1894_v49, %v1884_v27  ;;  %v1383_v27 = vld [vmem:[%s9846_s0 + $0xa8] sm:$0xff] }
 0x110   : > { %2122 = vmatprep.mubr.bf16.mxu0 %v1773_v14  ;;  %6587 = vmatpush3.bf16.msra.mxu1 %v7466_v10  ;;  %v1472_v5 = vmax.f32 %v1406_v61, 0.0  ;;  %v8532_v10 = vpack.c.bf16 %v1446_v58, %v1444_v56  ;;  %v7475_v14 = vld [vmem:[%s8316_s30 + $0x160] sm:$0xff]   ;;  %v1449_v36 = vmax.f32 %v1383_v27, 0.0  ;;  %v1451_v39 = vmax.f32 %v1385_v34, 0.0  ;;  %v1382_v49 = vld [vmem:[%s9846_s0 + $0xa0] sm:$0xff]  ;;  %1543 = vst [vmem:[#allocation2 + $0x188] sm:$0xff] %v1477_v41 }
 0x111   : > { %2178 = vmatprep.mubr.bf16.mxu1 %v1885_v42  ;;  %6687 = vmatpush3.bf16.msra.mxu0 %v7468_v22  ;;  %v1898_v9 = vshll.u32 %v8518_v54, 16  ;;  %v1788_v16 = vrot.slane %v1786_v4, 1  ;;  %v1479_v42 = vmax.f32 %v1413_v38, 0.0  ;;  %v7476_v43 = vld [vmem:[%s8316_s30 + $0x120] sm:$0xff]   ;;  %v1448_v58 = vmax.f32 %v1382_v49, 0.0  ;;  %v1410_v61 = vld [vmem:[%s9846_s0 + $0x180] sm:$0xff] }
 0x112   : > { %6588 = vmatprep.subr.bf16.mxu1 %v7469_v11  ;;  %6688 = vmatprep.subr.bf16.mxu0 %v7471_v50  ;;  %1538 = vst [vmem:[#allocation2 + $0x160] sm:$0xff] %v1472_v5  ;;  %v1778_v22 = vshll.u32 %v8532_v10, 16  ;;  %v8538_v23 = vpack.c.bf16 %v1474_v13, %v1472_v5  ;;  %v1888_v11 = vor.u32 %v1886_v17, %v1876_v45  ;;  %1515 = vst [vmem:[#allocation2 + $0xa8] sm:$0xff] %v1449_v36  ;;  %v1384_v50 = vld [vmem:[%s9846_s0 + $0xb0] sm:$0xff]  ;;  %v7477_v5 = vld [vmem:[%s8316_s30 + $0x68] sm:$0xff]  }
 0x113   : > { %v1900_v20 = vrot.slane %v1898_v9, 1  ;;  %v1789_v24 = vsel %vm1717_vm0, %v1784_v48, %v1788_v16  ;;  %v1800_v48 = vor.u32 %v1798_v3, %v1788_v16  ;;  %v1790_v51 = vshrl.u32 %v8532_v10, 16  ;;  %1517 = vst [vmem:[#allocation2 + $0xb8] sm:$0xff] %v1451_v39  ;;  %1545 = vst [vmem:[#allocation2 + $0x198] sm:$0xff] %v1479_v42  ;;  %v1387_v3 = vld [vmem:[%s9846_s0 + $0xc8] sm:$0xff]  ;;  %v1417_v38 = vld [vmem:[%s9846_s0 + $0x1b8] sm:$0xff] }
 0x114   : > { %6589 = vmatpush3.bf16.msra.mxu1 %v7470_v30  ;;  %v1910_v30 = vshrl.u32 %v8518_v54, 16  ;;  %v1780_v32 = vrot.slane %v1778_v22, 1  ;;  %v1890_v33 = vshll.u32 %v8538_v23, 16  ;;  %v8567_v52 = vpack.c.bf16 %v1451_v39, %v1449_v36  ;;  %1514 = vst [vmem:[#allocation2 + $0xa0] sm:$0xff] %v1448_v58  ;;  %v1386_v39 = vld [vmem:[%s9846_s0 + $0xc0] sm:$0xff] }
 0x115   : > { %6689 = vmatpush3.bf16.msra.mxu0 %v7472_v63  ;;  %v1901_v31 = vsel %vm1717_vm0, %v1896_v6, %v1900_v20  ;;  %6590 = vmatprep.subr.bf16.mxu1 %v7473_v18  ;;  %v8569_v56 = vpack.c.bf16 %v1479_v42, %v1477_v41  ;;  %v1450_v59 = vmax.f32 %v1384_v50, 0.0  ;;  %v1478_v4 = vmax.f32 %v1412_v62, 0.0  ;;  %v7478_v6 = vld [vmem:[%s8316_s30 + $0x28] sm:$0xff]  }
 0x116   : > { %v1781_v44 = vsel %vm1717_vm0, %v1776_v21, %v1780_v32  ;;  %v1892_v45 = vrot.slane %v1890_v33, 1  ;;  %6690 = vmatprep.subr.bf16.mxu0 %v7475_v14  ;;  %v1802_v9 = vshll.u32 %v8567_v52, 16  ;;  %v1902_v17 = vshrl.u32 %v8538_v23, 16  ;;  %v7479_v18 = vld [vmem:[%s8316_s30 + $0x168] sm:$0xff]  }
 0x117   : > { %2123 = vmatmul.mubr.bf16.gmra.mrb[8].mxu0 %v1765_v0  ;;  %2179 = vmatmul.mubr.bf16.gmra.mrb[8].mxu1 %v1877_v2  ;;  %v1912_v0 = vor.u32 %v1910_v30, %v1900_v20  ;;  %v1476_v2 = vmax.f32 %v1410_v61, 0.0  ;;  %v1914_v13 = vshll.u32 %v8569_v56, 16  ;;  %1516 = vst [vmem:[#allocation2 + $0xb0] sm:$0xff] %v1450_v59  ;;  %v8582_v16 = vpack.c.bf16 %v1450_v59, %v1448_v58  ;;  %v1389_v30 = vld [vmem:[%s9846_s0 + $0xd8] sm:$0xff]  ;;  %v7481_v59 = vld [vmem:[%s8316_s30 + $0x70] sm:$0xff]  }
 0x118   : > { %2130 = vmatprep.mubr.bf16.mxu0 %v1789_v24  ;;  %2186 = vmatprep.mubr.bf16.mxu1 %v1901_v31  ;;  %v1893_v63 = vsel %vm1717_vm0, %v1888_v11, %v1892_v45  ;;  %1544 = vst [vmem:[#allocation2 + $0x190] sm:$0xff] %v1478_v4  ;;  %v1804_v20 = vrot.slane %v1802_v9, 1  ;;  %v1792_v22 = vor.u32 %v1790_v51, %v1780_v32  ;;  %v7480_v11 = vld [vmem:[%s8316_s30 + $0x128] sm:$0xff]   ;;  %v1814_v31 = vshrl.u32 %v8567_v52, 16  ;;  %v7483_v9 = vld [vmem:[%s8316_s30 + $0x170] sm:$0xff]  }
 0x119   : > { %6591 = vmatpush3.bf16.msra.mxu1 %v7474_v19  ;;  %6691 = vmatpush3.bf16.msra.mxu0 %v7476_v43  ;;  %1542 = vst [vmem:[#allocation2 + $0x180] sm:$0xff] %v1476_v2  ;;  %v8586_v19 = vpack.c.bf16 %v1478_v4, %v1476_v2  ;;  %v1916_v21 = vrot.slane %v1914_v13, 1  ;;  %v1794_v24 = vshll.u32 %v8582_v16, 16  ;;  %v1904_v14 = vor.u32 %v1902_v17, %v1892_v45  ;;  %v1414_v45 = vld [vmem:[%s9846_s0 + $0x1a0] sm:$0xff] }
 0x11a   : > { %6592 = vmatprep.subr.bf16.mxu1 %v7477_v5  ;;  %6692 = vmatprep.subr.bf16.mxu0 %v7479_v18  ;;  %v1805_v32 = vsel %vm1717_vm0, %v1800_v48, %v1804_v20  ;;  %v1453_v36 = vmax.f32 %v1387_v3, 0.0  ;;  %v1455_v42 = vmax.f32 %v1389_v30, 0.0  ;;  %v1481_v43 = vmax.f32 %v1415_v37, 0.0  ;;  %v1416_v48 = vld [vmem:[%s9846_s0 + $0x1b0] sm:$0xff] }
 0x11b   : > { %v1906_v27 = vshll.u32 %v8586_v19, 16  ;;  %v1917_v33 = vsel %vm1717_vm0, %v1912_v0, %v1916_v21  ;;  %v1796_v34 = vrot.slane %v1794_v24, 1  ;;  %v1483_v50 = vmax.f32 %v1417_v38, 0.0 }
 0x11c   : > { %1519 = vst [vmem:[#allocation2 + $0xc8] sm:$0xff] %v1453_v36  ;;  %v1926_v51 = vshrl.u32 %v8569_v56, 16  ;;  %v1452_v58 = vmax.f32 %v1386_v39, 0.0  ;;  %1521 = vst [vmem:[#allocation2 + $0xd8] sm:$0xff] %v1455_v42  ;;  %v8622_v62 = vpack.c.bf16 %v1455_v42, %v1453_v36  ;;  %v1806_v0 = vshrl.u32 %v8582_v16, 16 }
 0x11d   : > { %6593 = vmatpush3.bf16.msra.mxu1 %v7478_v6  ;;  %6693 = vmatpush3.bf16.msra.mxu0 %v7480_v11  ;;  %v1908_v41 = vrot.slane %v1906_v27, 1  ;;  %v1797_v49 = vsel %vm1717_vm0, %v1792_v22, %v1796_v34  ;;  %1547 = vst [vmem:[#allocation2 + $0x1a8] sm:$0xff] %v1481_v43  ;;  %1549 = vst [vmem:[#allocation2 + $0x1b8] sm:$0xff] %v1483_v50  ;;  %v8625_v2 = vpack.c.bf16 %v1483_v50, %v1481_v43  ;;  %v7482_v6 = vld [vmem:[%s8316_s30 + $0x30] sm:$0xff]   ;;  %v7487_v50 = vld [vmem:[%s8316_s30 + $0x178] sm:$0xff]  }
 0x11e   : > { %1518 = vst [vmem:[#allocation2 + $0xc0] sm:$0xff] %v1452_v58  ;;  %v1480_v4 = vmax.f32 %v1414_v45, 0.0  ;;  %v1482_v5 = vmax.f32 %v1416_v48, 0.0  ;;  %6594 = vmatprep.subr.bf16.mxu1 %v7481_v59  ;;  %v1816_v13 = vor.u32 %v1814_v31, %v1804_v20  ;;  %v1818_v17 = vshll.u32 %v8622_v62, 16  ;;  %v7484_v27 = vld [vmem:[%s8316_s30 + $0x130] sm:$0xff]   ;;  %6694 = vmatprep.subr.bf16.mxu0 %v7483_v9 }
 0x11f   : > { %2131 = vmatmul.mubr.bf16.gmra.mrb[12].mxu0 %v1781_v44  ;;  %2187 = vmatmul.mubr.bf16.gmra.mrb[12].mxu1 %v1893_v63  ;;  %v1388_v44 = vld [vmem:[%s9846_s0 + $0xd0] sm:$0xff]  ;;  %v1909_v61 = vsel %vm1717_vm0, %v1904_v14, %v1908_v41  ;;  %v1918_v22 = vshrl.u32 %v8586_v19, 16  ;;  %v1928_v24 = vor.u32 %v1926_v51, %v1916_v21  ;;  %v1930_v11 = vshll.u32 %v8625_v2, 16  ;;  %v1418_v21 = vld [vmem:[%s9846_s0 + $0x1c0] sm:$0xff] }
 0x120   : > { %2138 = vmatprep.mubr.bf16.mxu0 %v1805_v32  ;;  %2194 = vmatprep.mubr.bf16.mxu1 %v1917_v33  ;;  %v1454_v63 = vmax.f32 %v1388_v44, 0.0  ;;  %1546 = vst [vmem:[#allocation2 + $0x1a0] sm:$0xff] %v1480_v4  ;;  %1548 = vst [vmem:[#allocation2 + $0x1b0] sm:$0xff] %v1482_v5  ;;  %v8634_v14 = vpack.c.bf16 %v1482_v5, %v1480_v4  ;;  %v1820_v3 = vrot.slane %v1818_v17, 1  ;;  %v1830_v31 = vshrl.u32 %v8622_v62, 16  ;;  %v1419_v32 = vld [vmem:[%s9846_s0 + $0x1c8] sm:$0xff] }
 0x121   : > { %v1808_v20 = vor.u32 %v1806_v0, %v1796_v34  ;;  %6595 = vmatpush3.bf16.msra.mxu1 %v7482_v6  ;;  %v7485_v33 = vld [vmem:[%s8316_s30 + $0x78] sm:$0xff]   ;;  %v1932_v36 = vrot.slane %v1930_v11, 1  ;;  %v1920_v37 = vor.u32 %v1918_v22, %v1908_v41  ;;  %6695 = vmatpush3.bf16.msra.mxu0 %v7484_v27  ;;  %v1485_v38 = vmax.f32 %v1419_v32, 0.0  ;;  %v7585_v0 = vld [vmem:[#allocation2 + $0x18] sm:$0xff]  ;;  %v7489_v5 = vld [vmem:[%s8316_s30 + $0x1c0] sm:$0xff]  }
 0x122   : > { %1520 = vst [vmem:[#allocation2 + $0xd0] sm:$0xff] %v1454_v63  ;;  %v8630_v18 = vpack.c.bf16 %v1454_v63, %v1452_v58  ;;  %v1922_v34 = vshll.u32 %v8634_v14, 16  ;;  %v1821_v39 = vsel %vm1717_vm0, %v1816_v13, %v1820_v3  ;;  %v1832_v43 = vor.u32 %v1830_v31, %v1820_v3  ;;  %6596 = vmatprep.subr.bf16.mxu1 %v7485_v33  ;;  %v7488_v58 = vld [vmem:[%s8316_s30 + $0x138] sm:$0xff]   ;;  %v7491_v22 = vld [vmem:[%s8316_s30 + $0x240] sm:$0xff]  }
 0x123   : > { %v1933_v44 = vsel %vm1717_vm0, %v1928_v24, %v1932_v36  ;;  %1551 = vst [vmem:[#allocation2 + $0x1c8] sm:$0xff] %v1485_v38  ;;  %v1484_v48 = vmax.f32 %v1418_v21, 0.0  ;;  %6696 = vmatprep.subr.bf16.mxu0 %v7487_v50  ;;  %v2461_v63 = vld [vmem:[#allocation2 + $0x8] sm:$0xfc]  ;;  %v1942_v6 = vshrl.u32 %v8625_v2, 16  ;;  %v2536_v13 = vrot.slane %v8335_v1, 1 }
 0x124   : > { %v1810_v30 = vshll.u32 %v8630_v18, 16  ;;  %v1924_v45 = vrot.slane %v1922_v34, 1  ;;  %v1822_v51 = vshrl.u32 %v8630_v18, 16  ;;  %v2465_v4 = vpack.c.bf16 %v7585_v0, %v2461_v63 }
 0x125   : > { %1550 = vst [vmem:[#allocation2 + $0x1c0] sm:$0xff] %v1484_v48  ;;  %6697 = vmatpush3.bf16.msra.mxu0 %v7488_v58  ;;  %v1934_v27 = vshrl.u32 %v8634_v14, 16  ;;  %v1944_v32 = vor.u32 %v1942_v6, %v1932_v36  ;;  %v7495_v58 = vld [vmem:[%s8316_s30 + $0x248] sm:$0xff]   ;;  %v2544_v6 = vrot.slane %v8462_v55, 1 }
 0x126   : > { %v1812_v42 = vrot.slane %v1810_v30, 1  ;;  %v1925_v59 = vsel %vm1717_vm0, %v1920_v37, %v1924_v45  ;;  %v2535_v17 = vrot.slane %v2465_v4, 1  ;;  %6882 = vmatprep.subr.bf16.mxu0 %v7491_v22  ;;  %v7586_v30 = vld [vmem:[#allocation2 + $0x10] sm:$0xff]  ;;  %v1561_v37 = vld [vmem:[#allocation2 + $0x8] sm:$0xff]  ;;  %v7496_v4 = vld [vmem:[%s8316_s30 + $0x208] sm:$0xff]  }
 0x127   : > { %2139 = vmatmul.mubr.bf16.gmra.mrb[16].mxu0 %v1797_v49  ;;  %2195 = vmatmul.mubr.bf16.gmra.mrb[16].mxu1 %v1909_v61  ;;  %v7486_v49 = vld [vmem:[%s8316_s30 + $0x38] sm:$0xff]   ;;  %v1837_v61 = vsel %vm1717_vm0, %v1832_v43, %v8329_v60  ;;  %v2460_v60 = vld [vmem:[#allocation2] sm:$0xfc]  ;;  %v1617_v36 = vpack.c.bf16 %v7585_v0, %v1561_v37  ;;  %v2538_v0 = vrot.slane %v8431_v25, 1 }
 0x128   : > { %2146 = vmatprep.mubr.bf16.mxu0 %v1821_v39  ;;  %2202 = vmatprep.mubr.bf16.mxu1 %v1933_v44  ;;  %v1813_v41 = vsel %vm1717_vm0, %v1808_v20, %v1812_v42  ;;  %v1824_v9 = vor.u32 %v1822_v51, %v1812_v42  ;;  %v2464_v31 = vpack.c.bf16 %v7586_v30, %v2460_v60  ;;  %v7500_v60 = vld [vmem:[%s8316_s30 + $0x210] sm:$0xff]  }
 0x129   : > { %6597 = vmatpush3.bf16.msra.mxu1 %v7486_v49  ;;  %v2537_v34 = vsel %vm2531_vm1, %v2535_v17, %v2536_v13  ;;  %v1936_v39 = vor.u32 %v1934_v27, %v1924_v45  ;;  %v2540_v49 = vrot.slane %v8409_v7, 1  ;;  %v7498_v27 = vld [vmem:[%s8316_s30 + $0x190] sm:$0xff]  }
 0x12a   : > { %6782 = vmatprep.subr.bf16.mxu1 %v7489_v5  ;;  %v1679_v24 = vld [vmem:[#allocation2 + $0x1c8] sm:$0x1]  ;;  %v1829_v3 = vsel %vm1717_vm0, %v1824_v9, %v8384_v47  ;;  %v2532_v43 = vrot.slane %v2464_v31, 1  ;;  %v2533_v47 = vrot.slane %v8371_v29, 1  ;;  %v7493_v5 = vld [vmem:[%s8316_s30 + $0x1c8] sm:$0xff]   ;;  %v7499_v9 = vld [vmem:[%s8316_s30 + $0x250] sm:$0xff]  }
 0x12b   : > { %v1683_v11 = vpack.c.bf16 %v1679_v24, %v1679_v24  ;;  %v2541_v51 = vsel %vm2531_vm1, %v2536_v13, %v2540_v49  ;;  %v7494_v13 = vld [vmem:[%s8316_s30 + $0x188] sm:$0xff]   ;;  %v2545_v22 = vsel %vm2531_vm1, %v2540_v49, %v2544_v6  ;;  %v7503_v24 = vld [vmem:[%s8316_s30 + $0x258] sm:$0xff]   ;;  %v7507_v31 = vld [vmem:[%s8316_s30 + $0x260] sm:$0xff]  }
 0x12c   : > { %v1678_v20 = vld [vmem:[#allocation2 + $0x1c0] sm:$0x1]  ;;  %v2534_v45 = vsel %vm2531_vm1, %v2532_v43, %v2533_v47  ;;  %v2539_v17 = vsel %vm2531_vm1, %v2533_v47, %v2538_v0  ;;  %v7509_v43 = vld [vmem:[%s8316_s30 + $0x1e8] sm:$0xff]  }
 0x12d   : > { %v1946_v21 = vshll.u32 %v1683_v11, 16  ;;  %v1682_v33 = vpack.c.bf16 %v1678_v20, %v1678_v20  ;;  %v7497_v11 = vld [vmem:[%s8316_s30 + $0x1d0] sm:$0xff]   ;;  %v7504_v20 = vld [vmem:[%s8316_s30 + $0x218] sm:$0xff]  }
 0x12e   : > { %v7515_v47 = vld [vmem:[%s8316_s30 + $0x270] sm:$0xff]  }
 0x12f   : > { %2147 = vmatmul.mubr.bf16.gmra.mrb[20].mxu0 %v1813_v41  ;;  %2203 = vmatmul.mubr.bf16.gmra.mrb[20].mxu1 %v1925_v59  ;;  %v1948_v38 = vrot.slane %v1946_v21, 1  ;;  %v1938_v42 = vshll.u32 %v1682_v33, 16  ;;  %v7492_v41 = vld [vmem:[%s8316_s30 + $0x200] sm:$0xff]  }
 0x130   : > { %2154 = vmatprep.mubr.bf16.mxu0 %v1837_v61  ;;  %v7490_v59 = vld [vmem:[%s8316_s30 + $0x180] sm:$0xff]   ;;  %v7587_v61 = vld [vmem:[#allocation2] sm:$0xff] }
 0x131   : > { %v1949_v44 = vsel %vm1717_vm0, %v1944_v32, %v1948_v38  ;;  %v1940_v48 = vrot.slane %v1938_v42, 1  ;;  %v1616_v63 = vpack.c.bf16 %v7586_v30, %v7587_v61  ;;  %v7501_v30 = vld [vmem:[%s8316_s30 + $0x1d8] sm:$0xff]   ;;  %v7508_v33 = vld [vmem:[%s8316_s30 + $0x220] sm:$0xff]  }
 0x132   : > { %2210 = vmatprep.mubr.bf16.mxu1 %v1949_v44  ;;  %v7502_v32 = vld [vmem:[%s8316_s30 + $0x198] sm:$0xff]   ;;  %v7505_v38 = vld [vmem:[%s8316_s30 + $0x1e0] sm:$0xff]   ;;  %v7510_v44 = vld [vmem:[%s8316_s30 + $0x1a8] sm:$0xff]  }
 0x133   : > { %v1941_v50 = vsel %vm1717_vm0, %v1936_v39, %v1940_v48  ;;  %v7512_v39 = vld [vmem:[%s8316_s30 + $0x228] sm:$0xff]   ;;  %v7506_v42 = vld [vmem:[%s8316_s30 + $0x1a0] sm:$0xff]  }
 0x137   : > { %2155 = vmatmul.mubr.bf16.gmra.mrb[24].mxu0 %v1829_v3  ;;  %2211 = vmatmul.mubr.bf16.gmra.mrb[24].mxu1 %v1941_v50  ;;  %v2542_v3 = vrot.slane %v8481_v12, 1  ;;  %v7519_v50 = vld [vmem:[%s8316_s30 + $0x278] sm:$0xff]  }
 0x138   : > { %2746 = vmatprep.mubr.bf16.mxu0 %v2537_v34  ;;  %2347 = vmatprep.mubr.bf16.mxu1 %v1617_v36  ;;  %v7511_v34 = vld [vmem:[%s8316_s30 + $0x268] sm:$0xff]   ;;  %v7516_v36 = vld [vmem:[%s8316_s30 + $0x230] sm:$0xff]  }
 0x139   : > { %v2543_v21 = vsel %vm2531_vm1, %v2538_v0, %v2542_v3  ;;  %v7518_v0 = vld [vmem:[%s8316_s30 + $0x1b8] sm:$0xff]  }
 0x13f   : > { %2747 = vmatmul.mubr.bf16.vlgmr.msra.gmra.mrb[28].mxu0 %v2534_v45  ;;  %2348 = vmatmul.mubr.bf16.vlgmr.msra.gmra.mrb[28].mxu1 %v1616_v63  ;;  %v7513_v45 = vld [vmem:[%s8316_s30 + $0x1f0] sm:$0xff]  }
 0x140   : > { %6883 = vmatpush3.bf16.msra.mxu0 %v7492_v41  ;;  %2754 = vmatprep.mubr.bf16.mxu0 %v2541_v51  ;;  %v7520_v41 = vld [vmem:[%s8316_s30 + $0x238] sm:$0xff]   ;;  %v2556_v51 = vrot.slane %v8622_v62, 1 }
 0x141   : > { %6884 = vmatprep.subr.bf16.mxu0 %v7495_v58  ;;  %6783 = vmatpush3.bf16.msra.mxu1 %v7490_v59  ;;  %v7517_v58 = vld [vmem:[%s8316_s30 + $0x1f8] sm:$0xff]   ;;  %v7523_v59 = vld [vmem:[%s8316_s30 + $0x340] sm:$0xff]  }
 0x142   : > { %2355 = vmatprep.mubr.bf16.mxu1 %v8335_v1  ;;  %6784 = vmatprep.subr.bf16.mxu1 %v7493_v5  ;;  %v2548_v1 = vrot.slane %v8508_v46, 1  ;;  %v2554_v5 = vrot.slane %v8630_v18, 1 }
 0x144   : > { %6885 = vmatpush3.bf16.msra.mxu0 %v7496_v4  ;;  %v2549_v37 = vsel %vm2531_vm1, %v2544_v6, %v2548_v1  ;;  %v7521_v4 = vld [vmem:[%s8316_s30 + $0x2c0] sm:$0xff]   ;;  %v2560_v6 = vrot.slane %v8320_v53, 1 }
 0x145   : > { %6886 = vmatprep.subr.bf16.mxu0 %v7499_v9  ;;  %6785 = vmatpush3.bf16.msra.mxu1 %v7494_v13  ;;  %v2558_v9 = vrot.slane %v8374_v35, 1  ;;  %v2564_v13 = vrot.slane %v8325_v57, 1 }
 0x146   : > { %6786 = vmatprep.subr.bf16.mxu1 %v7497_v11 }
 0x147   : > { %2755 = vmatmul.mubr.bf16.gmra.mrb[32].mxu0 %v2539_v17  ;;  %2356 = vmatmul.mubr.bf16.gmra.mrb[32].mxu1 %v8371_v29  ;;  %v2546_v29 = vrot.slane %v8532_v10, 1  ;;  %v2559_v17 = vsel %vm2531_vm1, %v2554_v5, %v2558_v9 }
 0x148   : > { %2762 = vmatprep.mubr.bf16.mxu0 %v2545_v22  ;;  %6887 = vmatpush3.bf16.msra.mxu0 %v7500_v60  ;;  %v2568_v60 = vrot.slane %v8421_v15, 1 }
 0x149   : > { %6888 = vmatprep.subr.bf16.mxu0 %v7503_v24  ;;  %2363 = vmatprep.mubr.bf16.mxu1 %v8409_v7  ;;  %v2552_v7 = vrot.slane %v8567_v52, 1  ;;  %v2547_v48 = vsel %vm2531_vm1, %v2542_v3, %v2546_v29  ;;  %v2572_v24 = vrot.slane %v8477_v8, 1 }
 0x14a   : > { %6787 = vmatpush3.bf16.msra.mxu1 %v7498_v27  ;;  %v2576_v27 = vrot.slane %v8518_v54, 1 }
 0x14b   : > { %6788 = vmatprep.subr.bf16.mxu1 %v7501_v30  ;;  %v2553_v49 = vsel %vm2531_vm1, %v2548_v1, %v2552_v7  ;;  %v2557_v63 = vsel %vm2531_vm1, %v2552_v7, %v2556_v51  ;;  %v8761_v1 = vld [vmem:[%s9846_s0 + $0x1d8] sm:$0xff]  ;;  %v3278_v7 = vld [vmem:[#allocation2 + $0x48] sm:$0xff] }
 0x14c   : > { %6889 = vmatpush3.bf16.msra.mxu0 %v7504_v20  ;;  %v2580_v20 = vrot.slane %v8569_v56, 1  ;;  %v1487_v30 = vmax.f32 %v8761_v1, 0.0 }
 0x14d   : > { %6890 = vmatprep.subr.bf16.mxu0 %v7507_v31 }
 0x14e   : > { %6789 = vmatpush3.bf16.msra.mxu1 %v7502_v32  ;;  %v1422_v32 = vld [vmem:[%s9846_s0 + $0x1e0] sm:$0xff]  ;;  %1553 = vst [vmem:[#allocation2 + $0x1d8] sm:$0xff] %v1487_v30 }
 0x14f   : > { %2763 = vmatmul.mubr.bf16.gmra.mrb[36].mxu0 %v2543_v21  ;;  %6790 = vmatprep.subr.bf16.mxu1 %v7505_v38  ;;  %v2463_v38 = vld [vmem:[#allocation2 + $0x1c8] sm:$0x3] }
 0x150   : > { %2770 = vmatprep.mubr.bf16.mxu0 %v2549_v37  ;;  %6891 = vmatpush3.bf16.msra.mxu0 %v7508_v33  ;;  %v1488_v33 = vmax.f32 %v1422_v32, 0.0  ;;  %v2887_v32 = vld [vmem:[#allocation2 + $0x20] sm:$0xff] }
 0x151   : > { %6892 = vmatprep.subr.bf16.mxu0 %v7511_v34  ;;  %2364 = vmatmul.mubr.bf16.gmra.mrb[36].mxu1 %v8431_v25  ;;  %v2550_v25 = vrot.slane %v8582_v16, 1  ;;  %v2581_v34 = vsel %vm2531_vm1, %v2576_v27, %v2580_v20 }
 0x152   : > { %2371 = vmatprep.mubr.bf16.mxu1 %v8462_v55  ;;  %6791 = vmatpush3.bf16.msra.mxu1 %v7506_v42  ;;  %v7514_v55 = vld [vmem:[%s8316_s30 + $0x1b0] sm:$0xff]   ;;  %1554 = vst [vmem:[#allocation2 + $0x1e0] sm:$0xff] %v1488_v33  ;;  %v2584_v42 = vrot.slane %v8625_v2, 1  ;;  %v7524_v33 = vld [vmem:[%s8316_s30 + $0x300] sm:$0xff]  }
 0x153   : > { %6792 = vmatprep.subr.bf16.mxu1 %v7509_v43  ;;  %v2551_v61 = vsel %vm2531_vm1, %v2546_v29, %v2550_v25  ;;  %v8784_v29 = vld [vmem:[#allocation2 + $0x38] sm:$0xff] }
 0x154   : > { %6893 = vmatpush3.bf16.msra.mxu0 %v7512_v39  ;;  %v3274_v39 = vld [vmem:[#allocation2 + $0x28] sm:$0xfe]  ;;  %v3280_v43 = vld [vmem:[#allocation2 + $0x58] sm:$0xff] }
 0x155   : > { %6894 = vmatprep.subr.bf16.mxu0 %v7515_v47  ;;  %v2467_v47 = vpack.c.bf16 %v2463_v38, %v2463_v38 }
 0x156   : > { %6793 = vmatpush3.bf16.msra.mxu1 %v7510_v44  ;;  %v2582_v44 = vrot.slane %v8634_v14, 1 }
 0x157   : > { %2771 = vmatmul.mubr.bf16.gmra.mrb[40].mxu0 %v2547_v48  ;;  %6794 = vmatprep.subr.bf16.mxu1 %v7513_v45  ;;  %v3332_v48 = vpack.c.bf16 %v8784_v29, %v3274_v39  ;;  %v3273_v45 = vld [vmem:[#allocation2 + $0x20] sm:$0xfe] }
 0x158   : > { %2778 = vmatprep.mubr.bf16.mxu0 %v2553_v49  ;;  %6895 = vmatpush3.bf16.msra.mxu0 %v7516_v36  ;;  %v8792_v36 = vld [vmem:[#allocation2 + $0x30] sm:$0xff]  ;;  %v2585_v49 = vsel %vm2531_vm1, %v2580_v20, %v2584_v42 }
 0x159   : > { %6896 = vmatprep.subr.bf16.mxu0 %v7519_v50  ;;  %2372 = vmatmul.mubr.bf16.gmra.mrb[40].mxu1 %v8481_v12  ;;  %v2555_v12 = vsel %vm2531_vm1, %v2550_v25, %v2554_v5  ;;  %v8796_v50 = vpack.c.bf16 %v3280_v43, %v3278_v7  ;;  %v2588_v25 = vrot.slane %v2467_v47, 1  ;;  %v3287_v7 = vld [vmem:[#allocation2 + $0x90] sm:$0xff]  ;;  %v3292_v43 = vld [vmem:[#allocation2 + $0xb8] sm:$0xff]  ;;  %v2943_v47 = vpack.c.bf16 %v8792_v36, %v2887_v32 }
 0x15a   : > { %2379 = vmatprep.mubr.bf16.mxu1 %v8508_v46  ;;  %6795 = vmatpush3.bf16.msra.mxu1 %v7514_v55  ;;  %v2561_v46 = vsel %vm2531_vm1, %v2556_v51, %v2560_v6  ;;  %v3407_v51 = vshrl.u32 %v3332_v48, 16  ;;  %v3279_v55 = vld [vmem:[#allocation2 + $0x50] sm:$0xff] }
 0x15b   : > { %6796 = vmatprep.subr.bf16.mxu1 %v7517_v58  ;;  %v3409_v58 = vshll.u32 %v3332_v48, 16 }
 0x15c   : > { %6897 = vmatpush3.bf16.msra.mxu0 %v7520_v41  ;;  %v2462_v41 = vld [vmem:[#allocation2 + $0x1c0] sm:$0x3] }
 0x15d   : > { %7082 = vmatprep.subr.bf16.mxu0 %v7523_v59  ;;  %v3282_v59 = vld [vmem:[#allocation2 + $0x68] sm:$0xff] }
 0x15e   : > { %6797 = vmatpush3.bf16.msra.mxu1 %v7518_v0  ;;  %v3284_v0 = vld [vmem:[#allocation2 + $0x78] sm:$0xff] }
 0x15f   : > { %2779 = vmatmul.mubr.bf16.gmra.mrb[44].mxu0 %v2551_v61  ;;  %6982 = vmatprep.subr.bf16.mxu1 %v7521_v4  ;;  %v3414_v61 = vshll.u32 %v8796_v50, 16  ;;  %v2466_v4 = vpack.c.bf16 %v2462_v41, %v2462_v41 }
 0x160   : > { %2786 = vmatprep.mubr.bf16.mxu0 %v2557_v63  ;;  %v3331_v63 = vpack.c.bf16 %v8792_v36, %v3273_v45  ;;  %v7522_v45 = vld [vmem:[%s8316_s30 + $0x280] sm:$0xff]  }
 0x161   : > { %2380 = vmatmul.mubr.bf16.gmra.mrb[44].mxu1 %v8532_v10  ;;  %v2565_v10 = vsel %vm2531_vm1, %v2560_v6, %v2564_v13  ;;  %v2589_v6 = vsel %vm2531_vm1, %v2584_v42, %v2588_v25  ;;  %v3290_v42 = vld [vmem:[#allocation2 + $0xa8] sm:$0xff] }
 0x162   : > { %2387 = vmatprep.mubr.bf16.mxu1 %v8567_v52  ;;  %v2562_v52 = vrot.slane %v8378_v40, 1 }
 0x164   : > { %v2563_v22 = vsel %vm2531_vm1, %v2558_v9, %v2562_v52  ;;  %v8806_v9 = vpack.c.bf16 %v3284_v0, %v3282_v59 }
 0x167   : > { %2787 = vmatmul.mubr.bf16.gmra.mrb[48].mxu0 %v2555_v12  ;;  %v3411_v12 = vrot.slane %v3409_v58, 1  ;;  %v7526_v58 = vld [vmem:[%s8316_s30 + $0x288] sm:$0xff]  }
 0x168   : > { %2794 = vmatprep.mubr.bf16.mxu0 %v2561_v46  ;;  %v3397_v46 = vshll.u32 %v3331_v63, 16 }
 0x169   : > { %2388 = vmatmul.mubr.bf16.gmra.mrb[48].mxu1 %v8582_v16  ;;  %v2569_v16 = vsel %vm2531_vm1, %v2564_v13, %v2568_v60  ;;  %v2586_v13 = vrot.slane %v2466_v4, 1 }
 0x16a   : > { %2395 = vmatprep.mubr.bf16.mxu1 %v8622_v62  ;;  %v2566_v62 = vrot.slane %v8436_v28, 1 }
 0x16c   : > { %v2567_v11 = vsel %vm2531_vm1, %v2562_v52, %v2566_v62  ;;  %v3412_v52 = vor.u32 %v3411_v12, %v3407_v51  ;;  %v8834_v51 = vpack.c.bf16 %v3292_v43, %v3290_v42  ;;  %v3291_v12 = vld [vmem:[#allocation2 + $0xb0] sm:$0xff] }
 0x16e   : > { %v3462_v4 = vshll.u32 %v8834_v51, 16 }
 0x16f   : > { %2795 = vmatmul.mubr.bf16.gmra.mrb[52].mxu0 %v2559_v17  ;;  %v3416_v17 = vrot.slane %v3414_v61, 1 }
 0x170   : > { %2802 = vmatprep.mubr.bf16.mxu0 %v2565_v10  ;;  %v3395_v10 = vshrl.u32 %v3331_v63, 16  ;;  %v7532_v63 = vld [vmem:[%s8316_s30 + $0x310] sm:$0xff]  }
 0x171   : > { %2396 = vmatmul.mubr.bf16.gmra.mrb[52].mxu1 %v8630_v18  ;;  %v2573_v18 = vsel %vm2531_vm1, %v2568_v60, %v2572_v24  ;;  %v3399_v60 = vrot.slane %v3397_v46, 1  ;;  %v7535_v46 = vld [vmem:[%s8316_s30 + $0x358] sm:$0xff]  }
 0x172   : > { %2403 = vmatprep.mubr.bf16.mxu1 %v8320_v53  ;;  %v2570_v53 = vrot.slane %v8488_v26, 1 }
 0x174   : > { %v2571_v3 = vsel %vm2531_vm1, %v2566_v62, %v2570_v53  ;;  %v3283_v62 = vld [vmem:[#allocation2 + $0x70] sm:$0xff] }
 0x177   : > { %2803 = vmatmul.mubr.bf16.gmra.mrb[56].mxu0 %v2563_v22  ;;  %v3426_v22 = vshrl.u32 %v8796_v50, 16 }
 0x178   : > { %2810 = vmatprep.mubr.bf16.mxu0 %v2569_v16  ;;  %v3430_v16 = vshll.u32 %v8806_v9, 16 }
 0x179   : > { %2404 = vmatmul.mubr.bf16.gmra.mrb[56].mxu1 %v8374_v35  ;;  %v2577_v35 = vsel %vm2531_vm1, %v2572_v24, %v2576_v27  ;;  %v2587_v24 = vsel %vm2531_vm1, %v2582_v44, %v2586_v13  ;;  %v3417_v27 = vsel %vm1717_vm0, %v3412_v52, %v3416_v17  ;;  %v7529_v13 = vld [vmem:[%s8316_s30 + $0x2d0] sm:$0xff]  }
 0x17a   : > { %2411 = vmatprep.mubr.bf16.mxu1 %v8325_v57  ;;  %v2574_v57 = vrot.slane %v8538_v23, 1 }
 0x17c   : > { %v2575_v37 = vsel %vm2531_vm1, %v2570_v53, %v2574_v57  ;;  %v3288_v53 = vld [vmem:[#allocation2 + $0x98] sm:$0xff] }
 0x17f   : > { %2811 = vmatmul.mubr.bf16.gmra.mrb[60].mxu0 %v2567_v11  ;;  %v2888_v11 = vld [vmem:[#allocation2 + $0x28] sm:$0xff] }
 0x180   : > { %2818 = vmatprep.mubr.bf16.mxu0 %v2573_v18  ;;  %v3286_v18 = vld [vmem:[#allocation2 + $0x88] sm:$0xff]  ;;  %v2944_v20 = vpack.c.bf16 %v8784_v29, %v2888_v11  ;;  %v3442_v29 = vshrl.u32 %v8806_v9, 16 }
 0x181   : > { %2412 = vmatmul.mubr.bf16.gmra.mrb[60].mxu1 %v8378_v40  ;;  %v1423_v40 = vld [vmem:[%s9846_s0 + $0x1e8] sm:$0xff] }
 0x182   : > { %2419 = vmatprep.mubr.bf16.mxu1 %v8421_v15  ;;  %v8770_v15 = vld [vmem:[%s9846_s0 + $0x1d0] sm:$0xff]  ;;  %v1489_v31 = vmax.f32 %v1423_v40, 0.0  ;;  %v3432_v40 = vrot.slane %v3430_v16, 1  ;;  %v7533_v11 = vld [vmem:[%s8316_s30 + $0x2d8] sm:$0xff]  }
 0x183   : > { %v9849_v21 = vmax.f32 %v8770_v15, 0.0 }
 0x184   : > { %1555 = vst [vmem:[#allocation2 + $0x1e8] sm:$0xff] %v1489_v31  ;;  %v8818_v31 = vpack.c.bf16 %v3288_v53, %v3286_v18  ;;  %v3444_v25 = vor.u32 %v3442_v29, %v3432_v40  ;;  %v7539_v18 = vld [vmem:[%s8316_s30 + $0x360] sm:$0xff]  }
 0x185   : > { %1552 = vst [vmem:[#allocation2 + $0x1d0] sm:$0xff] %v9849_v21  ;;  %v7537_v29 = vld [vmem:[%s8316_s30 + $0x2e0] sm:$0xff]  }
 0x186   : > { %v3446_v39 = vshll.u32 %v8818_v31, 16 }
 0x187   : > { %2819 = vmatmul.mubr.bf16.gmra.mrb[64].mxu0 %v2571_v3  ;;  %v3400_v3 = vor.u32 %v3399_v60, %v3395_v10  ;;  %v3296_v10 = vld [vmem:[#allocation2 + $0xd8] sm:$0xff] }
 0x188   : > { %2826 = vmatprep.mubr.bf16.mxu0 %v2577_v35  ;;  %v3448_v41 = vrot.slane %v3446_v39, 1 }
 0x189   : > { %2420 = vmatmul.mubr.bf16.gmra.mrb[64].mxu1 %v8436_v28  ;;  %v2578_v28 = vrot.slane %v8586_v19, 1 }
 0x18a   : > { %2427 = vmatprep.mubr.bf16.mxu1 %v8477_v8  ;;  %v3449_v0 = vsel %vm1717_vm0, %v3444_v25, %v3448_v41 }
 0x18b   : > { %v2579_v8 = vsel %vm2531_vm1, %v2574_v57, %v2578_v28 }
 0x18f   : > { %2827 = vmatmul.mubr.bf16.gmra.mrb[68].mxu0 %v2575_v37 }
 0x190   : > { %2834 = vmatprep.mubr.bf16.mxu0 %v2581_v34 }
 0x191   : > { %2428 = vmatmul.mubr.bf16.gmra.mrb[68].mxu1 %v8488_v26  ;;  %v3277_v26 = vld [vmem:[#allocation2 + $0x40] sm:$0xff] }
 0x192   : > { %2435 = vmatprep.mubr.bf16.mxu1 %v8518_v54  ;;  %v2583_v54 = vsel %vm2531_vm1, %v2578_v28, %v2582_v44  ;;  %v8802_v5 = vpack.c.bf16 %v3279_v55, %v3277_v26  ;;  %v3285_v28 = vld [vmem:[#allocation2 + $0x80] sm:$0xff]  ;;  %v7525_v26 = vld [vmem:[%s8316_s30 + $0x2c8] sm:$0xff]  }
 0x193   : > { %v8830_v48 = vpack.c.bf16 %v3287_v7, %v3285_v28  ;;  %v7531_v55 = vld [vmem:[%s8316_s30 + $0x350] sm:$0xff]  }
 0x194   : > { %v3418_v37 = vshrl.u32 %v8802_v5, 16 }
 0x195   : > { %v3438_v61 = vshll.u32 %v8830_v48, 16 }
 0x197   : > { %2835 = vmatmul.mubr.bf16.gmra.mrb[72].mxu0 %v2579_v8  ;;  %v3440_v52 = vrot.slane %v3438_v61, 1  ;;  %v3299_v61 = vld [vmem:[#allocation2 + $0xf0] sm:$0xff] }
 0x198   : > { %2842 = vmatprep.mubr.bf16.mxu0 %v2585_v49  ;;  %v7528_v49 = vld [vmem:[%s8316_s30 + $0x308] sm:$0xff]  }
 0x199   : > { %2436 = vmatmul.mubr.bf16.gmra.mrb[72].mxu1 %v8538_v23  ;;  %v3402_v23 = vshll.u32 %v8802_v5, 16 }
 0x19a   : > { %2443 = vmatprep.mubr.bf16.mxu1 %v8569_v56  ;;  %v3281_v56 = vld [vmem:[#allocation2 + $0x60] sm:$0xff] }
 0x19b   : > { %v3404_v35 = vrot.slane %v3402_v23, 1  ;;  %v8815_v57 = vpack.c.bf16 %v3283_v62, %v3281_v56  ;;  %v3464_v56 = vrot.slane %v3462_v4, 1  ;;  %v7530_v62 = vld [vmem:[%s8316_s30 + $0x290] sm:$0xff]   ;;  %v3304_v4 = vld [vmem:[#allocation2 + $0x118] sm:$0xff] }
 0x19d   : > { %v3422_v34 = vshll.u32 %v8815_v57, 16  ;;  %v3420_v8 = vor.u32 %v3418_v37, %v3404_v35  ;;  %v3434_v59 = vshrl.u32 %v8815_v57, 16  ;;  %v7543_v37 = vld [vmem:[%s8316_s30 + $0x368] sm:$0xff]  }
 0x19f   : > { %2843 = vmatmul.mubr.bf16.gmra.mrb[76].mxu0 %v2583_v54  ;;  %v3424_v44 = vrot.slane %v3422_v34, 1  ;;  %v3458_v54 = vshrl.u32 %v8818_v31, 16  ;;  %v3298_v34 = vld [vmem:[#allocation2 + $0xe8] sm:$0xff] }
 0x1a0   : > { %2850 = vmatprep.mubr.bf16.mxu0 %v2589_v6  ;;  %v3289_v6 = vld [vmem:[#allocation2 + $0xa0] sm:$0xff] }
 0x1a1   : > { %2444 = vmatmul.mubr.bf16.gmra.mrb[76].mxu1 %v8586_v19  ;;  %v3428_v19 = vor.u32 %v3426_v22, %v3416_v17  ;;  %v3425_v36 = vsel %vm1717_vm0, %v3420_v8, %v3424_v44  ;;  %v3294_v17 = vld [vmem:[#allocation2 + $0xc8] sm:$0xff]  ;;  %v3436_v23 = vor.u32 %v3434_v59, %v3424_v44  ;;  %v8849_v60 = vpack.c.bf16 %v3291_v12, %v3289_v6  ;;  %v7538_v8 = vld [vmem:[%s8316_s30 + $0x2a0] sm:$0xff]   ;;  %v7541_v44 = vld [vmem:[%s8316_s30 + $0x2e8] sm:$0xff]  }
 0x1a2   : > { %2451 = vmatprep.mubr.bf16.mxu1 %v8625_v2  ;;  %v3405_v2 = vsel %vm1717_vm0, %v3400_v3, %v3404_v35  ;;  %v7536_v22 = vld [vmem:[%s8316_s30 + $0x318] sm:$0xff]   ;;  %v3460_v16 = vor.u32 %v3458_v54, %v3448_v41  ;;  %v3293_v35 = vld [vmem:[#allocation2 + $0xc0] sm:$0xff] }
 0x1a3   : > { %v3433_v38 = vsel %vm1717_vm0, %v3428_v19, %v3432_v40  ;;  %v3441_v53 = vsel %vm1717_vm0, %v3436_v23, %v3440_v52  ;;  %v3454_v3 = vshll.u32 %v8849_v60, 16  ;;  %v3474_v40 = vshrl.u32 %v8834_v51, 16  ;;  %v3302_v54 = vld [vmem:[#allocation2 + $0x108] sm:$0xff]  ;;  %v7545_v6 = vld [vmem:[%s8316_s30 + $0x2f0] sm:$0xff]  }
 0x1a4   : > { %v3465_v19 = vsel %vm1717_vm0, %v3460_v16, %v3464_v56  ;;  %v3466_v25 = vshrl.u32 %v8849_v60, 16  ;;  %v7549_v16 = vld [vmem:[%s8316_s30 + $0x2f8] sm:$0xff]  }
 0x1a5   : > { %v3456_v28 = vrot.slane %v3454_v3, 1  ;;  %v3476_v42 = vor.u32 %v3474_v40, %v3464_v56  ;;  %v7555_v56 = vld [vmem:[%s8316_s30 + $0x440] sm:$0xff]   ;;  %v3306_v40 = vld [vmem:[#allocation2 + $0x128] sm:$0xff] }
 0x1a7   : > { %2851 = vmatmul.mubr.bf16.gmra.mrb[80].mxu0 %v2587_v24  ;;  %v8853_v24 = vpack.c.bf16 %v3296_v10, %v3294_v17  ;;  %v3468_v12 = vor.u32 %v3466_v25, %v3456_v28  ;;  %v7552_v17 = vld [vmem:[%s8316_s30 + $0x338] sm:$0xff]  }
 0x1a8   : > { %3782 = vmatprep.mubr.bf16.mxu0 %v3417_v27  ;;  %v3450_v27 = vshrl.u32 %v8830_v48, 16  ;;  %v3310_v25 = vld [vmem:[#allocation2 + $0x148] sm:$0xff] }
 0x1a9   : > { %2452 = vmatmul.mubr.bf16.gmra.mrb[80].mxu1 %v8634_v14  ;;  %v7527_v14 = vld [vmem:[%s8316_s30 + $0x348] sm:$0xff]   ;;  %v3478_v32 = vshll.u32 %v8853_v24, 16 }
 0x1aa   : > { %3132 = vmatprep.mubr.bf16.mxu1 %v2944_v20  ;;  %v7540_v20 = vld [vmem:[%s8316_s30 + $0x320] sm:$0xff]   ;;  %v3452_v39 = vor.u32 %v3450_v27, %v3440_v52  ;;  %v8892_v52 = vpack.c.bf16 %v3304_v4, %v3302_v54 }
 0x1ab   : > { %v3480_v43 = vrot.slane %v3478_v32, 1  ;;  %v3308_v32 = vld [vmem:[#allocation2 + $0x138] sm:$0xff] }
 0x1ac   : > { %v3510_v3 = vshll.u32 %v8892_v52, 16 }
 0x1af   : > { %3783 = vmatmul.mubr.bf16.vlgmr.msra.gmra.mrb[84].mxu0 %v3405_v2  ;;  %v3295_v2 = vld [vmem:[#allocation2 + $0xd0] sm:$0xff] }
 0x1b0   : > { %7083 = vmatpush3.bf16.msra.mxu0 %v7524_v33  ;;  %3790 = vmatprep.mubr.bf16.mxu0 %v3433_v38  ;;  %v7534_v33 = vld [vmem:[%s8316_s30 + $0x298] sm:$0xff]   ;;  %v3300_v38 = vld [vmem:[#allocation2 + $0xf8] sm:$0xff]  ;;  %v8869_v7 = vpack.c.bf16 %v3295_v2, %v3293_v35  ;;  %v3301_v35 = vld [vmem:[#allocation2 + $0x100] sm:$0xff] }
 0x1b1   : > { %7084 = vmatprep.subr.bf16.mxu0 %v7527_v14  ;;  %3133 = vmatmul.mubr.bf16.vlgmr.msra.gmra.mrb[84].mxu1 %v2943_v47  ;;  %v7544_v14 = vld [vmem:[%s8316_s30 + $0x328] sm:$0xff]   ;;  %v8872_v47 = vpack.c.bf16 %v3300_v38, %v3298_v34  ;;  %v7553_v2 = vld [vmem:[%s8316_s30 + $0x3c0] sm:$0xff]  }
 0x1b2   : > { %6983 = vmatpush3.bf16.msra.mxu1 %v7522_v45  ;;  %3140 = vmatprep.mubr.bf16.mxu1 %v8796_v50  ;;  %v3457_v45 = vsel %vm1717_vm0, %v3452_v39, %v3456_v28  ;;  %v3470_v41 = vshll.u32 %v8869_v7, 16  ;;  %v8909_v39 = vpack.c.bf16 %v3308_v32, %v3306_v40 }
 0x1b3   : > { %6984 = vmatprep.subr.bf16.mxu1 %v7525_v26  ;;  %v3297_v26 = vld [vmem:[#allocation2 + $0xe0] sm:$0xff]  ;;  %v3494_v59 = vshll.u32 %v8872_v47, 16  ;;  %v3506_v27 = vshrl.u32 %v8872_v47, 16 }
 0x1b4   : > { %7085 = vmatpush3.bf16.msra.mxu0 %v7528_v49  ;;  %v7547_v49 = vld [vmem:[%s8316_s30 + $0x370] sm:$0xff]  }
 0x1b5   : > { %7086 = vmatprep.subr.bf16.mxu0 %v7531_v55  ;;  %v7548_v55 = vld [vmem:[%s8316_s30 + $0x330] sm:$0xff]   ;;  %v3496_v23 = vrot.slane %v3494_v59, 1 }
 0x1b6   : > { %6985 = vmatpush3.bf16.msra.mxu1 %v7526_v58  ;;  %v3490_v58 = vshrl.u32 %v8853_v24, 16 }
 0x1b7   : > { %3791 = vmatmul.mubr.bf16.gmra.mrb[88].mxu0 %v3425_v36  ;;  %6986 = vmatprep.subr.bf16.mxu1 %v7529_v13  ;;  %v3481_v36 = vsel %vm1717_vm0, %v3476_v42, %v3480_v43  ;;  %v8889_v13 = vpack.c.bf16 %v3299_v61, %v3297_v26  ;;  %v3508_v38 = vor.u32 %v3506_v27, %v3496_v23  ;;  %v3311_v27 = vld [vmem:[#allocation2 + $0x150] sm:$0xff] }
 0x1b8   : > { %3798 = vmatprep.mubr.bf16.mxu0 %v3449_v0  ;;  %7087 = vmatpush3.bf16.msra.mxu0 %v7532_v63  ;;  %v7542_v63 = vld [vmem:[%s8316_s30 + $0x2a8] sm:$0xff]   ;;  %v7551_v0 = vld [vmem:[%s8316_s30 + $0x378] sm:$0xff]   ;;  %v3492_v10 = vor.u32 %v3490_v58, %v3480_v43 }
 0x1b9   : > { %7088 = vmatprep.subr.bf16.mxu0 %v7535_v46  ;;  %3141 = vmatmul.mubr.bf16.gmra.mrb[88].mxu1 %v8802_v5  ;;  %v3472_v46 = vrot.slane %v3470_v41, 1  ;;  %v3312_v41 = vld [vmem:[#allocation2 + $0x158] sm:$0xff] }
 0x1ba   : > { %3148 = vmatprep.mubr.bf16.mxu1 %v8806_v9  ;;  %6987 = vmatpush3.bf16.msra.mxu1 %v7530_v62  ;;  %v8921_v61 = vpack.c.bf16 %v3312_v41, %v3310_v25 }
 0x1bb   : > { %6988 = vmatprep.subr.bf16.mxu1 %v7533_v11  ;;  %v3473_v62 = vsel %vm1717_vm0, %v3468_v12, %v3472_v46  ;;  %v3482_v11 = vshrl.u32 %v8869_v7, 16 }
 0x1bc   : > { %7089 = vmatpush3.bf16.msra.mxu0 %v7536_v22  ;;  %v7546_v22 = vld [vmem:[%s8316_s30 + $0x2b0] sm:$0xff]  }
 0x1bd   : > { %7090 = vmatprep.subr.bf16.mxu0 %v7539_v18  ;;  %v3486_v18 = vshll.u32 %v8889_v13, 16 }
 0x1be   : > { %6989 = vmatpush3.bf16.msra.mxu1 %v7534_v33  ;;  %v3484_v33 = vor.u32 %v3482_v11, %v3472_v46  ;;  %v3538_v11 = vshrl.u32 %v8909_v39, 16 }
 0x1bf   : > { %3799 = vmatmul.mubr.bf16.gmra.mrb[92].mxu0 %v3441_v53  ;;  %6990 = vmatprep.subr.bf16.mxu1 %v7537_v29  ;;  %v3497_v53 = vsel %vm1717_vm0, %v3492_v10, %v3496_v23  ;;  %v3512_v29 = vrot.slane %v3510_v3, 1 }
 0x1c0   : > { %3806 = vmatprep.mubr.bf16.mxu0 %v3465_v19  ;;  %7091 = vmatpush3.bf16.msra.mxu0 %v7540_v20  ;;  %v3303_v20 = vld [vmem:[#allocation2 + $0x110] sm:$0xff]  ;;  %v7550_v19 = vld [vmem:[%s8316_s30 + $0x2b8] sm:$0xff]  }
 0x1c1   : > { %7092 = vmatprep.subr.bf16.mxu0 %v7543_v37  ;;  %3149 = vmatmul.mubr.bf16.gmra.mrb[92].mxu1 %v8815_v57  ;;  %v3488_v37 = vrot.slane %v3486_v18, 1  ;;  %v8907_v34 = vpack.c.bf16 %v3303_v20, %v3301_v35  ;;  %v3513_v43 = vsel %vm1717_vm0, %v3508_v38, %v3512_v29  ;;  %v3542_v18 = vshll.u32 %v8921_v61, 16  ;;  %v3314_v20 = vld [vmem:[#allocation2 + $0x168] sm:$0xff] }
 0x1c2   : > { %3156 = vmatprep.mubr.bf16.mxu1 %v8818_v31  ;;  %6991 = vmatpush3.bf16.msra.mxu1 %v7538_v8  ;;  %v3522_v8 = vshrl.u32 %v8892_v52, 16 }
 0x1c3   : > { %6992 = vmatprep.subr.bf16.mxu1 %v7541_v44  ;;  %v3489_v28 = vsel %vm1717_vm0, %v3484_v33, %v3488_v37  ;;  %v3502_v42 = vshll.u32 %v8907_v34, 16  ;;  %v3526_v44 = vshll.u32 %v8909_v39, 16 }
 0x1c4   : > { %7093 = vmatpush3.bf16.msra.mxu0 %v7544_v14  ;;  %v3498_v14 = vshrl.u32 %v8889_v13, 16  ;;  %v3524_v58 = vor.u32 %v3522_v8, %v3512_v29 }
 0x1c5   : > { %7094 = vmatprep.subr.bf16.mxu0 %v7547_v49  ;;  %v3305_v49 = vld [vmem:[#allocation2 + $0x120] sm:$0xff]  ;;  %v3528_v59 = vrot.slane %v3526_v44, 1 }
 0x1c6   : > { %6993 = vmatpush3.bf16.msra.mxu1 %v7542_v63  ;;  %v3500_v26 = vor.u32 %v3498_v14, %v3488_v37  ;;  %v3544_v37 = vrot.slane %v3542_v18, 1 }
 0x1c7   : > { %3807 = vmatmul.mubr.bf16.gmra.mrb[96].mxu0 %v3457_v45  ;;  %6994 = vmatprep.subr.bf16.mxu1 %v7545_v6  ;;  %v3307_v45 = vld [vmem:[#allocation2 + $0x130] sm:$0xff]  ;;  %v3514_v6 = vshrl.u32 %v8907_v34, 16  ;;  %v3540_v33 = vor.u32 %v3538_v11, %v3528_v59 }
 0x1c8   : > { %3814 = vmatprep.mubr.bf16.mxu0 %v3481_v36  ;;  %7095 = vmatpush3.bf16.msra.mxu0 %v7548_v55  ;;  %v3504_v55 = vrot.slane %v3502_v42, 1  ;;  %v8919_v36 = vpack.c.bf16 %v3307_v45, %v3305_v49 }
 0x1c9   : > { %7096 = vmatprep.subr.bf16.mxu0 %v7551_v0  ;;  %3157 = vmatmul.mubr.bf16.gmra.mrb[96].mxu1 %v8830_v48 }
 0x1ca   : > { %3164 = vmatprep.mubr.bf16.mxu1 %v8834_v51  ;;  %6995 = vmatpush3.bf16.msra.mxu1 %v7546_v22  ;;  %v3505_v23 = vsel %vm1717_vm0, %v3500_v26, %v3504_v55  ;;  %v3518_v22 = vshll.u32 %v8919_v36, 16  ;;  %v3516_v40 = vor.u32 %v3514_v6, %v3504_v55 }
 0x1cb   : > { %6996 = vmatprep.subr.bf16.mxu1 %v7549_v16 }
 0x1cc   : > { %7097 = vmatpush3.bf16.msra.mxu0 %v7552_v17  ;;  %v3520_v32 = vrot.slane %v3518_v22, 1 }
 0x1cd   : > { %7282 = vmatprep.subr.bf16.mxu0 %v7555_v56 }
 0x1ce   : > { %6997 = vmatpush3.bf16.msra.mxu1 %v7550_v19  ;;  %v3316_v19 = vld [vmem:[#allocation2 + $0x178] sm:$0xff]  ;;  %v3521_v25 = vsel %vm1717_vm0, %v3516_v40, %v3520_v32 }
 0x1cf   : > { %3815 = vmatmul.mubr.bf16.gmra.mrb[100].mxu0 %v3473_v62  ;;  %7182 = vmatprep.subr.bf16.mxu1 %v7553_v2  ;;  %v3529_v62 = vsel %vm1717_vm0, %v3524_v58, %v3528_v59  ;;  %v8941_v38 = vpack.c.bf16 %v3316_v19, %v3314_v20  ;;  %v3545_v58 = vsel %vm1717_vm0, %v3540_v33, %v3544_v37  ;;  %v3554_v59 = vshrl.u32 %v8921_v61, 16 }
 0x1d0   : > { %3822 = vmatprep.mubr.bf16.mxu0 %v3497_v53  ;;  %v3309_v53 = vld [vmem:[#allocation2 + $0x140] sm:$0xff] }
 0x1d1   : > { %3165 = vmatmul.mubr.bf16.gmra.mrb[100].mxu1 %v8849_v60  ;;  %v8939_v2 = vpack.c.bf16 %v3311_v27, %v3309_v53  ;;  %9867 = vst [vmem:[#allocation6_spill] sm:$0xff] %v8941_v38 }
 0x1d2   : > { %3172 = vmatprep.mubr.bf16.mxu1 %v8853_v24 }
 0x1d3   : > { %9866 = vst [vmem:[#allocation5_spill] sm:$0xff] %v8939_v2  ;;  %v3534_v41 = vshll.u32 %v8939_v2, 16  ;;  %v3546_v19 = vshrl.u32 %v8939_v2, 16 }
 0x1d5   : > { %v3536_v22 = vrot.slane %v3534_v41, 1  ;;  %v3319_v41 = vld [vmem:[#allocation2 + $0x190] sm:$0xff] }
 0x1d7   : > { %3823 = vmatmul.mubr.bf16.gmra.mrb[104].mxu0 %v3489_v28 }
 0x1d8   : > { %3830 = vmatprep.mubr.bf16.mxu0 %v3513_v43  ;;  %v3530_v43 = vshrl.u32 %v8919_v36, 16 }
 0x1d9   : > { %3173 = vmatmul.mubr.bf16.gmra.mrb[104].mxu1 %v8869_v7 }
 0x1da   : > { %v6498_v63 = vpop.f32.mrb[0].mxu0  ;;  %v6540_v0 = vpop.f32.mrb[0].mxu1  ;;  %3180 = vmatprep.mubr.bf16.mxu1 %v8872_v47 }
 0x1db   : > { %v6499_v54 = vpop.f32.mrb[1].mxu0  ;;  %v6541_v4 = vpop.f32.mrb[1].mxu1 }
 0x1dc   : > { %v8925_v12 = vadd.f32 %v6499_v54, %v6498_v63  ;;  %v8927_v46 = vadd.f32 %v6541_v4, %v6540_v0  ;;  %v6501_v17 = vpop.f32.mrb[2].mxu0  ;;  %v6543_v10 = vpop.f32.mrb[2].mxu1  ;;  %v3558_v63 = vshll.u32 %v8941_v38, 16  ;;  %v3313_v0 = vld [vmem:[#allocation2 + $0x160] sm:$0xff]  ;;  %v3315_v54 = vld [vmem:[#allocation2 + $0x170] sm:$0xff] }
 0x1dd   : > { %v6502_v16 = vpop.f32.mrb[3].mxu0  ;;  %v6544_v56 = vpop.f32.mrb[3].mxu1 }
 0x1de   : > { %v8935_v3 = vadd.f32 %v6502_v16, %v6501_v17  ;;  %v8937_v35 = vadd.f32 %v6544_v56, %v6543_v10  ;;  %v3318_v17 = vld [vmem:[#allocation2 + $0x188] sm:$0xff]  ;;  %v3320_v10 = vld [vmem:[#allocation2 + $0x198] sm:$0xff]  ;;  %v8959_v16 = vpack.c.bf16 %v3315_v54, %v3313_v0  ;;  %v3556_v56 = vor.u32 %v3554_v59, %v3544_v37 }
 0x1df   : > { %3831 = vmatmul.mubr.bf16.gmra.mrb[108].mxu0 %v3505_v23  ;;  %v3532_v23 = vor.u32 %v3530_v43, %v3520_v32  ;;  %v8961_v11 = vpack.c.bf16 %v3320_v10, %v3318_v17  ;;  %v3324_v59 = vld [vmem:[#allocation2 + $0x1b8] sm:$0xff] }
 0x1e0   : > { %3838 = vmatprep.mubr.bf16.mxu0 %v3529_v62  ;;  %v3560_v62 = vrot.slane %v3558_v63, 1  ;;  %v3550_v37 = vshll.u32 %v8959_v16, 16  ;;  %v3548_v63 = vor.u32 %v3546_v19, %v3536_v22 }
 0x1e1   : > { %3181 = vmatmul.mubr.bf16.gmra.mrb[108].mxu1 %v8889_v13 }
 0x1e2   : > { %v6504_v29 = vpop.f32.mrb[4].mxu0  ;;  %v6546_v28 = vpop.f32.mrb[4].mxu1  ;;  %3188 = vmatprep.mubr.bf16.mxu1 %v8892_v52  ;;  %v3561_v43 = vsel %vm1717_vm0, %v3556_v56, %v3560_v62  ;;  %v3552_v0 = vrot.slane %v3550_v37, 1  ;;  %v3321_v37 = vld [vmem:[#allocation2 + $0x1a0] sm:$0xff] }
 0x1e3   : > { %v6505_v14 = vpop.f32.mrb[5].mxu0  ;;  %v6547_v42 = vpop.f32.mrb[5].mxu1 }
 0x1e4   : > { %v8945_v8 = vadd.f32 %v6505_v14, %v6504_v29  ;;  %v8947_v44 = vadd.f32 %v6547_v42, %v6546_v28  ;;  %v6507_v49 = vpop.f32.mrb[6].mxu0  ;;  %v6549_v45 = vpop.f32.mrb[6].mxu1  ;;  %v3537_v28 = vsel %vm1717_vm0, %v3532_v23, %v3536_v22 }
 0x1e5   : > { %v6508_v26 = vpop.f32.mrb[7].mxu0  ;;  %v6550_v55 = vpop.f32.mrb[7].mxu1 }
 0x1e6   : > { %v8955_v4 = vadd.f32 %v6508_v26, %v6507_v49  ;;  %v8957_v6 = vadd.f32 %v6550_v55, %v6549_v45  ;;  %v3570_v49 = vshrl.u32 %v8941_v38, 16  ;;  %v3574_v45 = vshll.u32 %v8961_v11, 16 }
 0x1e7   : > { %3839 = vmatmul.mubr.bf16.gmra.mrb[112].mxu0 %v3521_v25  ;;  %v3317_v25 = vld [vmem:[#allocation2 + $0x180] sm:$0xff] }
 0x1e8   : > { %3846 = vmatprep.mubr.bf16.mxu0 %v3545_v58  ;;  %v3322_v58 = vld [vmem:[#allocation2 + $0x1a8] sm:$0xff]  ;;  %v8979_v54 = vpack.c.bf16 %v3319_v41, %v3317_v25  ;;  %v3572_v17 = vor.u32 %v3570_v49, %v3560_v62  ;;  %v3576_v10 = vrot.slane %v3574_v45, 1  ;;  %v3586_v45 = vshrl.u32 %v8961_v11, 16 }
 0x1e9   : > { %3189 = vmatmul.mubr.bf16.gmra.mrb[112].mxu1 %v8907_v34  ;;  %v8981_v23 = vpack.c.bf16 %v3324_v59, %v3322_v58  ;;  %v3326_v59 = vld [vmem:[#allocation2 + $0x1c8] sm:$0xff] }
 0x1ea   : > { %v6510_v18 = vpop.f32.mrb[8].mxu0  ;;  %v6552_v53 = vpop.f32.mrb[8].mxu1  ;;  %3196 = vmatprep.mubr.bf16.mxu1 %v8909_v39  ;;  %v3566_v62 = vshll.u32 %v8979_v54, 16  ;;  %v3577_v49 = vsel %vm1717_vm0, %v3572_v17, %v3576_v10  ;;  %v9003_v17 = vpack.c.bf16 %v1487_v30, %v3326_v59  ;;  %v9876_v59 = vmax.f32 %v8770_v15, 0.0 }
 0x1eb   : > { %v6511_v27 = vpop.f32.mrb[9].mxu0  ;;  %v6553_v20 = vpop.f32.mrb[9].mxu1  ;;  %9870 = vst [vmem:[#allocation9_spill] sm:$0xff] %v8981_v23  ;;  %v3590_v25 = vshll.u32 %v8981_v23, 16 }
 0x1ec   : > { %v8965_v40 = vadd.f32 %v6511_v27, %v6510_v18  ;;  %v8967_v33 = vadd.f32 %v6553_v20, %v6552_v53  ;;  %v6513_v32 = vpop.f32.mrb[10].mxu0  ;;  %v6555_v29 = vpop.f32.mrb[10].mxu1  ;;  %v3562_v20 = vshrl.u32 %v8959_v16, 16  ;;  %9873 = vst [vmem:[#allocation12_spill] sm:$0xff] %v9003_v17 }
 0x1ed   : > { %v6514_v14 = vpop.f32.mrb[11].mxu0  ;;  %v6556_v42 = vpop.f32.mrb[11].mxu1 }
 0x1ee   : > { %9868 = vst [vmem:[#allocation7_spill] sm:$0xff] %v8967_v33  ;;  %v8975_v26 = vadd.f32 %v6514_v14, %v6513_v32  ;;  %v8977_v55 = vadd.f32 %v6556_v42, %v6555_v29  ;;  %v3323_v14 = vld [vmem:[#allocation2 + $0x1b0] sm:$0xff] }
 0x1ef   : > { %3847 = vmatmul.mubr.bf16.gmra.mrb[116].mxu0 %v3537_v28  ;;  %v3553_v28 = vsel %vm1717_vm0, %v3548_v63, %v3552_v0  ;;  %v8999_v63 = vpack.c.bf16 %v3323_v14, %v3321_v37  ;;  %v3602_v14 = vshrl.u32 %v8981_v23, 16 }
 0x1f0   : > { %9869 = vst [vmem:[#allocation8_spill] sm:$0xff] %v8977_v55  ;;  %3854 = vmatprep.mubr.bf16.mxu0 %v3561_v43 }
 0x1f1   : > { %3197 = vmatmul.mubr.bf16.gmra.mrb[116].mxu1 %v8919_v36  ;;  %v3594_v15 = vshrl.u32 %v8999_v63, 16 }
 0x1f2   : > { %v6516_v56 = vpop.f32.mrb[12].mxu0  ;;  %v6558_v18 = vpop.f32.mrb[12].mxu1  ;;  %3204 = vmatprep.mubr.bf16.mxu1 %v8921_v61 }
 0x1f3   : > { %v6517_v53 = vpop.f32.mrb[13].mxu0  ;;  %v6559_v27 = vpop.f32.mrb[13].mxu1 }
 0x1f4   : > { %v8985_v32 = vadd.f32 %v6517_v53, %v6516_v56  ;;  %v8987_v29 = vadd.f32 %v6559_v27, %v6558_v18  ;;  %v6519_v22 = vpop.f32.mrb[14].mxu0  ;;  %v6561_v19 = vpop.f32.mrb[14].mxu1  ;;  %v3564_v56 = vor.u32 %v3562_v20, %v3552_v0  ;;  %v3568_v18 = vrot.slane %v3566_v62, 1 }
 0x1f5   : > { %v6520_v42 = vpop.f32.mrb[15].mxu0  ;;  %v6562_v43 = vpop.f32.mrb[15].mxu1  ;;  %v3588_v53 = vor.u32 %v3586_v45, %v3576_v10  ;;  %v3592_v27 = vrot.slane %v3590_v25, 1 }
 0x1f6   : > { %9871 = vst [vmem:[#allocation10_spill] sm:$0xff] %v8987_v29  ;;  %v8995_v41 = vadd.f32 %v6520_v42, %v6519_v22  ;;  %v8997_v58 = vadd.f32 %v6562_v43, %v6561_v19  ;;  %v3578_v19 = vshrl.u32 %v8979_v54, 16  ;;  %v3582_v42 = vshll.u32 %v8999_v63, 16 }
 0x1f7   : > { %3855 = vmatmul.mubr.bf16.gmra.mrb[120].mxu0 %v3553_v28  ;;  %v3569_v1 = vsel %vm1717_vm0, %v3564_v56, %v3568_v18  ;;  %v3593_v37 = vsel %vm1717_vm0, %v3588_v53, %v3592_v27  ;;  %v3606_v43 = vshll.u32 %v9003_v17, 16 }
 0x1f8   : > { %9872 = vst [vmem:[#allocation11_spill] sm:$0xff] %v8997_v58  ;;  %3862 = vmatprep.mubr.bf16.mxu0 %v3577_v49  ;;  %v3325_v49 = vld [vmem:[#allocation2 + $0x1c0] sm:$0xff]  ;;  %v3584_v25 = vrot.slane %v3582_v42, 1 }
 0x1f9   : > { %3205 = vmatmul.mubr.bf16.gmra.mrb[120].mxu1 %v8939_v2  ;;  %v9023_v56 = vpack.c.bf16 %v9876_v59, %v3325_v49  ;;  %v3608_v53 = vrot.slane %v3606_v43, 1  ;;  %v3329_v43 = vld [vmem:[#allocation2 + $0x1e0] sm:$0x1]  ;;  %v1424_v49 = vld [vmem:[%s9846_s0 + $0x1f0] sm:$0xff] }
 0x1fa   : > { %v6522_v21 = vpop.f32.mrb[16].mxu0  ;;  %v6564_v29 = vpop.f32.mrb[16].mxu1  ;;  %3212 = vmatprep.mubr.bf16.mxu1 %v8941_v38  ;;  %v1490_v59 = vmax.f32 %v1424_v49, 0.0 }
 0x1fb   : > { %v6523_v55 = vpop.f32.mrb[17].mxu0  ;;  %v6565_v22 = vpop.f32.mrb[17].mxu1 }
 0x1fc   : > { %v9008_v28 = vadd.f32 %v6523_v55, %v6522_v21  ;;  %v9010_v0 = vadd.f32 %v6565_v22, %v6564_v29  ;;  %v6525_v10 = vpop.f32.mrb[18].mxu0  ;;  %v6567_v20 = vpop.f32.mrb[18].mxu1  ;;  %v3330_v55 = vld [vmem:[#allocation2 + $0x1e8] sm:$0x1]  ;;  %v3580_v29 = vor.u32 %v3578_v19, %v3568_v18  ;;  %v3604_v22 = vor.u32 %v3602_v14, %v3592_v27  ;;  %1556 = vst [vmem:[#allocation2 + $0x1f0] sm:$0xff] %v1490_v59 }
 0x1fd   : > { %v6526_v30 = vpop.f32.mrb[19].mxu0  ;;  %v6568_v62 = vpop.f32.mrb[19].mxu1  ;;  %v3598_v27 = vshll.u32 %v9023_v56, 16 }
 0x1fe   : > { %9874 = vst [vmem:[#allocation13_spill] sm:$0xff] %v9010_v0  ;;  %v9017_v45 = vadd.f32 %v6526_v30, %v6525_v10  ;;  %v9019_v21 = vadd.f32 %v6568_v62, %v6567_v20  ;;  %v3360_v0 = vpack.c.bf16 %v3330_v55, %v3330_v55  ;;  %v3585_v10 = vsel %vm1717_vm0, %v3580_v29, %v3584_v25 }
 0x1ff   : > { %3863 = vmatmul.mubr.bf16.gmra.mrb[124].mxu0 %v3569_v1  ;;  %v3609_v62 = vsel %vm1717_vm0, %v3604_v22, %v3608_v53  ;;  %v3596_v55 = vor.u32 %v3594_v15, %v3584_v25  ;;  %v3359_v29 = vpack.c.bf16 %v3329_v43, %v3329_v43  ;;  %v3610_v25 = vshrl.u32 %v9023_v56, 16 }
 0x200   : > { %9875 = vst [vmem:[#allocation14_spill] sm:$0xff] %v9019_v21  ;;  %3870 = vmatprep.mubr.bf16.mxu0 %v3593_v37  ;;  %v3618_v37 = vshrl.u32 %v9003_v17, 16  ;;  %v3622_v14 = vshll.u32 %v3360_v0, 16  ;;  %v3600_v0 = vrot.slane %v3598_v27, 1 }
 0x201   : > { %3213 = vmatmul.mubr.bf16.gmra.mrb[124].mxu1 %v8959_v16  ;;  %v3614_v15 = vshll.u32 %v3359_v29, 16 }
 0x202   : > { %v6528_v58 = vpop.f32.mrb[20].mxu0  ;;  %v6570_v33 = vpop.f32.mrb[20].mxu1  ;;  %3220 = vmatprep.mubr.bf16.mxu1 %v8961_v11  ;;  %v3620_v22 = vor.u32 %v3618_v37, %v3608_v53  ;;  %v3612_v49 = vor.u32 %v3610_v25, %v3600_v0 }
 0x203   : > { %v6529_v38 = vpop.f32.mrb[21].mxu0  ;;  %v6571_v2 = vpop.f32.mrb[21].mxu1  ;;  %v3616_v59 = vrot.slane %v3614_v15, 1 }
 0x204   : > { %v9027_v20 = vadd.f32 %v6529_v38, %v6528_v58  ;;  %v9029_v18 = vadd.f32 %v6571_v2, %v6570_v33  ;;  %v6531_v19 = vpop.f32.mrb[22].mxu0  ;;  %v6573_v42 = vpop.f32.mrb[22].mxu1  ;;  %v9043_v33 = vld [vmem:[%s9846_s0 + $0x1f8] sm:$0xff] }
 0x205   : > { %v6532_v1 = vpop.f32.mrb[23].mxu0  ;;  %v6574_v30 = vpop.f32.mrb[23].mxu1  ;;  %9879 = vst [vmem:[#allocation17_spill] sm:$0xff] %v9043_v33  ;;  %v9852_v58 = vmax.f32 %v9043_v33, 0.0 }
 0x206   : > { %9877 = vst [vmem:[#allocation15_spill] sm:$0xff] %v9029_v18  ;;  %v9036_v38 = vadd.f32 %v6532_v1, %v6531_v19  ;;  %v9038_v2 = vadd.f32 %v6574_v30, %v6573_v42  ;;  %v3624_v19 = vrot.slane %v3622_v14, 1  ;;  %v3924_v14 = vld [vmem:[#allocation2 + $0x28] sm:$0xfc]  ;;  %v7588_v18 = vld [vmem:[#allocation2 + $0x38] sm:$0xff] }
 0x207   : > { %3871 = vmatmul.mubr.bf16.gmra.mrb[128].mxu0 %v3585_v10  ;;  %1557 = vst [vmem:[#allocation2 + $0x1f8] sm:$0xff] %v9852_v58  ;;  %v4352_v58 = vld [vmem:[#allocation2 + $0x58] sm:$0xff]  ;;  %v3928_v21 = vpack.c.bf16 %v7588_v18, %v3924_v14  ;;  %v4349_v14 = vld [vmem:[#allocation2 + $0x40] sm:$0xff] }
 0x208   : > { %9878 = vst [vmem:[#allocation16_spill] sm:$0xff] %v9038_v2  ;;  %3878 = vmatprep.mubr.bf16.mxu0 %v3609_v62  ;;  %v3601_v2 = vsel %vm1717_vm0, %v3596_v55, %v3600_v0  ;;  %v3625_v53 = vsel %vm1717_vm0, %v3620_v22, %v3624_v19 }
 0x209   : > { %3221 = vmatmul.mubr.bf16.gmra.mrb[128].mxu1 %v8979_v54 }
 0x20a   : > { %v6534_v42 = vpop.f32.mrb[24].mxu0  ;;  %3228 = vmatprep.mubr.bf16.mxu1 %v8981_v23  ;;  %v6576_v37 = vpop.f32.mrb[24].mxu1 }
 0x20b   : > { %v6535_v1 = vpop.f32.mrb[25].mxu0  ;;  %v6577_v43 = vpop.f32.mrb[25].mxu1 }
 0x20c   : > { %v9052_v10 = vadd.f32 %v6535_v1, %v6534_v42  ;;  %v6537_v30 = vpop.f32.mrb[26].mxu0  ;;  %v9060_v42 = vadd.f32 %v6577_v43, %v6576_v37  ;;  %v6579_v55 = vpop.f32.mrb[26].mxu1  ;;  %v4350_v1 = vld [vmem:[#allocation2 + $0x48] sm:$0xff]  ;;  %v3923_v37 = vld [vmem:[#allocation2 + $0x20] sm:$0xfc] }
 0x20d   : > { %v6538_v27 = vpop.f32.mrb[27].mxu0  ;;  %v6580_v29 = vpop.f32.mrb[27].mxu1  ;;  %v4406_v0 = vpack.c.bf16 %v4352_v58, %v4350_v1  ;;  %v4354_v58 = vld [vmem:[#allocation2 + $0x68] sm:$0xff] }
 0x20e   : > { %v9058_v62 = vadd.f32 %v6538_v27, %v6537_v30  ;;  %9880 = vst [vmem:[#allocation18_spill] sm:$0xff] %v9060_v42  ;;  %v9062_v23 = vadd.f32 %v6580_v29, %v6579_v55  ;;  %v3617_v30 = vsel %vm1717_vm0, %v3612_v49, %v3616_v59  ;;  %v3997_v27 = vrot.slane %v3928_v21, 1  ;;  %v4351_v55 = vld [vmem:[#allocation2 + $0x50] sm:$0xff]  ;;  %v4356_v59 = vld [vmem:[#allocation2 + $0x78] sm:$0xff] }
 0x20f   : > { %3879 = vmatmul.mubr.bf16.gmra.mrb[132].mxu0 %v3601_v2  ;;  %v9072_v42 = vpack.c.bf16 %v4356_v59, %v4354_v58 }
 0x210   : > { %3886 = vmatprep.mubr.bf16.mxu0 %v3625_v53  ;;  %9881 = vst [vmem:[#allocation19_spill] sm:$0xff] %v9062_v23  ;;  %v3998_v53 = vrot.slane %v8796_v50, 1 }
 0x211   : > { %3229 = vmatmul.mubr.bf16.gmra.mrb[132].mxu1 %v8999_v63  ;;  %9882 = vst [vmem:[#allocation20_spill] sm:$0xff] %v9072_v42 }
 0x212   : > { %v6698_v33 = vpop.f32.mrb[28].mxu0  ;;  %3236 = vmatprep.mubr.bf16.mxu1 %v9003_v17  ;;  %v6598_v43 = vpop.f32.mrb[28].mxu1  ;;  %v3999_v21 = vsel %vm2531_vm1, %v3997_v27, %v3998_v53 }
 0x213   : > { %v6699_v22 = vpop.f32.mrb[29].mxu0  ;;  %v6599_v18 = vpop.f32.mrb[29].mxu1 }
 0x214   : > { %v6700_v2 = vadd.f32 %v6699_v22, %v6698_v33  ;;  %v6701_v19 = vpop.f32.mrb[30].mxu0  ;;  %v6600_v29 = vadd.f32 %v6599_v18, %v6598_v43  ;;  %v6601_v33 = vpop.f32.mrb[30].mxu1  ;;  %v7589_v22 = vld [vmem:[#allocation2 + $0x30] sm:$0xff] }
 0x215   : > { %v6702_v25 = vpop.f32.mrb[31].mxu0  ;;  %v3927_v49 = vpack.c.bf16 %v7589_v22, %v3923_v37  ;;  %v6602_v1 = vpop.f32.mrb[31].mxu1  ;;  %v7556_v18 = vld [vmem:[%s8316_s30 + $0x400] sm:$0xff]  }
 0x216   : > { %v6703_v15 = vadd.f32 %v6702_v25, %v6701_v19  ;;  %v2350_v50 = vadd.f32 %v6600_v29, %v8925_v12  ;;  %v6603_v19 = vadd.f32 %v6602_v1, %v6601_v33  ;;  %v4405_v25 = vpack.c.bf16 %v4351_v55, %v4349_v14  ;;  %v7559_v29 = vld [vmem:[%s8316_s30 + $0x448] sm:$0xff]  }
 0x217   : > { %3887 = vmatmul.mubr.bf16.gmra.mrb[136].mxu0 %v3617_v30  ;;  %v3994_v27 = vrot.slane %v3927_v49, 1  ;;  %v3995_v12 = vrot.slane %v8802_v5, 1  ;;  %v9858_v55 = vrot.slane %v8806_v9, 1  ;;  %v7560_v49 = vld [vmem:[%s8316_s30 + $0x408] sm:$0xff]  }
 0x218   : > { %4594 = vmatprep.mubr.bf16.mxu0 %v4406_v0  ;;  %v9074_v37 = vadd.f32 %v6700_v2, %v2350_v50  ;;  %v2353_v22 = vadd.f32 %v6603_v19, %v8935_v3  ;;  %v4353_v3 = vld [vmem:[#allocation2 + $0x60] sm:$0xff]  ;;  %v4355_v2 = vld [vmem:[#allocation2 + $0x70] sm:$0xff]  ;;  %v4360_v50 = vld [vmem:[#allocation2 + $0x98] sm:$0xff] }
 0x219   : > { %3237 = vmatmul.mubr.bf16.gmra.mrb[136].mxu1 %v9023_v56  ;;  %v3996_v1 = vsel %vm2531_vm1, %v3994_v27, %v3995_v12  ;;  %v4407_v27 = vpack.c.bf16 %v4355_v2, %v4353_v3  ;;  %v4006_v2 = vrot.slane %v8818_v31, 1 }
 0x21a   : > { %v6704_v23 = vpop.f32.mrb[32].mxu0  ;;  %9883 = vst [vmem:[#allocation21_spill] sm:$0xff] %v9074_v37  ;;  %4208 = vmatprep.mubr.bf16.mxu1 %v3999_v21  ;;  %v6604_v33 = vpop.f32.mrb[32].mxu1  ;;  %v4358_v21 = vld [vmem:[#allocation2 + $0x88] sm:$0xff]  ;;  %v7564_v37 = vld [vmem:[%s8316_s30 + $0x410] sm:$0xff]  }
 0x21b   : > { %v6705_v30 = vpop.f32.mrb[33].mxu0  ;;  %v6605_v58 = vpop.f32.mrb[33].mxu1 }
 0x21c   : > { %v6706_v0 = vadd.f32 %v6705_v30, %v6704_v23  ;;  %v6707_v43 = vpop.f32.mrb[34].mxu0  ;;  %v9080_v23 = vadd.f32 %v6703_v15, %v2353_v22  ;;  %v6606_v59 = vadd.f32 %v6605_v58, %v6604_v33  ;;  %v6607_v5 = vpop.f32.mrb[34].mxu1  ;;  %v4003_v30 = vsel %vm2531_vm1, %v3998_v53, %v9858_v55 }
 0x21d   : > { %v6708_v17 = vpop.f32.mrb[35].mxu0  ;;  %v6608_v15 = vpop.f32.mrb[35].mxu1 }
 0x21e   : > { %v6709_v14 = vadd.f32 %v6708_v17, %v6707_v43  ;;  %9884 = vst [vmem:[#allocation22_spill] sm:$0xff] %v9080_v23  ;;  %v7554_v17 = vld [vmem:[%s8316_s30 + $0x380] sm:$0xff]   ;;  %v7563_v43 = vld [vmem:[%s8316_s30 + $0x450] sm:$0xff]   ;;  %v6609_v22 = vadd.f32 %v6608_v15, %v6607_v5  ;;  %v7567_v5 = vld [vmem:[%s8316_s30 + $0x458] sm:$0xff]  }
 0x21f   : > { %4595 = vmatmul.mubr.bf16.vlgmr.msra.gmra.mrb[140].mxu0 %v4405_v25  ;;  %v7557_v25 = vld [vmem:[%s8316_s30 + $0x3c8] sm:$0xff]  }
 0x220   : > { %7283 = vmatpush3.bf16.msra.mxu0 %v7556_v18  ;;  %4602 = vmatprep.mubr.bf16.mxu0 %v9072_v42  ;;  %v2358_v18 = vadd.f32 %v6606_v59, %v8945_v8  ;;  %v2361_v53 = vadd.f32 %v6609_v22, %v8955_v4  ;;  %v4000_v8 = vrot.slane %v8815_v57, 1  ;;  %v7558_v59 = vld [vmem:[%s8316_s30 + $0x388] sm:$0xff]   ;;  %v7565_v22 = vld [vmem:[%s8316_s30 + $0x3d8] sm:$0xff]  }
 0x221   : > { %7284 = vmatprep.subr.bf16.mxu0 %v7559_v29  ;;  %4209 = vmatmul.mubr.bf16.vlgmr.msra.gmra.mrb[140].mxu1 %v3996_v1  ;;  %v4410_v29 = vpack.c.bf16 %v4360_v50, %v4358_v21  ;;  %v7561_v1 = vld [vmem:[%s8316_s30 + $0x3d0] sm:$0xff]   ;;  %v4359_v21 = vld [vmem:[#allocation2 + $0x90] sm:$0xff]  ;;  %v7568_v50 = vld [vmem:[%s8316_s30 + $0x418] sm:$0xff]  }
 0x222   : > { %v6710_v19 = vpop.f32.mrb[36].mxu0  ;;  %v9093_v42 = vadd.f32 %v6706_v0, %v2358_v18  ;;  %7183 = vmatpush3.bf16.msra.mxu1 %v7554_v17  ;;  %4216 = vmatprep.mubr.bf16.mxu1 %v4003_v30  ;;  %v4357_v17 = vld [vmem:[#allocation2 + $0x80] sm:$0xff]  ;;  %v9885_v18 = vrot.slane %v8806_v9, 1 }
 0x223   : > { %v6711_v33 = vpop.f32.mrb[37].mxu0  ;;  %7184 = vmatprep.subr.bf16.mxu1 %v7557_v25  ;;  %v7562_v30 = vld [vmem:[%s8316_s30 + $0x390] sm:$0xff]  }
 0x224   : > { %v6712_v58 = vadd.f32 %v6711_v33, %v6710_v19  ;;  %v6713_v23 = vpop.f32.mrb[38].mxu0  ;;  %7285 = vmatpush3.bf16.msra.mxu0 %v7560_v49  ;;  %v9101_v49 = vadd.f32 %v6709_v14, %v2361_v53  ;;  %v6610_v0 = vpop.f32.mrb[36].mxu1  ;;  %v4362_v19 = vld [vmem:[#allocation2 + $0xa8] sm:$0xff]  ;;  %v4364_v14 = vld [vmem:[#allocation2 + $0xb8] sm:$0xff]  ;;  %v7571_v33 = vld [vmem:[%s8316_s30 + $0x460] sm:$0xff]   ;;  %v4409_v53 = vpack.c.bf16 %v4359_v21, %v4357_v17  ;;  %v4010_v21 = vrot.slane %v8834_v51, 1 }
 0x225   : > { %v6714_v55 = vpop.f32.mrb[39].mxu0  ;;  %7286 = vmatprep.subr.bf16.mxu0 %v7563_v43  ;;  %v6611_v4 = vpop.f32.mrb[37].mxu1 }
 0x226   : > { %v6715_v3 = vadd.f32 %v6714_v55, %v6713_v23  ;;  %v6612_v15 = vadd.f32 %v6611_v4, %v6610_v0  ;;  %v6613_v55 = vpop.f32.mrb[38].mxu1  ;;  %v4001_v23 = vsel %vm2531_vm1, %v3995_v12, %v4000_v8  ;;  %7185 = vmatpush3.bf16.msra.mxu1 %v7558_v59  ;;  %v4412_v0 = vpack.c.bf16 %v4364_v14, %v4362_v19  ;;  %v7572_v4 = vld [vmem:[%s8316_s30 + $0x420] sm:$0xff]   ;;  %v4361_v19 = vld [vmem:[#allocation2 + $0xa0] sm:$0xff] }
 0x227   : > { %4603 = vmatmul.mubr.bf16.gmra.mrb[144].mxu0 %v4407_v27  ;;  %v6614_v25 = vpop.f32.mrb[39].mxu1  ;;  %7186 = vmatprep.subr.bf16.mxu1 %v7561_v1  ;;  %v4363_v14 = vld [vmem:[#allocation2 + $0xb0] sm:$0xff] }
 0x228   : > { %4610 = vmatprep.mubr.bf16.mxu0 %v4410_v29  ;;  %7287 = vmatpush3.bf16.msra.mxu0 %v7564_v37  ;;  %v4007_v37 = vsel %vm2531_vm1, %v9885_v18, %v4006_v2  ;;  %v2366_v27 = vadd.f32 %v6612_v15, %v8965_v40  ;;  %v6615_v12 = vadd.f32 %v6614_v25, %v6613_v55  ;;  %v4004_v40 = vrot.slane %v8830_v48, 1  ;;  %v7566_v15 = vld [vmem:[%s8316_s30 + $0x398] sm:$0xff]   ;;  %v7575_v55 = vld [vmem:[%s8316_s30 + $0x468] sm:$0xff]  }
 0x229   : > { %7288 = vmatprep.subr.bf16.mxu0 %v7567_v5  ;;  %4217 = vmatmul.mubr.bf16.gmra.mrb[144].mxu1 %v4001_v23  ;;  %v7569_v23 = vld [vmem:[%s8316_s30 + $0x3e0] sm:$0xff]  }
 0x22a   : > { %v6716_v43 = vpop.f32.mrb[40].mxu0  ;;  %v9117_v9 = vadd.f32 %v6712_v58, %v2366_v27  ;;  %v2369_v1 = vadd.f32 %v6615_v12, %v8975_v26  ;;  %4224 = vmatprep.mubr.bf16.mxu1 %v4007_v37  ;;  %7187 = vmatpush3.bf16.msra.mxu1 %v7562_v30  ;;  %v7576_v30 = vld [vmem:[%s8316_s30 + $0x428] sm:$0xff]   ;;  %v4005_v37 = vsel %vm2531_vm1, %v4000_v8, %v4004_v40 }
 0x22b   : > { %v6717_v29 = vpop.f32.mrb[41].mxu0  ;;  %7188 = vmatprep.subr.bf16.mxu1 %v7565_v22  ;;  %v4368_v22 = vld [vmem:[#allocation2 + $0xd8] sm:$0xff] }
 0x22c   : > { %v6718_v59 = vadd.f32 %v6717_v29, %v6716_v43  ;;  %v6719_v5 = vpop.f32.mrb[42].mxu0  ;;  %7289 = vmatpush3.bf16.msra.mxu0 %v7568_v50  ;;  %v9125_v50 = vadd.f32 %v6715_v3, %v2369_v1  ;;  %v6616_v58 = vpop.f32.mrb[40].mxu1  ;;  %v4366_v3 = vld [vmem:[#allocation2 + $0xc8] sm:$0xff]  ;;  %v4011_v29 = vsel %vm2531_vm1, %v4006_v2, %v4010_v21 }
 0x22d   : > { %v6720_v18 = vpop.f32.mrb[43].mxu0  ;;  %7290 = vmatprep.subr.bf16.mxu0 %v7571_v33  ;;  %v6617_v26 = vpop.f32.mrb[41].mxu1  ;;  %v7570_v33 = vld [vmem:[%s8316_s30 + $0x3a0] sm:$0xff]  }
 0x22e   : > { %v6721_v17 = vadd.f32 %v6720_v18, %v6719_v5  ;;  %v6618_v25 = vadd.f32 %v6617_v26, %v6616_v58  ;;  %v6619_v43 = vpop.f32.mrb[42].mxu1  ;;  %7189 = vmatpush3.bf16.msra.mxu1 %v7566_v15  ;;  %v7579_v5 = vld [vmem:[%s8316_s30 + $0x470] sm:$0xff]   ;;  %v4414_v15 = vpack.c.bf16 %v4368_v22, %v4366_v3  ;;  %v7574_v58 = vld [vmem:[%s8316_s30 + $0x3a8] sm:$0xff]   ;;  %v7583_v26 = vld [vmem:[%s8316_s30 + $0x478] sm:$0xff]  }
 0x22f   : > { %4611 = vmatmul.mubr.bf16.gmra.mrb[148].mxu0 %v4409_v53  ;;  %v6620_v27 = vpop.f32.mrb[43].mxu1  ;;  %7190 = vmatprep.subr.bf16.mxu1 %v7569_v23  ;;  %v7573_v53 = vld [vmem:[%s8316_s30 + $0x3e8] sm:$0xff]  }
 0x230   : > { %4618 = vmatprep.mubr.bf16.mxu0 %v4412_v0  ;;  %7291 = vmatpush3.bf16.msra.mxu0 %v7572_v4  ;;  %v2374_v57 = vadd.f32 %v6618_v25, %v8985_v32  ;;  %v6621_v8 = vadd.f32 %v6620_v27, %v6619_v43  ;;  %v4411_v4 = vpack.c.bf16 %v4363_v14, %v4361_v19  ;;  %v4008_v32 = vrot.slane %v8849_v60, 1  ;;  %v7577_v25 = vld [vmem:[%s8316_s30 + $0x3f0] sm:$0xff]   ;;  %v4367_v60 = vld [vmem:[#allocation2 + $0xd0] sm:$0xff]  ;;  %v4372_v27 = vld [vmem:[#allocation2 + $0xf8] sm:$0xff] }
 0x231   : > { %7292 = vmatprep.subr.bf16.mxu0 %v7575_v55  ;;  %4225 = vmatmul.mubr.bf16.gmra.mrb[148].mxu1 %v4005_v37  ;;  %v7580_v55 = vld [vmem:[%s8316_s30 + $0x430] sm:$0xff]   ;;  %v4014_v14 = vrot.slane %v8853_v24, 1  ;;  %v7584_v37 = vld [vmem:[%s8316_s30 + $0x438] sm:$0xff]  }
 0x232   : > { %v6722_v12 = vpop.f32.mrb[44].mxu0  ;;  %v9143_v31 = vadd.f32 %v6718_v59, %v2374_v57  ;;  %v2377_v2 = vadd.f32 %v6621_v8, %v8995_v41  ;;  %4232 = vmatprep.mubr.bf16.mxu1 %v4011_v29  ;;  %7191 = vmatpush3.bf16.msra.mxu1 %v7570_v33  ;;  %v4365_v43 = vld [vmem:[#allocation2 + $0xc0] sm:$0xff]  ;;  %v4009_v24 = vsel %vm2531_vm1, %v4004_v40, %v4008_v32  ;;  %v4370_v33 = vld [vmem:[#allocation2 + $0xe8] sm:$0xff] }
 0x233   : > { %v6723_v0 = vpop.f32.mrb[45].mxu0  ;;  %7192 = vmatprep.subr.bf16.mxu1 %v7573_v53  ;;  %v4015_v53 = vsel %vm2531_vm1, %v4010_v21, %v4014_v14  ;;  %v4012_v21 = vrot.slane %v8869_v7, 1  ;;  %v4376_v7 = vld [vmem:[#allocation2 + $0x118] sm:$0xff] }
 0x234   : > { %v6724_v1 = vadd.f32 %v6723_v0, %v6722_v12  ;;  %v6725_v18 = vpop.f32.mrb[46].mxu0  ;;  %7293 = vmatpush3.bf16.msra.mxu0 %v7576_v30  ;;  %v9151_v30 = vadd.f32 %v6721_v17, %v2377_v2  ;;  %v6622_v59 = vpop.f32.mrb[44].mxu1  ;;  %v7578_v17 = vld [vmem:[%s8316_s30 + $0x3b0] sm:$0xff]   ;;  %v4413_v0 = vpack.c.bf16 %v4367_v60, %v4365_v43  ;;  %v7582_v2 = vld [vmem:[%s8316_s30 + $0x3b8] sm:$0xff]  }
 0x235   : > { %v6726_v23 = vpop.f32.mrb[47].mxu0  ;;  %7294 = vmatprep.subr.bf16.mxu0 %v7579_v5  ;;  %v6623_v41 = vpop.f32.mrb[45].mxu1  ;;  %v7581_v5 = vld [vmem:[%s8316_s30 + $0x3f8] sm:$0xff]   ;;  %v4013_v43 = vsel %vm2531_vm1, %v4008_v32, %v4012_v21 }
 0x236   : > { %v6727_v19 = vadd.f32 %v6726_v23, %v6725_v18  ;;  %v6624_v3 = vadd.f32 %v6623_v41, %v6622_v59  ;;  %v6625_v22 = vpop.f32.mrb[46].mxu1  ;;  %7193 = vmatpush3.bf16.msra.mxu1 %v7574_v58  ;;  %v4416_v18 = vpack.c.bf16 %v4372_v27, %v4370_v33  ;;  %v4371_v59 = vld [vmem:[#allocation2 + $0xf0] sm:$0xff]  ;;  %v4374_v60 = vld [vmem:[#allocation2 + $0x108] sm:$0xff] }
 0x237   : > { %4619 = vmatmul.mubr.bf16.gmra.mrb[152].mxu0 %v4411_v4  ;;  %v6626_v12 = vpop.f32.mrb[47].mxu1  ;;  %7194 = vmatprep.subr.bf16.mxu1 %v7577_v25 }
 0x238   : > { %4626 = vmatprep.mubr.bf16.mxu0 %v4414_v15  ;;  %7295 = vmatpush3.bf16.msra.mxu0 %v7580_v55  ;;  %v2382_v57 = vadd.f32 %v6624_v3, %v9008_v28  ;;  %v6627_v8 = vadd.f32 %v6626_v12, %v6625_v22  ;;  %v4018_v28 = vrot.slane %v8872_v47, 1  ;;  %v4418_v12 = vpack.c.bf16 %v4376_v7, %v4374_v60 }
 0x239   : > { %7296 = vmatprep.subr.bf16.mxu0 %v7583_v26  ;;  %4233 = vmatmul.mubr.bf16.gmra.mrb[152].mxu1 %v4009_v24  ;;  %v4020_v7 = vrot.slane %v8907_v34, 1 }
 0x23a   : > { %v6728_v29 = vpop.f32.mrb[48].mxu0  ;;  %v9163_v15 = vadd.f32 %v6724_v1, %v2382_v57  ;;  %v2385_v55 = vadd.f32 %v6627_v8, %v9017_v45  ;;  %4240 = vmatprep.mubr.bf16.mxu1 %v4015_v53  ;;  %7195 = vmatpush3.bf16.msra.mxu1 %v7578_v17  ;;  %v4369_v1 = vld [vmem:[#allocation2 + $0xe0] sm:$0xff]  ;;  %v4019_v47 = vsel %vm2531_vm1, %v4014_v14, %v4018_v28  ;;  %v4022_v14 = vrot.slane %v8892_v52, 1 }
 0x23b   : > { %v6729_v48 = vpop.f32.mrb[49].mxu0  ;;  %7196 = vmatprep.subr.bf16.mxu1 %v7581_v5  ;;  %v4415_v33 = vpack.c.bf16 %v4371_v59, %v4369_v1  ;;  %v4016_v5 = vrot.slane %v8889_v13, 1 }
 0x23c   : > { %v6730_v40 = vadd.f32 %v6729_v48, %v6728_v29  ;;  %v6731_v4 = vpop.f32.mrb[50].mxu0  ;;  %7297 = vmatpush3.bf16.msra.mxu0 %v7584_v37  ;;  %v9169_v58 = vadd.f32 %v6727_v19, %v2385_v55  ;;  %v6628_v26 = vpop.f32.mrb[48].mxu1  ;;  %v4023_v13 = vsel %vm2531_vm1, %v4018_v28, %v4022_v14  ;;  %v4026_v28 = vrot.slane %v8909_v39, 1 }
 0x23d   : > { %v6732_v51 = vpop.f32.mrb[51].mxu0  ;;  %v6629_v25 = vpop.f32.mrb[49].mxu1  ;;  %v4017_v55 = vsel %vm2531_vm1, %v4012_v21, %v4016_v5 }
 0x23e   : > { %v6733_v23 = vadd.f32 %v6732_v51, %v6731_v4  ;;  %v6630_v41 = vadd.f32 %v6629_v25, %v6628_v26  ;;  %v6631_v45 = vpop.f32.mrb[50].mxu1  ;;  %7197 = vmatpush3.bf16.msra.mxu1 %v7582_v2  ;;  %v4375_v4 = vld [vmem:[#allocation2 + $0x110] sm:$0xff]  ;;  %v4380_v51 = vld [vmem:[#allocation2 + $0x138] sm:$0xff]  ;;  %v4027_v34 = vsel %vm2531_vm1, %v4022_v14, %v4026_v28  ;;  %v4030_v14 = vrot.slane %v8921_v61, 1 }
 0x23f   : > { %4627 = vmatmul.mubr.bf16.gmra.mrb[156].mxu0 %v4413_v0  ;;  %v6632_v37 = vpop.f32.mrb[51].mxu1  ;;  %v4373_v0 = vld [vmem:[#allocation2 + $0x100] sm:$0xff] }
 0x240   : > { %4634 = vmatprep.mubr.bf16.mxu0 %v4416_v18  ;;  %v2390_v19 = vadd.f32 %v6630_v41, %v9027_v20  ;;  %v6633_v22 = vadd.f32 %v6632_v37, %v6631_v45  ;;  %v4417_v1 = vpack.c.bf16 %v4375_v4, %v4373_v0 }
 0x241   : > { %4241 = vmatmul.mubr.bf16.gmra.mrb[156].mxu1 %v4013_v43 }
 0x242   : > { %v6734_v3 = vpop.f32.mrb[52].mxu0  ;;  %v9174_v29 = vadd.f32 %v6730_v40, %v2390_v19  ;;  %v2393_v32 = vadd.f32 %v6633_v22, %v9036_v38  ;;  %4248 = vmatprep.mubr.bf16.mxu1 %v4019_v47  ;;  %v4378_v38 = vld [vmem:[#allocation2 + $0x128] sm:$0xff]  ;;  %v4377_v19 = vld [vmem:[#allocation2 + $0x120] sm:$0xff]  ;;  %v4379_v22 = vld [vmem:[#allocation2 + $0x130] sm:$0xff] }
 0x243   : > { %v6735_v24 = vpop.f32.mrb[53].mxu0  ;;  %v4420_v45 = vpack.c.bf16 %v4380_v51, %v4378_v38 }
 0x244   : > { %v6736_v27 = vadd.f32 %v6735_v24, %v6734_v3  ;;  %v6737_v17 = vpop.f32.mrb[54].mxu0  ;;  %v9179_v8 = vadd.f32 %v6733_v23, %v2393_v32  ;;  %v6634_v20 = vpop.f32.mrb[52].mxu1 }
 0x245   : > { %v6738_v53 = vpop.f32.mrb[55].mxu0  ;;  %v6635_v48 = vpop.f32.mrb[53].mxu1 }
 0x246   : > { %v6739_v57 = vadd.f32 %v6738_v53, %v6737_v17  ;;  %v6636_v18 = vadd.f32 %v6635_v48, %v6634_v20  ;;  %v6637_v40 = vpop.f32.mrb[54].mxu1  ;;  %v4384_v17 = vld [vmem:[#allocation2 + $0x158] sm:$0xff]  ;;  %v4419_v20 = vpack.c.bf16 %v4379_v22, %v4377_v19 }
 0x247   : > { %4635 = vmatmul.mubr.bf16.gmra.mrb[160].mxu0 %v4415_v33  ;;  %v6638_v2 = vpop.f32.mrb[55].mxu1 }
 0x248   : > { %4642 = vmatprep.mubr.bf16.mxu0 %v4418_v12  ;;  %v2398_v52 = vadd.f32 %v6636_v18, %v9052_v10  ;;  %v6639_v23 = vadd.f32 %v6638_v2, %v6637_v40 }
 0x249   : > { %4249 = vmatmul.mubr.bf16.gmra.mrb[160].mxu1 %v4017_v55  ;;  %v4024_v55 = vrot.slane %v8919_v36, 1  ;;  %v4031_v36 = vsel %vm2531_vm1, %v4026_v28, %v4030_v14 }
 0x24a   : > { %v6740_v26 = vpop.f32.mrb[56].mxu0  ;;  %v9184_v43 = vadd.f32 %v6736_v27, %v2398_v52  ;;  %v2401_v60 = vadd.f32 %v6639_v23, %v9058_v62  ;;  %4256 = vmatprep.mubr.bf16.mxu1 %v4023_v13  ;;  %v4021_v27 = vsel %vm2531_vm1, %v4016_v5, %v4020_v7  ;;  %v4382_v62 = vld [vmem:[#allocation2 + $0x148] sm:$0xff]  ;;  %v4383_v13 = vld [vmem:[#allocation2 + $0x150] sm:$0xff] }
 0x24b   : > { %v6741_v25 = vpop.f32.mrb[57].mxu0  ;;  %v4422_v4 = vpack.c.bf16 %v4384_v17, %v4382_v62  ;;  %v9887_v62 = vld [vmem:[#allocation6_spill] sm:$0xff] }
 0x24c   : > { %v6742_v59 = vadd.f32 %v6741_v25, %v6740_v26  ;;  %v6743_v41 = vpop.f32.mrb[58].mxu0  ;;  %v9189_v3 = vadd.f32 %v6739_v57, %v2401_v60  ;;  %v6640_v10 = vpop.f32.mrb[56].mxu1  ;;  %v4381_v26 = vld [vmem:[#allocation2 + $0x140] sm:$0xff]  ;;  %v4025_v25 = vsel %vm2531_vm1, %v4020_v7, %v4024_v55  ;;  %v4034_v28 = vrot.slane %v9887_v62, 1 }
 0x24d   : > { %v6744_v21 = vpop.f32.mrb[59].mxu0  ;;  %v6641_v47 = vpop.f32.mrb[57].mxu1  ;;  %v1426_v62 = vld [vmem:[%s9846_s0 + $0x200] sm:$0xff] }
 0x24e   : > { %v6745_v37 = vadd.f32 %v6744_v21, %v6743_v41  ;;  %v6642_v24 = vadd.f32 %v6641_v47, %v6640_v10  ;;  %v6643_v33 = vpop.f32.mrb[58].mxu1  ;;  %v4421_v21 = vpack.c.bf16 %v4383_v13, %v4381_v26 }
 0x24f   : > { %4643 = vmatmul.mubr.bf16.gmra.mrb[164].mxu0 %v4417_v1  ;;  %v6644_v12 = vpop.f32.mrb[59].mxu1  ;;  %v4388_v1 = vld [vmem:[#allocation2 + $0x178] sm:$0xff] }
 0x250   : > { %4650 = vmatprep.mubr.bf16.mxu0 %v4420_v45  ;;  %v2406_v39 = vadd.f32 %v6642_v24, %v8927_v46  ;;  %v6645_v53 = vadd.f32 %v6644_v12, %v6643_v33  ;;  %v9886_v24 = vld [vmem:[#allocation5_spill] sm:$0xff] }
 0x251   : > { %4257 = vmatmul.mubr.bf16.gmra.mrb[164].mxu1 %v4021_v27  ;;  %v4028_v33 = vrot.slane %v9886_v24, 1 }
 0x252   : > { %v6746_v32 = vpop.f32.mrb[60].mxu0  ;;  %v9194_v18 = vadd.f32 %v6742_v59, %v2406_v39  ;;  %v2409_v40 = vadd.f32 %v6645_v53, %v8937_v35  ;;  %4264 = vmatprep.mubr.bf16.mxu1 %v4027_v34  ;;  %v4386_v35 = vld [vmem:[#allocation2 + $0x168] sm:$0xff]  ;;  %v4387_v34 = vld [vmem:[#allocation2 + $0x170] sm:$0xff] }
 0x253   : > { %v6747_v57 = vpop.f32.mrb[61].mxu0  ;;  %v4424_v47 = vpack.c.bf16 %v4388_v1, %v4386_v35  ;;  %v4032_v1 = vrot.slane %v8959_v16, 1  ;;  %v1427_v16 = vld [vmem:[%s9846_s0 + $0x208] sm:$0xff] }
 0x254   : > { %v6748_v48 = vadd.f32 %v6747_v57, %v6746_v32  ;;  %v6749_v0 = vpop.f32.mrb[62].mxu0  ;;  %v9199_v51 = vadd.f32 %v6745_v37, %v2409_v40  ;;  %v6646_v46 = vpop.f32.mrb[60].mxu1  ;;  %v4385_v32 = vld [vmem:[#allocation2 + $0x160] sm:$0xff]  ;;  %v4029_v57 = vsel %vm2531_vm1, %v4024_v55, %v4028_v33 }
 0x255   : > { %v6750_v5 = vpop.f32.mrb[63].mxu0  ;;  %v6647_v2 = vpop.f32.mrb[61].mxu1  ;;  %v9888_v40 = vld [vmem:[#allocation7_spill] sm:$0xff] }
 0x256   : > { %v6751_v38 = vadd.f32 %v6750_v5, %v6749_v0  ;;  %v6648_v52 = vadd.f32 %v6647_v2, %v6646_v46  ;;  %v6649_v23 = vpop.f32.mrb[62].mxu1  ;;  %v4423_v2 = vpack.c.bf16 %v4387_v34, %v4385_v32 }
 0x257   : > { %4651 = vmatmul.mubr.bf16.gmra.mrb[168].mxu0 %v4419_v20  ;;  %v6650_v59 = vpop.f32.mrb[63].mxu1  ;;  %v4392_v20 = vld [vmem:[#allocation2 + $0x198] sm:$0xff] }
 0x258   : > { %4658 = vmatprep.mubr.bf16.mxu0 %v4422_v4  ;;  %v2414_v61 = vadd.f32 %v6648_v52, %v8947_v44  ;;  %v6651_v45 = vadd.f32 %v6650_v59, %v6649_v23  ;;  %v4035_v4 = vsel %vm2531_vm1, %v4030_v14, %v4034_v28  ;;  %v4038_v14 = vrot.slane %v8961_v11, 1 }
 0x259   : > { %4265 = vmatmul.mubr.bf16.gmra.mrb[168].mxu1 %v4025_v25  ;;  %v9889_v25 = vld [vmem:[#allocation8_spill] sm:$0xff] }
 0x25a   : > { %v6752_v41 = vpop.f32.mrb[64].mxu0  ;;  %v9204_v19 = vadd.f32 %v6748_v48, %v2414_v61  ;;  %v2417_v22 = vadd.f32 %v6651_v45, %v8957_v6  ;;  %4272 = vmatprep.mubr.bf16.mxu1 %v4031_v36  ;;  %v4390_v6 = vld [vmem:[#allocation2 + $0x188] sm:$0xff]  ;;  %v4389_v45 = vld [vmem:[#allocation2 + $0x180] sm:$0xff]  ;;  %v4039_v24 = vsel %vm2531_vm1, %v4034_v28, %v4038_v14 }
 0x25b   : > { %v6753_v60 = vpop.f32.mrb[65].mxu0  ;;  %v4426_v52 = vpack.c.bf16 %v4392_v20, %v4390_v6  ;;  %v1492_v6 = vmax.f32 %v1426_v62, 0.0  ;;  %v4040_v62 = vrot.slane %v8999_v63, 1 }
 0x25c   : > { %v6754_v37 = vadd.f32 %v6753_v60, %v6752_v41  ;;  %v6755_v10 = vpop.f32.mrb[66].mxu0  ;;  %v9209_v17 = vadd.f32 %v6751_v38, %v2417_v22  ;;  %v6652_v44 = vpop.f32.mrb[64].mxu1  ;;  %v4391_v60 = vld [vmem:[#allocation2 + $0x190] sm:$0xff]  ;;  %v4396_v22 = vld [vmem:[#allocation2 + $0x1b8] sm:$0xff] }
 0x25d   : > { %v6756_v7 = vpop.f32.mrb[67].mxu0  ;;  %v6653_v12 = vpop.f32.mrb[65].mxu1  ;;  %1558 = vst [vmem:[#allocation2 + $0x200] sm:$0xff] %v1492_v6 }
 0x25e   : > { %v6757_v27 = vadd.f32 %v6756_v7, %v6755_v10  ;;  %v6654_v39 = vadd.f32 %v6653_v12, %v6652_v44  ;;  %v6655_v53 = vpop.f32.mrb[66].mxu1  ;;  %v4033_v10 = vsel %vm2531_vm1, %v4028_v33, %v4032_v1  ;;  %v9890_v44 = vld [vmem:[#allocation10_spill] sm:$0xff]  ;;  %v4425_v33 = vpack.c.bf16 %v4391_v60, %v4389_v45 }
 0x25f   : > { %4659 = vmatmul.mubr.bf16.gmra.mrb[172].mxu0 %v4421_v21  ;;  %v6656_v48 = vpop.f32.mrb[67].mxu1 }
 0x260   : > { %4666 = vmatprep.mubr.bf16.mxu0 %v4424_v47  ;;  %v2422_v5 = vadd.f32 %v6654_v39, %v9888_v40  ;;  %v6657_v38 = vadd.f32 %v6656_v48, %v6655_v53  ;;  %v4394_v47 = vld [vmem:[#allocation2 + $0x1a8] sm:$0xff]  ;;  %v9891_v48 = vld [vmem:[#allocation11_spill] sm:$0xff] }
 0x261   : > { %4273 = vmatmul.mubr.bf16.gmra.mrb[172].mxu1 %v4029_v57  ;;  %v4428_v57 = vpack.c.bf16 %v4396_v22, %v4394_v47 }
 0x262   : > { %v6758_v0 = vpop.f32.mrb[68].mxu0  ;;  %v9214_v23 = vadd.f32 %v6754_v37, %v2422_v5  ;;  %v2425_v35 = vadd.f32 %v6657_v38, %v9889_v25  ;;  %4280 = vmatprep.mubr.bf16.mxu1 %v4035_v4  ;;  %v4036_v4 = vrot.slane %v8979_v54, 1  ;;  %v9892_v5 = vld [vmem:[#allocation9_spill] sm:$0xff] }
 0x263   : > { %v6759_v46 = vpop.f32.mrb[69].mxu0  ;;  %v4042_v38 = vrot.slane %v9892_v5, 1  ;;  %v4395_v25 = vld [vmem:[#allocation2 + $0x1b0] sm:$0xff] }
 0x264   : > { %v6760_v26 = vadd.f32 %v6759_v46, %v6758_v0  ;;  %v6761_v13 = vpop.f32.mrb[70].mxu0  ;;  %v9219_v41 = vadd.f32 %v6757_v27, %v2425_v35  ;;  %v6658_v36 = vpop.f32.mrb[68].mxu1  ;;  %v1493_v27 = vmax.f32 %v1427_v16, 0.0  ;;  %v4041_v5 = vsel %vm2531_vm1, %v4036_v4, %v4040_v62 }
 0x265   : > { %v6762_v55 = vpop.f32.mrb[71].mxu0  ;;  %v6659_v61 = vpop.f32.mrb[69].mxu1  ;;  %v4043_v60 = vsel %vm2531_vm1, %v4038_v14, %v4042_v38 }
 0x266   : > { %v6763_v59 = vadd.f32 %v6762_v55, %v6761_v13  ;;  %v6660_v21 = vadd.f32 %v6659_v61, %v6658_v36  ;;  %v6661_v37 = vpop.f32.mrb[70].mxu1  ;;  %1559 = vst [vmem:[#allocation2 + $0x208] sm:$0xff] %v1493_v27  ;;  %v4037_v55 = vsel %vm2531_vm1, %v4032_v1, %v4036_v4  ;;  %v4398_v36 = vld [vmem:[#allocation2 + $0x1c8] sm:$0xff]  ;;  %v4400_v61 = vld [vmem:[#allocation2 + $0x1d8] sm:$0xff]  ;;  %v9897_v4 = vld [vmem:[#allocation17_spill] sm:$0xff] }
 0x267   : > { %4667 = vmatmul.mubr.bf16.gmra.mrb[176].mxu0 %v4423_v2  ;;  %v6662_v7 = vpop.f32.mrb[71].mxu1 }
 0x268   : > { %4674 = vmatprep.mubr.bf16.mxu0 %v4426_v52  ;;  %v2430_v12 = vadd.f32 %v6660_v21, %v9890_v44  ;;  %v6663_v32 = vadd.f32 %v6662_v7, %v6661_v37  ;;  %v4393_v52 = vld [vmem:[#allocation2 + $0x1a0] sm:$0xff]  ;;  %v9893_v21 = vld [vmem:[#allocation13_spill] sm:$0xff]  ;;  %v4430_v7 = vpack.c.bf16 %v4400_v61, %v4398_v36 }
 0x269   : > { %4281 = vmatmul.mubr.bf16.gmra.mrb[176].mxu1 %v4033_v10  ;;  %v4427_v47 = vpack.c.bf16 %v4395_v25, %v4393_v52 }
 0x26a   : > { %v6764_v11 = vpop.f32.mrb[72].mxu0  ;;  %v9230_v20 = vadd.f32 %v6760_v26, %v2430_v12  ;;  %v2433_v28 = vadd.f32 %v6663_v32, %v9891_v48  ;;  %4288 = vmatprep.mubr.bf16.mxu1 %v4039_v24  ;;  %v9894_v24 = vld [vmem:[#allocation14_spill] sm:$0xff]  ;;  %v9895_v12 = vld [vmem:[#allocation12_spill] sm:$0xff]  ;;  %v4399_v48 = vld [vmem:[#allocation2 + $0x1d0] sm:$0xff] }
 0x26b   : > { %v6765_v34 = vpop.f32.mrb[73].mxu0  ;;  %v4046_v14 = vrot.slane %v9895_v12, 1 }
 0x26c   : > { %v6766_v39 = vadd.f32 %v6765_v34, %v6764_v11  ;;  %v6767_v53 = vpop.f32.mrb[74].mxu0  ;;  %v9235_v46 = vadd.f32 %v6763_v59, %v2433_v28  ;;  %v6664_v2 = vpop.f32.mrb[72].mxu1 }
 0x26d   : > { %v6768_v0 = vpop.f32.mrb[75].mxu0  ;;  %v6665_v13 = vpop.f32.mrb[73].mxu1  ;;  %v4047_v52 = vsel %vm2531_vm1, %v4042_v38, %v4046_v14  ;;  %v9899_v38 = vld [vmem:[#allocation16_spill] sm:$0xff] }
 0x26e   : > { %v6769_v40 = vadd.f32 %v6768_v0, %v6767_v53  ;;  %v6666_v26 = vadd.f32 %v6665_v13, %v6664_v2  ;;  %v6667_v35 = vpop.f32.mrb[74].mxu1  ;;  %v4736_v53 = vld [vmem:[#allocation2 + $0x48] sm:$0xfe] }
 0x26f   : > { %4675 = vmatmul.mubr.bf16.gmra.mrb[180].mxu0 %v4425_v33  ;;  %v6668_v45 = vpop.f32.mrb[75].mxu1  ;;  %v3926_v33 = vld [vmem:[#allocation2 + $0x1e8] sm:$0x3] }
 0x270   : > { %4682 = vmatprep.mubr.bf16.mxu0 %v4428_v57  ;;  %v2438_v37 = vadd.f32 %v6666_v26, %v9893_v21  ;;  %v6669_v59 = vadd.f32 %v6668_v45, %v6667_v35  ;;  %v4738_v57 = vld [vmem:[#allocation2 + $0x58] sm:$0xff]  ;;  %v4402_v2 = vld [vmem:[#allocation2 + $0x1e8] sm:$0xff]  ;;  %v9896_v35 = vld [vmem:[#allocation15_spill] sm:$0xff]  ;;  %v4044_v21 = vrot.slane %v9023_v56, 1 }
 0x271   : > { %4289 = vmatmul.mubr.bf16.gmra.mrb[180].mxu1 %v4037_v55  ;;  %v9249_v25 = vpack.c.bf16 %v4738_v57, %v4736_v53  ;;  %v5386_v26 = vld [vmem:[#allocation2 + $0x48] sm:$0xfc] }
 0x272   : > { %v6770_v54 = vpop.f32.mrb[76].mxu0  ;;  %v9240_v11 = vadd.f32 %v6766_v39, %v2438_v37  ;;  %v2441_v27 = vadd.f32 %v6669_v59, %v9894_v24  ;;  %4296 = vmatprep.mubr.bf16.mxu1 %v4043_v60  ;;  %v4397_v39 = vld [vmem:[#allocation2 + $0x1c0] sm:$0xff]  ;;  %v9898_v37 = vmax.f32 %v9897_v4, 0.0  ;;  %v5390_v24 = vpack.c.bf16 %v4738_v57, %v5386_v26 }
 0x273   : > { %v6771_v10 = vpop.f32.mrb[77].mxu0  ;;  %v4429_v45 = vpack.c.bf16 %v4399_v48, %v4397_v39  ;;  %v4401_v48 = vld [vmem:[#allocation2 + $0x1e0] sm:$0xff]  ;;  %v4045_v57 = vsel %vm2531_vm1, %v4040_v62, %v4044_v21  ;;  %v7590_v62 = vld [vmem:[#allocation2 + $0x1f0] sm:$0xff] }
 0x274   : > { %v6772_v22 = vadd.f32 %v6771_v10, %v6770_v54  ;;  %v6773_v16 = vpop.f32.mrb[78].mxu0  ;;  %v9245_v32 = vadd.f32 %v6769_v40, %v2441_v27  ;;  %v6670_v34 = vpop.f32.mrb[76].mxu1  ;;  %v3930_v40 = vpack.c.bf16 %v3926_v33, %v3926_v33  ;;  %v4432_v59 = vpack.c.bf16 %v9898_v37, %v4402_v2  ;;  %v4735_v27 = vld [vmem:[#allocation2 + $0x40] sm:$0xfe] }
 0x275   : > { %v6774_v1 = vpop.f32.mrb[79].mxu0  ;;  %v6671_v6 = vpop.f32.mrb[77].mxu1  ;;  %v4871_v33 = vshll.u32 %v9249_v25, 16  ;;  %v5459_v2 = vrot.slane %v5390_v24, 1 }
 0x276   : > { %v6775_v44 = vadd.f32 %v6774_v1, %v6773_v16  ;;  %v6672_v28 = vadd.f32 %v6671_v6, %v6670_v34  ;;  %v6673_v0 = vpop.f32.mrb[78].mxu1  ;;  %v4737_v1 = vld [vmem:[#allocation2 + $0x50] sm:$0xff]  ;;  %v4050_v34 = vrot.slane %v3930_v40, 1 }
 0x277   : > { %4683 = vmatmul.mubr.bf16.gmra.mrb[184].mxu0 %v4427_v47  ;;  %v6674_v63 = vpop.f32.mrb[79].mxu1 }
 0x278   : > { %4690 = vmatprep.mubr.bf16.mxu0 %v4430_v7  ;;  %v2446_v55 = vadd.f32 %v6672_v28, %v9896_v35  ;;  %v6675_v36 = vadd.f32 %v6674_v63, %v6673_v0  ;;  %v3925_v7 = vld [vmem:[#allocation2 + $0x1e0] sm:$0x3]  ;;  %v9261_v28 = vpack.c.bf16 %v4737_v1, %v4735_v27  ;;  %v9900_v63 = vld [vmem:[#allocation20_spill] sm:$0xff]  ;;  %v4051_v35 = vsel %vm2531_vm1, %v4046_v14, %v4050_v34 }
 0x279   : > { %4297 = vmatmul.mubr.bf16.gmra.mrb[184].mxu1 %v4041_v5 }
 0x27a   : > { %v6776_v13 = vpop.f32.mrb[80].mxu0  ;;  %v9255_v10 = vadd.f32 %v6772_v22, %v2446_v55  ;;  %v2449_v47 = vadd.f32 %v6675_v36, %v9899_v38  ;;  %4304 = vmatprep.mubr.bf16.mxu1 %v4047_v52  ;;  %v3929_v22 = vpack.c.bf16 %v3925_v7, %v3925_v7  ;;  %v4739_v52 = vld [vmem:[#allocation2 + $0x60] sm:$0xff]  ;;  %v4869_v55 = vshrl.u32 %v9249_v25, 16 }
 0x27b   : > { %v6777_v61 = vpop.f32.mrb[81].mxu0  ;;  %v4873_v36 = vrot.slane %v4871_v33, 1  ;;  %v4431_v38 = vpack.c.bf16 %v7590_v62, %v4401_v48  ;;  %v4859_v14 = vshll.u32 %v9261_v28, 16  ;;  %v9902_v33 = vld [vmem:[#allocation19_spill] sm:$0xff]  ;;  %v4888_v62 = vshrl.u32 %v9900_v63, 16 }
 0x27c   : > { %v6778_v54 = vadd.f32 %v6777_v61, %v6776_v13  ;;  %v6779_v60 = vpop.f32.mrb[82].mxu0  ;;  %v9259_v53 = vadd.f32 %v6775_v44, %v2449_v47  ;;  %v6676_v6 = vpop.f32.mrb[80].mxu1  ;;  %v5460_v13 = vrot.slane %v9900_v63, 1  ;;  %v5385_v44 = vld [vmem:[#allocation2 + $0x40] sm:$0xfc]  ;;  %v4876_v61 = vshll.u32 %v9900_v63, 16 }
 0x27d   : > { %v6780_v16 = vpop.f32.mrb[83].mxu0  ;;  %v6677_v39 = vpop.f32.mrb[81].mxu1  ;;  %v4744_v47 = vld [vmem:[#allocation2 + $0x88] sm:$0xff]  ;;  %v4048_v27 = vrot.slane %v3929_v22, 1  ;;  %v5389_v34 = vpack.c.bf16 %v4737_v1, %v5385_v44  ;;  %v4857_v44 = vshrl.u32 %v9261_v28, 16 }
 0x27e   : > { %v6781_v12 = vadd.f32 %v6780_v16, %v6779_v60  ;;  %v6678_v0 = vadd.f32 %v6677_v39, %v6676_v6  ;;  %v6679_v5 = vpop.f32.mrb[82].mxu1  ;;  %v9901_v60 = vld [vmem:[#allocation18_spill] sm:$0xff] }
 0x27f   : > { %4691 = vmatmul.mubr.bf16.gmra.mrb[188].mxu0 %v4429_v45  ;;  %v6680_v40 = vpop.f32.mrb[83].mxu1  ;;  %v4741_v45 = vld [vmem:[#allocation2 + $0x70] sm:$0xff]  ;;  %v4746_v16 = vld [vmem:[#allocation2 + $0x98] sm:$0xff] }
 0x280   : > { %4698 = vmatprep.mubr.bf16.mxu0 %v4432_v59  ;;  %v2454_v4 = vadd.f32 %v6678_v0, %v9901_v60  ;;  %v6681_v37 = vadd.f32 %v6680_v40, %v6679_v5  ;;  %v5461_v0 = vsel %vm2531_vm1, %v5459_v2, %v5460_v13  ;;  %v9278_v48 = vpack.c.bf16 %v4741_v45, %v4739_v52  ;;  %v4745_v45 = vld [vmem:[#allocation2 + $0x90] sm:$0xff] }
 0x281   : > { %4305 = vmatmul.mubr.bf16.gmra.mrb[188].mxu1 %v4045_v57  ;;  %v4874_v57 = vor.u32 %v4873_v36, %v4869_v55  ;;  %v4878_v40 = vrot.slane %v4876_v61, 1  ;;  %v5456_v60 = vrot.slane %v5389_v34, 1  ;;  %v4049_v55 = vsel %vm2531_vm1, %v4044_v21, %v4048_v27  ;;  %v4743_v61 = vld [vmem:[#allocation2 + $0x80] sm:$0xff]  ;;  %v4750_v21 = vld [vmem:[#allocation2 + $0xb8] sm:$0xff] }
 0x282   : > { %v6898_v26 = vpop.f32.mrb[84].mxu0  ;;  %v9272_v25 = vadd.f32 %v6778_v54, %v2454_v4  ;;  %v2457_v6 = vadd.f32 %v6681_v37, %v9902_v33  ;;  %4312 = vmatprep.mubr.bf16.mxu1 %v4051_v35  ;;  %v4861_v35 = vrot.slane %v4859_v14, 1  ;;  %v5457_v4 = vrot.slane %v9278_v48, 1  ;;  %v4748_v14 = vld [vmem:[#allocation2 + $0xa8] sm:$0xff] }
 0x283   : > { %v6899_v59 = vpop.f32.mrb[85].mxu0  ;;  %v4864_v36 = vshll.u32 %v9278_v48, 16  ;;  %v4879_v28 = vsel %vm1717_vm0, %v4874_v57, %v4878_v40  ;;  %v9904_v57 = vld [vmem:[#allocation22_spill] sm:$0xff] }
 0x284   : > { %v6900_v7 = vadd.f32 %v6899_v59, %v6898_v26  ;;  %v6901_v24 = vpop.f32.mrb[86].mxu0  ;;  %v9280_v26 = vpack.c.bf16 %v4746_v16, %v4744_v47  ;;  %v9282_v22 = vadd.f32 %v6781_v12, %v2457_v6  ;;  %v6798_v1 = vpop.f32.mrb[84].mxu1  ;;  %v9903_v47 = vld [vmem:[#allocation21_spill] sm:$0xff]  ;;  %v4862_v33 = vor.u32 %v4861_v35, %v4857_v44 }
 0x285   : > { %v6902_v39 = vpop.f32.mrb[87].mxu0  ;;  %v6799_v54 = vpop.f32.mrb[85].mxu1  ;;  %v5458_v6 = vsel %vm2531_vm1, %v5456_v60, %v5457_v4  ;;  %v4890_v35 = vor.u32 %v4888_v62, %v4878_v40 }
 0x286   : > { %v6903_v5 = vadd.f32 %v6902_v39, %v6901_v24  ;;  %v6800_v2 = vadd.f32 %v6799_v54, %v6798_v1  ;;  %v6801_v52 = vpop.f32.mrb[86].mxu1  ;;  %v9859_v12 = vrot.slane %v9280_v26, 1  ;;  %v9298_v39 = vpack.c.bf16 %v4745_v45, %v4743_v61 }
 0x287   : > { %4699 = vmatmul.mubr.bf16.gmra.mrb[192].mxu0 %v4431_v38  ;;  %v6802_v37 = vpop.f32.mrb[87].mxu1  ;;  %v4892_v38 = vshll.u32 %v9280_v26, 16  ;;  %v4880_v45 = vshrl.u32 %v9278_v48, 16 }
 0x288   : > { %5670 = vmatprep.mubr.bf16.mxu0 %v5461_v0  ;;  %v3245_v16 = vadd.f32 %v6800_v2, %v9903_v47  ;;  %v6803_v24 = vadd.f32 %v6802_v37, %v6801_v52  ;;  %v4866_v2 = vrot.slane %v4864_v36, 1  ;;  %v5465_v52 = vsel %vm2531_vm1, %v5460_v13, %v9859_v12 }
 0x289   : > { %4313 = vmatmul.mubr.bf16.gmra.mrb[192].mxu1 %v4049_v55  ;;  %v4894_v55 = vrot.slane %v4892_v38, 1  ;;  %v9308_v37 = vpack.c.bf16 %v4750_v21, %v4748_v14  ;;  %v4884_v36 = vshll.u32 %v9298_v39, 16  ;;  %v4904_v47 = vshrl.u32 %v9280_v26, 16 }
 0x28a   : > { %v6904_v59 = vpop.f32.mrb[88].mxu0  ;;  %v9300_v0 = vadd.f32 %v6900_v7, %v3245_v16  ;;  %v3246_v1 = vadd.f32 %v6803_v24, %v9904_v57  ;;  %5244 = vmatprep.mubr.bf16.mxu1 %v4879_v28  ;;  %v4867_v13 = vsel %vm1717_vm0, %v4862_v33, %v4866_v2  ;;  %v4747_v24 = vld [vmem:[#allocation2 + $0xa0] sm:$0xff]  ;;  %v4754_v57 = vld [vmem:[#allocation2 + $0xd8] sm:$0xff] }
 0x28b   : > { %v6905_v56 = vpop.f32.mrb[89].mxu0  ;;  %v5468_v40 = vrot.slane %v9308_v37, 1  ;;  %v4908_v16 = vshll.u32 %v9308_v37, 16 }
 0x28c   : > { %v6906_v27 = vadd.f32 %v6905_v56, %v6904_v59  ;;  %v6907_v34 = vpop.f32.mrb[90].mxu0  ;;  %v9310_v60 = vadd.f32 %v6903_v5, %v3246_v1  ;;  %v6804_v7 = vpop.f32.mrb[88].mxu1  ;;  %v5462_v59 = vrot.slane %v9298_v39, 1  ;;  %v4895_v5 = vsel %vm1717_vm0, %v4890_v35, %v4894_v55  ;;  %v4749_v56 = vld [vmem:[#allocation2 + $0xb0] sm:$0xff] }
 0x28d   : > { %v6908_v54 = vpop.f32.mrb[91].mxu0  ;;  %v6805_v61 = vpop.f32.mrb[89].mxu1 }
 0x28e   : > { %v6909_v44 = vadd.f32 %v6908_v54, %v6907_v34  ;;  %v6806_v63 = vadd.f32 %v6805_v61, %v6804_v7  ;;  %v6807_v28 = vpop.f32.mrb[90].mxu1  ;;  %v4882_v54 = vor.u32 %v4880_v45, %v4866_v2  ;;  %v5463_v35 = vsel %vm2531_vm1, %v5457_v4, %v5462_v59 }
 0x28f   : > { %5671 = vmatmul.mubr.bf16.vlgmr.msra.gmra.mrb[196].mxu0 %v5458_v6  ;;  %v6808_v62 = vpop.f32.mrb[91].mxu1  ;;  %v4752_v6 = vld [vmem:[#allocation2 + $0xc8] sm:$0xff]  ;;  %v4906_v45 = vor.u32 %v4904_v47, %v4894_v55  ;;  %v4751_v47 = vld [vmem:[#allocation2 + $0xc0] sm:$0xff] }
 0x290   : > { %5678 = vmatprep.mubr.bf16.mxu0 %v5465_v52  ;;  %v3247_v14 = vadd.f32 %v6806_v63, %v9093_v42  ;;  %v6809_v21 = vadd.f32 %v6808_v62, %v6807_v28  ;;  %v4886_v52 = vrot.slane %v4884_v36, 1  ;;  %v9905_v42 = vrot.slane %v9280_v26, 1 }
 0x291   : > { %5245 = vmatmul.mubr.bf16.vlgmr.msra.gmra.mrb[196].mxu1 %v4867_v13  ;;  %v9332_v28 = vpack.c.bf16 %v4749_v56, %v4747_v24  ;;  %v4910_v36 = vrot.slane %v4908_v16, 1  ;;  %v9334_v48 = vpack.c.bf16 %v4754_v57, %v4752_v6  ;;  %v4896_v13 = vshrl.u32 %v9298_v39, 16  ;;  %v4753_v16 = vld [vmem:[#allocation2 + $0xd0] sm:$0xff]  ;;  %v4756_v57 = vld [vmem:[#allocation2 + $0xe8] sm:$0xff] }
 0x292   : > { %v6910_v38 = vpop.f32.mrb[92].mxu0  ;;  %v9324_v7 = vadd.f32 %v6906_v27, %v3247_v14  ;;  %v3248_v61 = vadd.f32 %v6809_v21, %v9101_v49  ;;  %5252 = vmatprep.mubr.bf16.mxu1 %v4895_v5  ;;  %v5469_v63 = vsel %vm2531_vm1, %v9905_v42, %v5468_v40  ;;  %v4887_v5 = vsel %vm1717_vm0, %v4882_v54, %v4886_v52 }
 0x293   : > { %v6911_v34 = vpop.f32.mrb[93].mxu0  ;;  %v5466_v62 = vrot.slane %v9332_v28, 1  ;;  %v9860_v55 = vrot.slane %v9334_v48, 1  ;;  %v4911_v56 = vsel %vm1717_vm0, %v4906_v45, %v4910_v36  ;;  %v4920_v14 = vshrl.u32 %v9308_v37, 16 }
 0x294   : > { %v6912_v33 = vadd.f32 %v6911_v34, %v6910_v38  ;;  %v6913_v1 = vpop.f32.mrb[94].mxu0  ;;  %v9336_v4 = vadd.f32 %v6909_v44, %v3248_v61  ;;  %v6810_v27 = vpop.f32.mrb[92].mxu1  ;;  %v4924_v39 = vshll.u32 %v9334_v48, 16  ;;  %v4898_v61 = vor.u32 %v4896_v13, %v4886_v52 }
 0x295   : > { %v6914_v12 = vpop.f32.mrb[95].mxu0  ;;  %v6811_v49 = vpop.f32.mrb[93].mxu1  ;;  %v5467_v42 = vsel %vm2531_vm1, %v5462_v59, %v5466_v62  ;;  %v4922_v13 = vor.u32 %v4920_v14, %v4910_v36  ;;  %v4936_v14 = vshrl.u32 %v9334_v48, 16 }
 0x296   : > { %v6915_v2 = vadd.f32 %v6914_v12, %v6913_v1  ;;  %v6812_v26 = vadd.f32 %v6811_v49, %v6810_v27  ;;  %v6813_v38 = vpop.f32.mrb[94].mxu1  ;;  %v4900_v12 = vshll.u32 %v9332_v28, 16  ;;  %v4758_v1 = vld [vmem:[#allocation2 + $0xf8] sm:$0xff] }
 0x297   : > { %5679 = vmatmul.mubr.bf16.gmra.mrb[200].mxu0 %v5463_v35  ;;  %v6814_v44 = vpop.f32.mrb[95].mxu1 }
 0x298   : > { %5686 = vmatprep.mubr.bf16.mxu0 %v5469_v63  ;;  %v3249_v21 = vadd.f32 %v6812_v26, %v9117_v9  ;;  %v6815_v34 = vadd.f32 %v6814_v44, %v6813_v38  ;;  %v9350_v63 = vpack.c.bf16 %v4753_v16, %v4751_v47  ;;  %v4902_v9 = vrot.slane %v4900_v12, 1 }
 0x299   : > { %5253 = vmatmul.mubr.bf16.gmra.mrb[200].mxu1 %v4887_v5  ;;  %v5473_v26 = vsel %vm2531_vm1, %v5468_v40, %v9860_v55  ;;  %v4926_v38 = vrot.slane %v4924_v39, 1  ;;  %v9360_v5 = vpack.c.bf16 %v4758_v1, %v4756_v57 }
 0x29a   : > { %v6916_v24 = vpop.f32.mrb[96].mxu0  ;;  %v9352_v45 = vadd.f32 %v6912_v33, %v3249_v21  ;;  %v3250_v27 = vadd.f32 %v6815_v34, %v9125_v50  ;;  %5260 = vmatprep.mubr.bf16.mxu1 %v4911_v56  ;;  %v4912_v50 = vshrl.u32 %v9332_v28, 16  ;;  %v4916_v12 = vshll.u32 %v9350_v63, 16  ;;  %v4755_v21 = vld [vmem:[#allocation2 + $0xe0] sm:$0xff]  ;;  %v4757_v34 = vld [vmem:[#allocation2 + $0xf0] sm:$0xff] }
 0x29b   : > { %v6917_v6 = vpop.f32.mrb[97].mxu0  ;;  %v5470_v16 = vrot.slane %v9350_v63, 1  ;;  %v4903_v40 = vsel %vm1717_vm0, %v4898_v61, %v4902_v9  ;;  %v5476_v36 = vrot.slane %v9360_v5, 1  ;;  %v4940_v39 = vshll.u32 %v9360_v5, 16 }
 0x29c   : > { %v6918_v54 = vadd.f32 %v6917_v6, %v6916_v24  ;;  %v6919_v35 = vpop.f32.mrb[98].mxu0  ;;  %v9362_v59 = vadd.f32 %v6915_v2, %v3250_v27  ;;  %v6816_v33 = vpop.f32.mrb[96].mxu1  ;;  %v4927_v2 = vsel %vm1717_vm0, %v4922_v13, %v4926_v38 }
 0x29d   : > { %v6920_v49 = vpop.f32.mrb[99].mxu0  ;;  %v6817_v47 = vpop.f32.mrb[97].mxu1  ;;  %v5471_v13 = vsel %vm2531_vm1, %v5466_v62, %v5470_v16 }
 0x29e   : > { %v6921_v52 = vadd.f32 %v6920_v49, %v6919_v35  ;;  %v6818_v37 = vadd.f32 %v6817_v47, %v6816_v33  ;;  %v6819_v44 = vpop.f32.mrb[98].mxu1  ;;  %v4760_v35 = vld [vmem:[#allocation2 + $0x108] sm:$0xff]  ;;  %v4914_v49 = vor.u32 %v4912_v50, %v4902_v9  ;;  %v4938_v50 = vor.u32 %v4936_v14, %v4926_v38  ;;  %v4759_v14 = vld [vmem:[#allocation2 + $0x100] sm:$0xff] }
 0x29f   : > { %5687 = vmatmul.mubr.bf16.gmra.mrb[204].mxu0 %v5467_v42  ;;  %v6820_v24 = vpop.f32.mrb[99].mxu1  ;;  %v4762_v42 = vld [vmem:[#allocation2 + $0x118] sm:$0xff] }
 0x2a0   : > { %5694 = vmatprep.mubr.bf16.mxu0 %v5473_v26  ;;  %v3251_v6 = vadd.f32 %v6818_v37, %v9143_v31  ;;  %v6821_v57 = vadd.f32 %v6820_v24, %v6819_v44  ;;  %v4918_v26 = vrot.slane %v4916_v12, 1  ;;  %v9906_v31 = vrot.slane %v9334_v48, 1 }
 0x2a1   : > { %5261 = vmatmul.mubr.bf16.gmra.mrb[204].mxu1 %v4903_v40  ;;  %v9384_v44 = vpack.c.bf16 %v4757_v34, %v4755_v21  ;;  %v4942_v12 = vrot.slane %v4940_v39, 1  ;;  %v9386_v28 = vpack.c.bf16 %v4762_v42, %v4760_v35  ;;  %v4928_v40 = vshrl.u32 %v9350_v63, 16  ;;  %v4761_v39 = vld [vmem:[#allocation2 + $0x110] sm:$0xff]  ;;  %v4764_v42 = vld [vmem:[#allocation2 + $0x128] sm:$0xff] }
 0x2a2   : > { %v6922_v56 = vpop.f32.mrb[100].mxu0  ;;  %v9376_v33 = vadd.f32 %v6918_v54, %v3251_v6  ;;  %v3252_v47 = vadd.f32 %v6821_v57, %v9151_v30  ;;  %5268 = vmatprep.mubr.bf16.mxu1 %v4927_v2  ;;  %v5477_v37 = vsel %vm2531_vm1, %v9906_v31, %v5476_v36  ;;  %v4919_v2 = vsel %vm1717_vm0, %v4914_v49, %v4918_v26 }
 0x2a3   : > { %v6923_v1 = vpop.f32.mrb[101].mxu0  ;;  %v5474_v24 = vrot.slane %v9384_v44, 1  ;;  %v9861_v38 = vrot.slane %v9386_v28, 1  ;;  %v4943_v34 = vsel %vm1717_vm0, %v4938_v50, %v4942_v12  ;;  %v4952_v6 = vshrl.u32 %v9360_v5, 16 }
 0x2a4   : > { %v6924_v61 = vadd.f32 %v6923_v1, %v6922_v56  ;;  %v6925_v27 = vpop.f32.mrb[102].mxu0  ;;  %v9388_v62 = vadd.f32 %v6921_v52, %v3252_v47  ;;  %v6822_v54 = vpop.f32.mrb[100].mxu1  ;;  %v4956_v63 = vshll.u32 %v9386_v28, 16  ;;  %v4930_v47 = vor.u32 %v4928_v40, %v4918_v26 }
 0x2a5   : > { %v6926_v55 = vpop.f32.mrb[103].mxu0  ;;  %v6823_v30 = vpop.f32.mrb[101].mxu1  ;;  %v5475_v31 = vsel %vm2531_vm1, %v5470_v16, %v5474_v24  ;;  %v4954_v40 = vor.u32 %v4952_v6, %v4942_v12  ;;  %v4968_v6 = vshrl.u32 %v9386_v28, 16 }
 0x2a6   : > { %v6927_v9 = vadd.f32 %v6926_v55, %v6925_v27  ;;  %v6824_v48 = vadd.f32 %v6823_v30, %v6822_v54  ;;  %v6825_v56 = vpop.f32.mrb[102].mxu1  ;;  %v4932_v55 = vshll.u32 %v9384_v44, 16  ;;  %v4766_v27 = vld [vmem:[#allocation2 + $0x138] sm:$0xff] }
 0x2a7   : > { %5695 = vmatmul.mubr.bf16.gmra.mrb[208].mxu0 %v5471_v13  ;;  %v6826_v52 = vpop.f32.mrb[103].mxu1 }
 0x2a8   : > { %5702 = vmatprep.mubr.bf16.mxu0 %v5477_v37  ;;  %v3253_v57 = vadd.f32 %v6824_v48, %v9163_v15  ;;  %v6827_v1 = vadd.f32 %v6826_v52, %v6825_v56  ;;  %v9402_v37 = vpack.c.bf16 %v4761_v39, %v4759_v14  ;;  %v4934_v15 = vrot.slane %v4932_v55, 1 }
 0x2a9   : > { %5269 = vmatmul.mubr.bf16.gmra.mrb[208].mxu1 %v4919_v2  ;;  %v5481_v48 = vsel %vm2531_vm1, %v5476_v36, %v9861_v38  ;;  %v4958_v56 = vrot.slane %v4956_v63, 1  ;;  %v9412_v2 = vpack.c.bf16 %v4766_v27, %v4764_v42 }
 0x2aa   : > { %v6928_v21 = vpop.f32.mrb[104].mxu0  ;;  %v9404_v50 = vadd.f32 %v6924_v61, %v3253_v57  ;;  %v3254_v54 = vadd.f32 %v6827_v1, %v9169_v58  ;;  %5276 = vmatprep.mubr.bf16.mxu1 %v4943_v34  ;;  %v4944_v58 = vshrl.u32 %v9384_v44, 16  ;;  %v4948_v55 = vshll.u32 %v9402_v37, 16  ;;  %v4763_v57 = vld [vmem:[#allocation2 + $0x120] sm:$0xff]  ;;  %v4765_v1 = vld [vmem:[#allocation2 + $0x130] sm:$0xff] }
 0x2ab   : > { %v6929_v35 = vpop.f32.mrb[105].mxu0  ;;  %v5478_v39 = vrot.slane %v9402_v37, 1  ;;  %v4935_v36 = vsel %vm1717_vm0, %v4930_v47, %v4934_v15  ;;  %v5484_v12 = vrot.slane %v9412_v2, 1  ;;  %v4972_v63 = vshll.u32 %v9412_v2, 16 }
 0x2ac   : > { %v6930_v49 = vadd.f32 %v6929_v35, %v6928_v21  ;;  %v6931_v13 = vpop.f32.mrb[106].mxu0  ;;  %v9414_v16 = vadd.f32 %v6927_v9, %v3254_v54  ;;  %v6828_v61 = vpop.f32.mrb[104].mxu1  ;;  %v4959_v9 = vsel %vm1717_vm0, %v4954_v40, %v4958_v56 }
 0x2ad   : > { %v6932_v30 = vpop.f32.mrb[107].mxu0  ;;  %v6829_v14 = vpop.f32.mrb[105].mxu1  ;;  %v5479_v40 = vsel %vm2531_vm1, %v5474_v24, %v5478_v39 }
 0x2ae   : > { %v6933_v26 = vadd.f32 %v6932_v30, %v6931_v13  ;;  %v6830_v5 = vadd.f32 %v6829_v14, %v6828_v61  ;;  %v6831_v52 = vpop.f32.mrb[106].mxu1  ;;  %v4768_v13 = vld [vmem:[#allocation2 + $0x148] sm:$0xff]  ;;  %v4946_v30 = vor.u32 %v4944_v58, %v4934_v15  ;;  %v4970_v58 = vor.u32 %v4968_v6, %v4958_v56  ;;  %v4767_v6 = vld [vmem:[#allocation2 + $0x140] sm:$0xff] }
 0x2af   : > { %5703 = vmatmul.mubr.bf16.gmra.mrb[212].mxu0 %v5475_v31  ;;  %v6832_v21 = vpop.f32.mrb[107].mxu1  ;;  %v4770_v31 = vld [vmem:[#allocation2 + $0x158] sm:$0xff] }
 0x2b0   : > { %5710 = vmatprep.mubr.bf16.mxu0 %v5481_v48  ;;  %v3255_v35 = vadd.f32 %v6830_v5, %v9174_v29  ;;  %v6833_v42 = vadd.f32 %v6832_v21, %v6831_v52  ;;  %v4950_v48 = vrot.slane %v4948_v55, 1  ;;  %v9907_v29 = vrot.slane %v9386_v28, 1 }
 0x2b1   : > { %5277 = vmatmul.mubr.bf16.gmra.mrb[212].mxu1 %v4935_v36  ;;  %v9436_v52 = vpack.c.bf16 %v4765_v1, %v4763_v57  ;;  %v4974_v55 = vrot.slane %v4972_v63, 1  ;;  %v9438_v44 = vpack.c.bf16 %v4770_v31, %v4768_v13  ;;  %v4960_v36 = vshrl.u32 %v9402_v37, 16  ;;  %v4769_v63 = vld [vmem:[#allocation2 + $0x150] sm:$0xff]  ;;  %v4772_v31 = vld [vmem:[#allocation2 + $0x168] sm:$0xff] }
 0x2b2   : > { %v6934_v34 = vpop.f32.mrb[108].mxu0  ;;  %v9428_v61 = vadd.f32 %v6930_v49, %v3255_v35  ;;  %v3256_v14 = vadd.f32 %v6833_v42, %v9179_v8  ;;  %5284 = vmatprep.mubr.bf16.mxu1 %v4959_v9  ;;  %v5485_v5 = vsel %vm2531_vm1, %v9907_v29, %v5484_v12  ;;  %v4951_v9 = vsel %vm1717_vm0, %v4946_v30, %v4950_v48 }
 0x2b3   : > { %v6935_v27 = vpop.f32.mrb[109].mxu0  ;;  %v5482_v21 = vrot.slane %v9436_v52, 1  ;;  %v9862_v56 = vrot.slane %v9438_v44, 1  ;;  %v4975_v1 = vsel %vm1717_vm0, %v4970_v58, %v4974_v55  ;;  %v4984_v35 = vshrl.u32 %v9412_v2, 16 }
 0x2b4   : > { %v6936_v47 = vadd.f32 %v6935_v27, %v6934_v34  ;;  %v6937_v54 = vpop.f32.mrb[110].mxu0  ;;  %v9440_v24 = vadd.f32 %v6933_v26, %v3256_v14  ;;  %v6834_v49 = vpop.f32.mrb[108].mxu1  ;;  %v4988_v37 = vshll.u32 %v9438_v44, 16  ;;  %v4962_v14 = vor.u32 %v4960_v36, %v4950_v48 }
 0x2b5   : > { %v6938_v38 = vpop.f32.mrb[111].mxu0  ;;  %v6835_v8 = vpop.f32.mrb[109].mxu1  ;;  %v5483_v29 = vsel %vm2531_vm1, %v5478_v39, %v5482_v21  ;;  %v4986_v36 = vor.u32 %v4984_v35, %v4974_v55  ;;  %v5000_v35 = vshrl.u32 %v9438_v44, 16 }
 0x2b6   : > { %v6939_v15 = vadd.f32 %v6938_v38, %v6937_v54  ;;  %v6836_v28 = vadd.f32 %v6835_v8, %v6834_v49  ;;  %v6837_v34 = vpop.f32.mrb[110].mxu1  ;;  %v4964_v38 = vshll.u32 %v9436_v52, 16  ;;  %v4774_v54 = vld [vmem:[#allocation2 + $0x178] sm:$0xff] }
 0x2b7   : > { %5711 = vmatmul.mubr.bf16.gmra.mrb[216].mxu0 %v5479_v40  ;;  %v6838_v26 = vpop.f32.mrb[111].mxu1 }
 0x2b8   : > { %5718 = vmatprep.mubr.bf16.mxu0 %v5485_v5  ;;  %v3257_v42 = vadd.f32 %v6836_v28, %v9184_v43  ;;  %v6839_v27 = vadd.f32 %v6838_v26, %v6837_v34  ;;  %v9454_v5 = vpack.c.bf16 %v4769_v63, %v4767_v6  ;;  %v4966_v43 = vrot.slane %v4964_v38, 1 }
 0x2b9   : > { %5285 = vmatmul.mubr.bf16.gmra.mrb[216].mxu1 %v4951_v9  ;;  %v5489_v28 = vsel %vm2531_vm1, %v5484_v12, %v9862_v56  ;;  %v4990_v34 = vrot.slane %v4988_v37, 1  ;;  %v9464_v9 = vpack.c.bf16 %v4774_v54, %v4772_v31 }
 0x2ba   : > { %v6940_v57 = vpop.f32.mrb[112].mxu0  ;;  %v9456_v58 = vadd.f32 %v6936_v47, %v3257_v42  ;;  %v3258_v49 = vadd.f32 %v6839_v27, %v9189_v3  ;;  %5292 = vmatprep.mubr.bf16.mxu1 %v4975_v1  ;;  %v4976_v3 = vshrl.u32 %v9436_v52, 16  ;;  %v4980_v38 = vshll.u32 %v9454_v5, 16  ;;  %v4771_v42 = vld [vmem:[#allocation2 + $0x160] sm:$0xff]  ;;  %v4773_v27 = vld [vmem:[#allocation2 + $0x170] sm:$0xff] }
 0x2bb   : > { %v6941_v13 = vpop.f32.mrb[113].mxu0  ;;  %v5486_v63 = vrot.slane %v9454_v5, 1  ;;  %v4967_v12 = vsel %vm1717_vm0, %v4962_v14, %v4966_v43  ;;  %v5492_v55 = vrot.slane %v9464_v9, 1  ;;  %v5004_v37 = vshll.u32 %v9464_v9, 16 }
 0x2bc   : > { %v6942_v30 = vadd.f32 %v6941_v13, %v6940_v57  ;;  %v6943_v40 = vpop.f32.mrb[114].mxu0  ;;  %v9466_v39 = vadd.f32 %v6939_v15, %v3258_v49  ;;  %v6840_v47 = vpop.f32.mrb[112].mxu1  ;;  %v4991_v15 = vsel %vm1717_vm0, %v4986_v36, %v4990_v34 }
 0x2bd   : > { %v6944_v8 = vpop.f32.mrb[115].mxu0  ;;  %v6841_v6 = vpop.f32.mrb[113].mxu1  ;;  %v5487_v36 = vsel %vm2531_vm1, %v5482_v21, %v5486_v63 }
 0x2be   : > { %v6945_v48 = vadd.f32 %v6944_v8, %v6943_v40  ;;  %v6842_v2 = vadd.f32 %v6841_v6, %v6840_v47  ;;  %v6843_v26 = vpop.f32.mrb[114].mxu1  ;;  %v4776_v40 = vld [vmem:[#allocation2 + $0x188] sm:$0xff]  ;;  %v4978_v8 = vor.u32 %v4976_v3, %v4966_v43  ;;  %v5002_v3 = vor.u32 %v5000_v35, %v4990_v34  ;;  %v4775_v35 = vld [vmem:[#allocation2 + $0x180] sm:$0xff] }
 0x2bf   : > { %5719 = vmatmul.mubr.bf16.gmra.mrb[220].mxu0 %v5483_v29  ;;  %v6844_v57 = vpop.f32.mrb[115].mxu1  ;;  %v4778_v29 = vld [vmem:[#allocation2 + $0x198] sm:$0xff] }
 0x2c0   : > { %5726 = vmatprep.mubr.bf16.mxu0 %v5489_v28  ;;  %v3259_v13 = vadd.f32 %v6842_v2, %v9194_v18  ;;  %v6845_v31 = vadd.f32 %v6844_v57, %v6843_v26  ;;  %v4982_v28 = vrot.slane %v4980_v38, 1  ;;  %v9908_v18 = vrot.slane %v9438_v44, 1 }
 0x2c1   : > { %5293 = vmatmul.mubr.bf16.gmra.mrb[220].mxu1 %v4967_v12  ;;  %v9488_v26 = vpack.c.bf16 %v4773_v27, %v4771_v42  ;;  %v5006_v38 = vrot.slane %v5004_v37, 1  ;;  %v9490_v52 = vpack.c.bf16 %v4778_v29, %v4776_v40  ;;  %v4992_v12 = vshrl.u32 %v9454_v5, 16  ;;  %v4777_v37 = vld [vmem:[#allocation2 + $0x190] sm:$0xff]  ;;  %v4780_v29 = vld [vmem:[#allocation2 + $0x1a8] sm:$0xff] }
 0x2c2   : > { %v6946_v1 = vpop.f32.mrb[116].mxu0  ;;  %v9480_v47 = vadd.f32 %v6942_v30, %v3259_v13  ;;  %v3260_v6 = vadd.f32 %v6845_v31, %v9199_v51  ;;  %5300 = vmatprep.mubr.bf16.mxu1 %v4991_v15  ;;  %v5493_v2 = vsel %vm2531_vm1, %v9908_v18, %v5492_v55  ;;  %v4983_v15 = vsel %vm1717_vm0, %v4978_v8, %v4982_v28 }
 0x2c3   : > { %v6947_v54 = vpop.f32.mrb[117].mxu0  ;;  %v5490_v57 = vrot.slane %v9488_v26, 1  ;;  %v9863_v34 = vrot.slane %v9490_v52, 1  ;;  %v5007_v27 = vsel %vm1717_vm0, %v5002_v3, %v5006_v38  ;;  %v5016_v13 = vshrl.u32 %v9464_v9, 16 }
 0x2c4   : > { %v6948_v14 = vadd.f32 %v6947_v54, %v6946_v1  ;;  %v6949_v49 = vpop.f32.mrb[118].mxu0  ;;  %v9492_v21 = vadd.f32 %v6945_v48, %v3260_v6  ;;  %v6846_v30 = vpop.f32.mrb[116].mxu1  ;;  %v5020_v5 = vshll.u32 %v9490_v52, 16  ;;  %v4994_v6 = vor.u32 %v4992_v12, %v4982_v28 }
 0x2c5   : > { %v6950_v56 = vpop.f32.mrb[119].mxu0  ;;  %v6847_v51 = vpop.f32.mrb[117].mxu1  ;;  %v5491_v18 = vsel %vm2531_vm1, %v5486_v63, %v5490_v57  ;;  %v5018_v12 = vor.u32 %v5016_v13, %v5006_v38  ;;  %v5032_v13 = vshrl.u32 %v9490_v52, 16 }
 0x2c6   : > { %v6951_v43 = vadd.f32 %v6950_v56, %v6949_v49  ;;  %v6848_v44 = vadd.f32 %v6847_v51, %v6846_v30  ;;  %v6849_v1 = vpop.f32.mrb[118].mxu1  ;;  %v4996_v56 = vshll.u32 %v9488_v26, 16  ;;  %v4782_v49 = vld [vmem:[#allocation2 + $0x1b8] sm:$0xff] }
 0x2c7   : > { %5727 = vmatmul.mubr.bf16.gmra.mrb[224].mxu0 %v5487_v36  ;;  %v6850_v48 = vpop.f32.mrb[119].mxu1 }
 0x2c8   : > { %5734 = vmatprep.mubr.bf16.mxu0 %v5493_v2  ;;  %v3261_v31 = vadd.f32 %v6848_v44, %v9204_v19  ;;  %v6851_v54 = vadd.f32 %v6850_v48, %v6849_v1  ;;  %v9506_v2 = vpack.c.bf16 %v4777_v37, %v4775_v35  ;;  %v4998_v19 = vrot.slane %v4996_v56, 1 }
 0x2c9   : > { %5301 = vmatmul.mubr.bf16.gmra.mrb[224].mxu1 %v4983_v15  ;;  %v5497_v44 = vsel %vm2531_vm1, %v5492_v55, %v9863_v34  ;;  %v5022_v1 = vrot.slane %v5020_v5, 1  ;;  %v9516_v15 = vpack.c.bf16 %v4782_v49, %v4780_v29 }
 0x2ca   : > { %v6952_v42 = vpop.f32.mrb[120].mxu0  ;;  %v9508_v3 = vadd.f32 %v6948_v14, %v3261_v31  ;;  %v3262_v30 = vadd.f32 %v6851_v54, %v9209_v17  ;;  %5308 = vmatprep.mubr.bf16.mxu1 %v5007_v27  ;;  %v5008_v17 = vshrl.u32 %v9488_v26, 16  ;;  %v5012_v56 = vshll.u32 %v9506_v2, 16  ;;  %v4779_v31 = vld [vmem:[#allocation2 + $0x1a0] sm:$0xff]  ;;  %v4781_v54 = vld [vmem:[#allocation2 + $0x1b0] sm:$0xff] }
 0x2cb   : > { %v6953_v40 = vpop.f32.mrb[121].mxu0  ;;  %v5494_v37 = vrot.slane %v9506_v2, 1  ;;  %v4999_v55 = vsel %vm1717_vm0, %v4994_v6, %v4998_v19  ;;  %v5500_v38 = vrot.slane %v9516_v15, 1  ;;  %v5036_v5 = vshll.u32 %v9516_v15, 16 }
 0x2cc   : > { %v6954_v8 = vadd.f32 %v6953_v40, %v6952_v42  ;;  %v6955_v36 = vpop.f32.mrb[122].mxu0  ;;  %v9518_v63 = vadd.f32 %v6951_v43, %v3262_v30  ;;  %v6852_v14 = vpop.f32.mrb[120].mxu1  ;;  %v5023_v43 = vsel %vm1717_vm0, %v5018_v12, %v5022_v1 }
 0x2cd   : > { %v6956_v51 = vpop.f32.mrb[123].mxu0  ;;  %v6853_v35 = vpop.f32.mrb[121].mxu1  ;;  %v5495_v12 = vsel %vm2531_vm1, %v5490_v57, %v5494_v37 }
 0x2ce   : > { %v6957_v28 = vadd.f32 %v6956_v51, %v6955_v36  ;;  %v6854_v9 = vadd.f32 %v6853_v35, %v6852_v14  ;;  %v6855_v48 = vpop.f32.mrb[122].mxu1  ;;  %v4784_v36 = vld [vmem:[#allocation2 + $0x1c8] sm:$0xff]  ;;  %v5010_v51 = vor.u32 %v5008_v17, %v4998_v19  ;;  %v5034_v17 = vor.u32 %v5032_v13, %v5022_v1  ;;  %v4783_v13 = vld [vmem:[#allocation2 + $0x1c0] sm:$0xff] }
 0x2cf   : > { %5735 = vmatmul.mubr.bf16.gmra.mrb[228].mxu0 %v5491_v18  ;;  %v6856_v42 = vpop.f32.mrb[123].mxu1  ;;  %v4786_v18 = vld [vmem:[#allocation2 + $0x1d8] sm:$0xff] }
 0x2d0   : > { %5742 = vmatprep.mubr.bf16.mxu0 %v5497_v44  ;;  %v3263_v40 = vadd.f32 %v6854_v9, %v9214_v23  ;;  %v6857_v29 = vadd.f32 %v6856_v42, %v6855_v48  ;;  %v5014_v44 = vrot.slane %v5012_v56, 1  ;;  %v9909_v23 = vrot.slane %v9490_v52, 1 }
 0x2d1   : > { %5309 = vmatmul.mubr.bf16.gmra.mrb[228].mxu1 %v4999_v55  ;;  %v9540_v48 = vpack.c.bf16 %v4781_v54, %v4779_v31  ;;  %v5038_v56 = vrot.slane %v5036_v5, 1  ;;  %v9542_v26 = vpack.c.bf16 %v4786_v18, %v4784_v36  ;;  %v5024_v55 = vshrl.u32 %v9506_v2, 16  ;;  %v4785_v5 = vld [vmem:[#allocation2 + $0x1d0] sm:$0xff]  ;;  %v4788_v18 = vld [vmem:[#allocation2 + $0x1e8] sm:$0xff] }
 0x2d2   : > { %v6958_v27 = vpop.f32.mrb[124].mxu0  ;;  %v9532_v14 = vadd.f32 %v6954_v8, %v3263_v40  ;;  %v3264_v35 = vadd.f32 %v6857_v29, %v9219_v41  ;;  %5316 = vmatprep.mubr.bf16.mxu1 %v5023_v43  ;;  %v5501_v9 = vsel %vm2531_vm1, %v9909_v23, %v5500_v38  ;;  %v5015_v43 = vsel %vm1717_vm0, %v5010_v51, %v5014_v44 }
 0x2d3   : > { %v6959_v49 = vpop.f32.mrb[125].mxu0  ;;  %v5498_v42 = vrot.slane %v9540_v48, 1  ;;  %v9864_v1 = vrot.slane %v9542_v26, 1  ;;  %v5039_v54 = vsel %vm1717_vm0, %v5034_v17, %v5038_v56  ;;  %v5048_v40 = vshrl.u32 %v9516_v15, 16 }
 0x2d4   : > { %v6960_v6 = vadd.f32 %v6959_v49, %v6958_v27  ;;  %v6961_v30 = vpop.f32.mrb[126].mxu0  ;;  %v9544_v57 = vadd.f32 %v6957_v28, %v3264_v35  ;;  %v6858_v8 = vpop.f32.mrb[124].mxu1  ;;  %v5052_v2 = vshll.u32 %v9542_v26, 16  ;;  %v5026_v35 = vor.u32 %v5024_v55, %v5014_v44 }
 0x2d5   : > { %v6962_v34 = vpop.f32.mrb[127].mxu0  ;;  %v6859_v41 = vpop.f32.mrb[125].mxu1  ;;  %v5499_v23 = vsel %vm2531_vm1, %v5494_v37, %v5498_v42  ;;  %v5050_v55 = vor.u32 %v5048_v40, %v5038_v56 }
 0x2d6   : > { %v6963_v19 = vadd.f32 %v6962_v34, %v6961_v30  ;;  %v6860_v52 = vadd.f32 %v6859_v41, %v6858_v8  ;;  %v6861_v27 = vpop.f32.mrb[126].mxu1  ;;  %v5028_v34 = vshll.u32 %v9540_v48, 16  ;;  %v4790_v30 = vld [vmem:[#allocation2 + $0x1f8] sm:$0xff] }
 0x2d7   : > { %5743 = vmatmul.mubr.bf16.gmra.mrb[232].mxu0 %v5495_v12  ;;  %v6862_v28 = vpop.f32.mrb[127].mxu1 }
 0x2d8   : > { %5750 = vmatprep.mubr.bf16.mxu0 %v5501_v9  ;;  %v3265_v29 = vadd.f32 %v6860_v52, %v9230_v20  ;;  %v6863_v49 = vadd.f32 %v6862_v28, %v6861_v27  ;;  %v9558_v9 = vpack.c.bf16 %v4785_v5, %v4783_v13  ;;  %v5030_v20 = vrot.slane %v5028_v34, 1 }
 0x2d9   : > { %5317 = vmatmul.mubr.bf16.gmra.mrb[232].mxu1 %v5015_v43  ;;  %v5505_v52 = vsel %vm2531_vm1, %v5500_v38, %v9864_v1  ;;  %v5054_v27 = vrot.slane %v5052_v2, 1  ;;  %v9568_v43 = vpack.c.bf16 %v4790_v30, %v4788_v18 }
 0x2da   : > { %v6964_v31 = vpop.f32.mrb[128].mxu0  ;;  %v9560_v17 = vadd.f32 %v6960_v6, %v3265_v29  ;;  %v3266_v8 = vadd.f32 %v6863_v49, %v9235_v46  ;;  %5324 = vmatprep.mubr.bf16.mxu1 %v5039_v54  ;;  %v5040_v46 = vshrl.u32 %v9540_v48, 16  ;;  %v5044_v34 = vshll.u32 %v9558_v9, 16  ;;  %v4789_v54 = vld [vmem:[#allocation2 + $0x1f0] sm:$0xff] }
 0x2db   : > { %v6965_v36 = vpop.f32.mrb[129].mxu0  ;;  %v5502_v5 = vrot.slane %v9558_v9, 1  ;;  %v5031_v38 = vsel %vm1717_vm0, %v5026_v35, %v5030_v20  ;;  %v5055_v2 = vsel %vm1717_vm0, %v5050_v55, %v5054_v27  ;;  %v5064_v29 = vshrl.u32 %v9542_v26, 16 }
 0x2dc   : > { %v6966_v51 = vadd.f32 %v6965_v36, %v6964_v31  ;;  %v6967_v12 = vpop.f32.mrb[130].mxu0  ;;  %v9570_v37 = vadd.f32 %v6963_v19, %v3266_v8  ;;  %v6864_v6 = vpop.f32.mrb[128].mxu1  ;;  %v4787_v31 = vld [vmem:[#allocation2 + $0x1e0] sm:$0xff]  ;;  %v5068_v49 = vshll.u32 %v9568_v43, 16  ;;  %v5388_v36 = vld [vmem:[#allocation2 + $0x208] sm:$0x3] }
 0x2dd   : > { %v6968_v41 = vpop.f32.mrb[131].mxu0  ;;  %v6865_v13 = vpop.f32.mrb[129].mxu1  ;;  %v4792_v8 = vld [vmem:[#allocation2 + $0x208] sm:$0x1]  ;;  %v9584_v55 = vpack.c.bf16 %v4789_v54, %v4787_v31 }
 0x2de   : > { %v6969_v44 = vadd.f32 %v6968_v41, %v6967_v12  ;;  %v6866_v15 = vadd.f32 %v6865_v13, %v6864_v6  ;;  %v6867_v28 = vpop.f32.mrb[130].mxu1  ;;  %v5503_v6 = vsel %vm2531_vm1, %v5498_v42, %v5502_v5  ;;  %v5070_v48 = vrot.slane %v5068_v49, 1 }
 0x2df   : > { %5751 = vmatmul.mubr.bf16.gmra.mrb[236].mxu0 %v5499_v23  ;;  %v6868_v19 = vpop.f32.mrb[131].mxu1  ;;  %v5042_v23 = vor.u32 %v5040_v46, %v5030_v20  ;;  %v9911_v20 = vrot.slane %v9542_v26, 1  ;;  %v5060_v54 = vshll.u32 %v9584_v55, 16 }
 0x2e0   : > { %5758 = vmatprep.mubr.bf16.mxu0 %v5505_v52  ;;  %v3267_v18 = vadd.f32 %v6866_v15, %v9240_v11  ;;  %v6869_v30 = vadd.f32 %v6868_v19, %v6867_v28  ;;  %v5046_v52 = vrot.slane %v5044_v34, 1  ;;  %v9910_v11 = vrot.slane %v9568_v43, 1 }
 0x2e1   : > { %5325 = vmatmul.mubr.bf16.gmra.mrb[236].mxu1 %v5031_v38  ;;  %v5392_v15 = vpack.c.bf16 %v5388_v36, %v5388_v36  ;;  %v5066_v28 = vor.u32 %v5064_v29, %v5054_v27  ;;  %v4822_v38 = vpack.c.bf16 %v4792_v8, %v4792_v8  ;;  %v5506_v19 = vrot.slane %v9584_v55, 1  ;;  %v5387_v27 = vld [vmem:[#allocation2 + $0x200] sm:$0x3] }
 0x2e2   : > { %v6970_v40 = vpop.f32.mrb[132].mxu0  ;;  %v9586_v13 = vadd.f32 %v6966_v51, %v3267_v18  ;;  %v3268_v1 = vadd.f32 %v6869_v30, %v9245_v32  ;;  %5332 = vmatprep.mubr.bf16.mxu1 %v5055_v2  ;;  %v5509_v46 = vsel %vm2531_vm1, %v9911_v20, %v9910_v11  ;;  %v5056_v51 = vshrl.u32 %v9558_v9, 16  ;;  %v4791_v9 = vld [vmem:[#allocation2 + $0x200] sm:$0x1] }
 0x2e3   : > { %v6971_v12 = vpop.f32.mrb[133].mxu0  ;;  %v5047_v2 = vsel %vm1717_vm0, %v5042_v23, %v5046_v52  ;;  %v5084_v36 = vshll.u32 %v4822_v38, 16  ;;  %v5062_v11 = vrot.slane %v5060_v54, 1  ;;  %v5507_v23 = vsel %vm2531_vm1, %v5502_v5, %v5506_v19 }
 0x2e4   : > { %v6972_v35 = vadd.f32 %v6971_v12, %v6970_v40  ;;  %v6973_v41 = vpop.f32.mrb[134].mxu0  ;;  %v9594_v42 = vadd.f32 %v6969_v44, %v3268_v1  ;;  %v6870_v31 = vpop.f32.mrb[132].mxu1  ;;  %v5071_v1 = vsel %vm1717_vm0, %v5066_v28, %v5070_v48  ;;  %v5080_v44 = vshrl.u32 %v9568_v43, 16 }
 0x2e5   : > { %v6974_v56 = vpop.f32.mrb[135].mxu0  ;;  %v6871_v32 = vpop.f32.mrb[133].mxu1  ;;  %v5058_v8 = vor.u32 %v5056_v51, %v5046_v52  ;;  %v5391_v20 = vpack.c.bf16 %v5387_v27, %v5387_v27  ;;  %v9912_v38 = vrot.slane %v9568_v43, 1  ;;  %v5086_v51 = vrot.slane %v5084_v36, 1 }
 0x2e6   : > { %v6975_v34 = vadd.f32 %v6974_v56, %v6973_v41  ;;  %v6872_v26 = vadd.f32 %v6871_v32, %v6870_v31  ;;  %v6873_v40 = vpop.f32.mrb[134].mxu1  ;;  %v5512_v56 = vrot.slane %v5392_v15, 1  ;;  %v4821_v31 = vpack.c.bf16 %v4791_v9, %v4791_v9 }
 0x2e7   : > { %5759 = vmatmul.mubr.bf16.gmra.mrb[240].mxu0 %v5503_v6  ;;  %v6874_v29 = vpop.f32.mrb[135].mxu1  ;;  %v5082_v52 = vor.u32 %v5080_v44, %v5070_v48  ;;  %v5072_v27 = vshrl.u32 %v9584_v55, 16 }
 0x2e8   : > { %5766 = vmatprep.mubr.bf16.mxu0 %v5509_v46  ;;  %v3269_v18 = vadd.f32 %v6872_v26, %v9255_v10  ;;  %v6875_v30 = vadd.f32 %v6874_v29, %v6873_v40  ;;  %v5513_v10 = vsel %vm2531_vm1, %v9912_v38, %v5512_v56  ;;  %v5076_v43 = vshll.u32 %v4821_v31, 16 }
 0x2e9   : > { %5333 = vmatmul.mubr.bf16.gmra.mrb[240].mxu1 %v5047_v2  ;;  %v5074_v55 = vor.u32 %v5072_v27, %v5062_v11 }
 0x2ea   : > { %v6976_v49 = vpop.f32.mrb[136].mxu0  ;;  %v9604_v46 = vadd.f32 %v6972_v35, %v3269_v18  ;;  %v3270_v15 = vadd.f32 %v6875_v30, %v9259_v53  ;;  %5340 = vmatprep.mubr.bf16.mxu1 %v5071_v1  ;;  %v5510_v35 = vrot.slane %v5391_v20, 1  ;;  %v5063_v53 = vsel %vm1717_vm0, %v5058_v8, %v5062_v11 }
 0x2eb   : > { %v6977_v12 = vpop.f32.mrb[137].mxu0  ;;  %v5078_v8 = vrot.slane %v5076_v43, 1 }
 0x2ec   : > { %v6978_v41 = vadd.f32 %v6977_v12, %v6976_v49  ;;  %v6979_v6 = vpop.f32.mrb[138].mxu0  ;;  %v9610_v26 = vadd.f32 %v6975_v34, %v3270_v15  ;;  %v6876_v54 = vpop.f32.mrb[136].mxu1  ;;  %v5087_v49 = vsel %vm1717_vm0, %v5082_v52, %v5086_v51  ;;  %v5511_v9 = vsel %vm2531_vm1, %v5506_v19, %v5510_v35 }
 0x2ed   : > { %v6980_v28 = vpop.f32.mrb[139].mxu0  ;;  %v6877_v5 = vpop.f32.mrb[137].mxu1  ;;  %v5079_v38 = vsel %vm1717_vm0, %v5074_v55, %v5078_v8 }
 0x2ee   : > { %v6981_v32 = vadd.f32 %v6980_v28, %v6979_v6  ;;  %v6878_v40 = vadd.f32 %v6877_v5, %v6876_v54  ;;  %v6879_v2 = vpop.f32.mrb[138].mxu1 }
 0x2ef   : > { %5767 = vmatmul.mubr.bf16.gmra.mrb[244].mxu0 %v5507_v23  ;;  %v6880_v29 = vpop.f32.mrb[139].mxu1 }
 0x2f0   : > { %5774 = vmatprep.mubr.bf16.mxu0 %v5513_v10  ;;  %v3271_v48 = vadd.f32 %v6878_v40, %v9272_v25  ;;  %v6881_v34 = vadd.f32 %v6880_v29, %v6879_v2 }
 0x2f1   : > { %5341 = vmatmul.mubr.bf16.gmra.mrb[244].mxu1 %v5063_v53 }
 0x2f2   : > { %v7098_v56 = vpop.f32.mrb[140].mxu0  ;;  %v9617_v18 = vadd.f32 %v6978_v41, %v3271_v48  ;;  %v3272_v30 = vadd.f32 %v6881_v34, %v9282_v22  ;;  %5348 = vmatprep.mubr.bf16.mxu1 %v5087_v49 }
 0x2f3   : > { %v7099_v1 = vpop.f32.mrb[141].mxu0 }
 0x2f4   : > { %v7100_v44 = vadd.f32 %v7099_v1, %v7098_v56  ;;  %v7101_v36 = vpop.f32.mrb[142].mxu0  ;;  %v9620_v23 = vadd.f32 %v6981_v32, %v3272_v30  ;;  %v6998_v20 = vpop.f32.mrb[140].mxu1 }
 0x2f5   : > { %v7102_v12 = vpop.f32.mrb[143].mxu0  ;;  %v6999_v25 = vpop.f32.mrb[141].mxu1 }
 0x2f6   : > { %v7103_v6 = vadd.f32 %v7102_v12, %v7101_v36  ;;  %v7000_v15 = vadd.f32 %v6999_v25, %v6998_v20  ;;  %v7001_v28 = vpop.f32.mrb[142].mxu1 }
 0x2f7   : > { %5775 = vmatmul.mubr.bf16.gmra.mrb[248].mxu0 %v5511_v9  ;;  %v7002_v10 = vpop.f32.mrb[143].mxu1 }
 0x2f8   : > { %v4321_v41 = vadd.f32 %v7000_v15, %v9300_v0  ;;  %v7003_v31 = vadd.f32 %v7002_v10, %v7001_v28 }
 0x2f9   : > { %5349 = vmatmul.mubr.bf16.gmra.mrb[248].mxu1 %v5079_v38 }
 0x2fa   : > { %v7104_v19 = vpop.f32.mrb[144].mxu0  ;;  %v9624_v51 = vadd.f32 %v7100_v44, %v4321_v41  ;;  %v4322_v32 = vadd.f32 %v7003_v31, %v9310_v60 }
 0x2fb   : > { %v7105_v22 = vpop.f32.mrb[145].mxu0 }
 0x2fc   : > { %v7106_v52 = vadd.f32 %v7105_v22, %v7104_v19  ;;  %v7107_v11 = vpop.f32.mrb[146].mxu0  ;;  %v9627_v35 = vadd.f32 %v7103_v6, %v4322_v32  ;;  %v7004_v40 = vpop.f32.mrb[144].mxu1 }
 0x2fd   : > { %v7108_v54 = vpop.f32.mrb[147].mxu0  ;;  %v7005_v2 = vpop.f32.mrb[145].mxu1 }
 0x2fe   : > { %v7109_v5 = vadd.f32 %v7108_v54, %v7107_v11  ;;  %v7006_v53 = vadd.f32 %v7005_v2, %v7004_v40  ;;  %v7007_v27 = vpop.f32.mrb[146].mxu1 }
 0x2ff   : > { %v7008_v43 = vpop.f32.mrb[147].mxu1 }
 0x300   : > { %v4323_v0 = vadd.f32 %v7006_v53, %v9324_v7  ;;  %v7009_v56 = vadd.f32 %v7008_v43, %v7007_v27 }
 0x302   : > { %v7110_v29 = vpop.f32.mrb[148].mxu0  ;;  %v9630_v1 = vadd.f32 %v7106_v52, %v4323_v0  ;;  %v4324_v60 = vadd.f32 %v7009_v56, %v9336_v4 }
 0x303   : > { %v7111_v49 = vpop.f32.mrb[149].mxu0 }
 0x304   : > { %v7112_v48 = vadd.f32 %v7111_v49, %v7110_v29  ;;  %v7113_v34 = vpop.f32.mrb[150].mxu0  ;;  %v9633_v9 = vadd.f32 %v7109_v5, %v4324_v60  ;;  %v7010_v30 = vpop.f32.mrb[148].mxu1 }
 0x305   : > { %v7114_v44 = vpop.f32.mrb[151].mxu0  ;;  %v7011_v12 = vpop.f32.mrb[149].mxu1 }
 0x306   : > { %v7115_v36 = vadd.f32 %v7114_v44, %v7113_v34  ;;  %v7012_v55 = vadd.f32 %v7011_v12, %v7010_v30  ;;  %v7013_v8 = vpop.f32.mrb[150].mxu1 }
 0x307   : > { %v7014_v6 = vpop.f32.mrb[151].mxu1 }
 0x308   : > { %v4325_v7 = vadd.f32 %v7012_v55, %v9352_v45  ;;  %v7015_v25 = vadd.f32 %v7014_v6, %v7013_v8 }
 0x30a   : > { %v7116_v20 = vpop.f32.mrb[152].mxu0  ;;  %v9636_v10 = vadd.f32 %v7112_v48, %v4325_v7  ;;  %v4326_v4 = vadd.f32 %v7015_v25, %v9362_v59 }
 0x30b   : > { %v7117_v15 = vpop.f32.mrb[153].mxu0 }
 0x30c   : > { %v7118_v28 = vadd.f32 %v7117_v15, %v7116_v20  ;;  %v7119_v38 = vpop.f32.mrb[154].mxu0  ;;  %v9639_v31 = vadd.f32 %v7115_v36, %v4326_v4  ;;  %v7016_v22 = vpop.f32.mrb[152].mxu1 }
 0x30d   : > { %v7120_v19 = vpop.f32.mrb[155].mxu0  ;;  %v7017_v52 = vpop.f32.mrb[153].mxu1 }
 0x30e   : > { %v7121_v41 = vadd.f32 %v7120_v19, %v7119_v38  ;;  %v7018_v11 = vadd.f32 %v7017_v52, %v7016_v22  ;;  %v7019_v32 = vpop.f32.mrb[154].mxu1 }
 0x30f   : > { %v7020_v54 = vpop.f32.mrb[155].mxu1 }
 0x310   : > { %v4327_v45 = vadd.f32 %v7018_v11, %v9376_v33  ;;  %v7021_v40 = vadd.f32 %v7020_v54, %v7019_v32 }
 0x312   : > { %v7122_v5 = vpop.f32.mrb[156].mxu0  ;;  %v9642_v43 = vadd.f32 %v7118_v28, %v4327_v45  ;;  %v4328_v59 = vadd.f32 %v7021_v40, %v9388_v62 }
 0x313   : > { %v7123_v2 = vpop.f32.mrb[157].mxu0 }
 0x314   : > { %v7124_v53 = vadd.f32 %v7123_v2, %v7122_v5  ;;  %v7125_v27 = vpop.f32.mrb[158].mxu0  ;;  %v9645_v56 = vadd.f32 %v7121_v41, %v4328_v59  ;;  %v7022_v49 = vpop.f32.mrb[156].mxu1 }
 0x315   : > { %v7126_v29 = vpop.f32.mrb[159].mxu0  ;;  %v7023_v48 = vpop.f32.mrb[157].mxu1 }
 0x316   : > { %v7127_v0 = vadd.f32 %v7126_v29, %v7125_v27  ;;  %v7024_v34 = vadd.f32 %v7023_v48, %v7022_v49  ;;  %v7025_v60 = vpop.f32.mrb[158].mxu1 }
 0x317   : > { %v7026_v44 = vpop.f32.mrb[159].mxu1 }
 0x318   : > { %v4329_v33 = vadd.f32 %v7024_v34, %v9404_v50  ;;  %v7027_v30 = vadd.f32 %v7026_v44, %v7025_v60 }
 0x31a   : > { %v7128_v36 = vpop.f32.mrb[160].mxu0  ;;  %v9648_v6 = vadd.f32 %v7124_v53, %v4329_v33  ;;  %v4330_v62 = vadd.f32 %v7027_v30, %v9414_v16 }
 0x31b   : > { %v7129_v12 = vpop.f32.mrb[161].mxu0 }
 0x31c   : > { %v7130_v55 = vadd.f32 %v7129_v12, %v7128_v36  ;;  %v7131_v8 = vpop.f32.mrb[162].mxu0  ;;  %v9651_v25 = vadd.f32 %v7127_v0, %v4330_v62  ;;  %v7028_v15 = vpop.f32.mrb[160].mxu1 }
 0x31d   : > { %v7132_v20 = vpop.f32.mrb[163].mxu0  ;;  %v7029_v28 = vpop.f32.mrb[161].mxu1 }
 0x31e   : > { %v7133_v7 = vadd.f32 %v7132_v20, %v7131_v8  ;;  %v7030_v38 = vadd.f32 %v7029_v28, %v7028_v15  ;;  %v7031_v4 = vpop.f32.mrb[162].mxu1 }
 0x31f   : > { %v7032_v19 = vpop.f32.mrb[163].mxu1 }
 0x320   : > { %v4331_v50 = vadd.f32 %v7030_v38, %v9428_v61  ;;  %v7033_v22 = vadd.f32 %v7032_v19, %v7031_v4 }
 0x322   : > { %v7134_v41 = vpop.f32.mrb[164].mxu0  ;;  %v9654_v54 = vadd.f32 %v7130_v55, %v4331_v50  ;;  %v4332_v16 = vadd.f32 %v7033_v22, %v9440_v24 }
 0x323   : > { %v7135_v52 = vpop.f32.mrb[165].mxu0 }
 0x324   : > { %v7136_v11 = vadd.f32 %v7135_v52, %v7134_v41  ;;  %v7137_v32 = vpop.f32.mrb[166].mxu0  ;;  %v9657_v40 = vadd.f32 %v7133_v7, %v4332_v16  ;;  %v7034_v2 = vpop.f32.mrb[164].mxu1 }
 0x325   : > { %v7138_v5 = vpop.f32.mrb[167].mxu0  ;;  %v7035_v53 = vpop.f32.mrb[165].mxu1 }
 0x326   : > { %v7139_v45 = vadd.f32 %v7138_v5, %v7137_v32  ;;  %v7036_v27 = vadd.f32 %v7035_v53, %v7034_v2  ;;  %v7037_v59 = vpop.f32.mrb[166].mxu1 }
 0x327   : > { %v7038_v29 = vpop.f32.mrb[167].mxu1 }
 0x328   : > { %v4333_v61 = vadd.f32 %v7036_v27, %v9456_v58  ;;  %v7039_v49 = vadd.f32 %v7038_v29, %v7037_v59 }
 0x32a   : > { %v7140_v0 = vpop.f32.mrb[168].mxu0  ;;  %v9660_v44 = vadd.f32 %v7136_v11, %v4333_v61  ;;  %v4334_v24 = vadd.f32 %v7039_v49, %v9466_v39 }
 0x32b   : > { %v7141_v48 = vpop.f32.mrb[169].mxu0 }
 0x32c   : > { %v7142_v34 = vadd.f32 %v7141_v48, %v7140_v0  ;;  %v7143_v60 = vpop.f32.mrb[170].mxu0  ;;  %v9663_v30 = vadd.f32 %v7139_v45, %v4334_v24  ;;  %v7040_v12 = vpop.f32.mrb[168].mxu1 }
 0x32d   : > { %v7144_v36 = vpop.f32.mrb[171].mxu0  ;;  %v7041_v55 = vpop.f32.mrb[169].mxu1 }
 0x32e   : > { %v7145_v33 = vadd.f32 %v7144_v36, %v7143_v60  ;;  %v7042_v8 = vadd.f32 %v7041_v55, %v7040_v12  ;;  %v7043_v62 = vpop.f32.mrb[170].mxu1 }
 0x32f   : > { %v7044_v20 = vpop.f32.mrb[171].mxu1 }
 0x330   : > { %v4335_v58 = vadd.f32 %v7042_v8, %v9480_v47  ;;  %v7045_v15 = vadd.f32 %v7044_v20, %v7043_v62 }
 0x332   : > { %v7146_v7 = vpop.f32.mrb[172].mxu0  ;;  %v9666_v19 = vadd.f32 %v7142_v34, %v4335_v58  ;;  %v4336_v39 = vadd.f32 %v7045_v15, %v9492_v21 }
 0x333   : > { %v7147_v28 = vpop.f32.mrb[173].mxu0 }
 0x334   : > { %v7148_v38 = vadd.f32 %v7147_v28, %v7146_v7  ;;  %v7149_v4 = vpop.f32.mrb[174].mxu0  ;;  %v9669_v22 = vadd.f32 %v7145_v33, %v4336_v39  ;;  %v7046_v52 = vpop.f32.mrb[172].mxu1 }
 0x335   : > { %v7150_v41 = vpop.f32.mrb[175].mxu0  ;;  %v7047_v11 = vpop.f32.mrb[173].mxu1 }
 0x336   : > { %v7151_v50 = vadd.f32 %v7150_v41, %v7149_v4  ;;  %v7048_v32 = vadd.f32 %v7047_v11, %v7046_v52  ;;  %v7049_v16 = vpop.f32.mrb[174].mxu1 }
 0x337   : > { %v7050_v5 = vpop.f32.mrb[175].mxu1 }
 0x338   : > { %v4337_v47 = vadd.f32 %v7048_v32, %v9508_v3  ;;  %v7051_v2 = vadd.f32 %v7050_v5, %v7049_v16 }
 0x33a   : > { %v7152_v45 = vpop.f32.mrb[176].mxu0  ;;  %v9672_v29 = vadd.f32 %v7148_v38, %v4337_v47  ;;  %v4338_v21 = vadd.f32 %v7051_v2, %v9518_v63 }
 0x33b   : > { %v7153_v53 = vpop.f32.mrb[177].mxu0 }
 0x33c   : > { %v7154_v27 = vadd.f32 %v7153_v53, %v7152_v45  ;;  %v7155_v59 = vpop.f32.mrb[178].mxu0  ;;  %v9675_v49 = vadd.f32 %v7151_v50, %v4338_v21  ;;  %v7052_v48 = vpop.f32.mrb[176].mxu1 }
 0x33d   : > { %v7156_v0 = vpop.f32.mrb[179].mxu0  ;;  %v7053_v34 = vpop.f32.mrb[177].mxu1 }
 0x33e   : > { %v7157_v61 = vadd.f32 %v7156_v0, %v7155_v59  ;;  %v7054_v60 = vadd.f32 %v7053_v34, %v7052_v48  ;;  %v7055_v24 = vpop.f32.mrb[178].mxu1 }
 0x33f   : > { %v7056_v36 = vpop.f32.mrb[179].mxu1 }
 0x340   : > { %v4339_v3 = vadd.f32 %v7054_v60, %v9532_v14  ;;  %v7057_v12 = vadd.f32 %v7056_v36, %v7055_v24 }
 0x342   : > { %v7158_v33 = vpop.f32.mrb[180].mxu0  ;;  %v9678_v20 = vadd.f32 %v7154_v27, %v4339_v3  ;;  %v4340_v63 = vadd.f32 %v7057_v12, %v9544_v57 }
 0x343   : > { %v7159_v55 = vpop.f32.mrb[181].mxu0 }
 0x344   : > { %v7160_v8 = vadd.f32 %v7159_v55, %v7158_v33  ;;  %v7161_v62 = vpop.f32.mrb[182].mxu0  ;;  %v9681_v15 = vadd.f32 %v7157_v61, %v4340_v63  ;;  %v7058_v28 = vpop.f32.mrb[180].mxu1 }
 0x345   : > { %v7162_v7 = vpop.f32.mrb[183].mxu0  ;;  %v7059_v38 = vpop.f32.mrb[181].mxu1 }
 0x346   : > { %v7163_v58 = vadd.f32 %v7162_v7, %v7161_v62  ;;  %v7060_v4 = vadd.f32 %v7059_v38, %v7058_v28  ;;  %v7061_v39 = vpop.f32.mrb[182].mxu1 }
 0x347   : > { %v7062_v41 = vpop.f32.mrb[183].mxu1 }
 0x348   : > { %v4341_v14 = vadd.f32 %v7060_v4, %v9560_v17  ;;  %v7063_v52 = vadd.f32 %v7062_v41, %v7061_v39 }
 0x34a   : > { %v7164_v50 = vpop.f32.mrb[184].mxu0  ;;  %v9684_v5 = vadd.f32 %v7160_v8, %v4341_v14  ;;  %v4342_v57 = vadd.f32 %v7063_v52, %v9570_v37 }
 0x34b   : > { %v7165_v11 = vpop.f32.mrb[185].mxu0 }
 0x34c   : > { %v7166_v32 = vadd.f32 %v7165_v11, %v7164_v50  ;;  %v7167_v16 = vpop.f32.mrb[186].mxu0  ;;  %v9687_v2 = vadd.f32 %v7163_v58, %v4342_v57  ;;  %v7064_v53 = vpop.f32.mrb[184].mxu1 }
 0x34d   : > { %v7168_v45 = vpop.f32.mrb[187].mxu0  ;;  %v7065_v27 = vpop.f32.mrb[185].mxu1 }
 0x34e   : > { %v7169_v47 = vadd.f32 %v7168_v45, %v7167_v16  ;;  %v7066_v59 = vadd.f32 %v7065_v27, %v7064_v53  ;;  %v7067_v21 = vpop.f32.mrb[186].mxu1 }
 0x34f   : > { %v7068_v0 = vpop.f32.mrb[187].mxu1 }
 0x350   : > { %v4343_v17 = vadd.f32 %v7066_v59, %v9586_v13  ;;  %v7069_v48 = vadd.f32 %v7068_v0, %v7067_v21 }
 0x352   : > { %v7170_v61 = vpop.f32.mrb[188].mxu0  ;;  %v9690_v36 = vadd.f32 %v7166_v32, %v4343_v17  ;;  %v4344_v37 = vadd.f32 %v7069_v48, %v9594_v42 }
 0x353   : > { %v7171_v34 = vpop.f32.mrb[189].mxu0 }
 0x354   : > { %v7172_v60 = vadd.f32 %v7171_v34, %v7170_v61  ;;  %v7173_v24 = vpop.f32.mrb[190].mxu0  ;;  %v9693_v12 = vadd.f32 %v7169_v47, %v4344_v37  ;;  %v7070_v55 = vpop.f32.mrb[188].mxu1 }
 0x355   : > { %v7174_v33 = vpop.f32.mrb[191].mxu0  ;;  %v7071_v8 = vpop.f32.mrb[189].mxu1 }
 0x356   : > { %v7175_v3 = vadd.f32 %v7174_v33, %v7173_v24  ;;  %v7072_v62 = vadd.f32 %v7071_v8, %v7070_v55  ;;  %v7073_v63 = vpop.f32.mrb[190].mxu1 }
 0x357   : > { %v7074_v7 = vpop.f32.mrb[191].mxu1 }
 0x358   : > { %v4345_v13 = vadd.f32 %v7072_v62, %v9604_v46  ;;  %v7075_v28 = vadd.f32 %v7074_v7, %v7073_v63 }
 0x35a   : > { %v7176_v58 = vpop.f32.mrb[192].mxu0  ;;  %v9696_v41 = vadd.f32 %v7172_v60, %v4345_v13  ;;  %v4346_v42 = vadd.f32 %v7075_v28, %v9610_v26 }
 0x35b   : > { %v7177_v38 = vpop.f32.mrb[193].mxu0 }
 0x35c   : > { %v7178_v4 = vadd.f32 %v7177_v38, %v7176_v58  ;;  %v7179_v39 = vpop.f32.mrb[194].mxu0  ;;  %v9699_v52 = vadd.f32 %v7175_v3, %v4346_v42  ;;  %v7076_v11 = vpop.f32.mrb[192].mxu1 }
 0x35d   : > { %v7180_v50 = vpop.f32.mrb[195].mxu0  ;;  %v7077_v32 = vpop.f32.mrb[193].mxu1 }
 0x35e   : > { %v7181_v14 = vadd.f32 %v7180_v50, %v7179_v39  ;;  %v7078_v16 = vadd.f32 %v7077_v32, %v7076_v11  ;;  %v7079_v57 = vpop.f32.mrb[194].mxu1 }
 0x35f   : > { %v7080_v45 = vpop.f32.mrb[195].mxu1 }
 0x360   : > { %v4347_v46 = vadd.f32 %v7078_v16, %v9617_v18  ;;  %v7081_v53 = vadd.f32 %v7080_v45, %v7079_v57 }
 0x362   : > { %v7298_v47 = vpop.f32.mrb[196].mxu0  ;;  %v9702_v0 = vadd.f32 %v7178_v4, %v4347_v46  ;;  %v4348_v26 = vadd.f32 %v7081_v53, %v9620_v23 }
 0x363   : > { %v7299_v27 = vpop.f32.mrb[197].mxu0 }
 0x364   : > { %v7300_v59 = vadd.f32 %v7299_v27, %v7298_v47  ;;  %v7301_v21 = vpop.f32.mrb[198].mxu0  ;;  %v9705_v48 = vadd.f32 %v7181_v14, %v4348_v26  ;;  %v7198_v34 = vpop.f32.mrb[196].mxu1 }
 0x365   : > { %v7302_v61 = vpop.f32.mrb[199].mxu0  ;;  %v7199_v60 = vpop.f32.mrb[197].mxu1 }
 0x366   : > { %v7303_v17 = vadd.f32 %v7302_v61, %v7301_v21  ;;  %v7200_v24 = vadd.f32 %v7199_v60, %v7198_v34  ;;  %v7201_v37 = vpop.f32.mrb[198].mxu1 }
 0x367   : > { %v7202_v33 = vpop.f32.mrb[199].mxu1 }
 0x368   : > { %v5357_v3 = vadd.f32 %v7200_v24, %v9624_v51  ;;  %v7203_v55 = vadd.f32 %v7202_v33, %v7201_v37 }
 0x36a   : > { %v7304_v18 = vpop.f32.mrb[200].mxu0  ;;  %v5783_v7 = vadd.f32 %v7300_v59, %v5357_v3  ;;  %v5358_v23 = vadd.f32 %v7203_v55, %v9627_v35 }
 0x36b   : > { %v7305_v8 = vpop.f32.mrb[201].mxu0 }
 0x36c   : > { %v7306_v62 = vadd.f32 %v7305_v8, %v7304_v18  ;;  %v7307_v63 = vpop.f32.mrb[202].mxu0  ;;  %5811 = vst [vmem:[%s9711_s7] sm:$0xff] %v5783_v7  ;;  %v5784_v28 = vadd.f32 %v7303_v17, %v5358_v23  ;;  %v7204_v38 = vpop.f32.mrb[200].mxu1 }
 0x36d   : > { %v7308_v58 = vpop.f32.mrb[203].mxu0  ;;  %v7205_v4 = vpop.f32.mrb[201].mxu1 }
 0x36e   : > { %v7309_v13 = vadd.f32 %v7308_v58, %v7307_v63  ;;  %5812 = vst [vmem:[%s9711_s7 + $0x8] sm:$0xff] %v5784_v28  ;;  %v7206_v51 = vadd.f32 %v7205_v4, %v7204_v38  ;;  %v7207_v39 = vpop.f32.mrb[202].mxu1 }
 0x36f   : > { %v7208_v42 = vpop.f32.mrb[203].mxu1 }
 0x370   : > { %v5359_v14 = vadd.f32 %v7206_v51, %v9630_v1  ;;  %v7209_v35 = vadd.f32 %v7208_v42, %v7207_v39 }
 0x372   : > { %v7310_v50 = vpop.f32.mrb[204].mxu0  ;;  %v5785_v57 = vadd.f32 %v7306_v62, %v5359_v14  ;;  %v5360_v45 = vadd.f32 %v7209_v35, %v9633_v9 }
 0x373   : > { %v7311_v11 = vpop.f32.mrb[205].mxu0 }
 0x374   : > { %v7312_v32 = vadd.f32 %v7311_v11, %v7310_v50  ;;  %v7313_v16 = vpop.f32.mrb[206].mxu0  ;;  %5813 = vst [vmem:[%s9711_s7 + $0x10] sm:$0xff] %v5785_v57  ;;  %v5786_v53 = vadd.f32 %v7309_v13, %v5360_v45  ;;  %v7210_v27 = vpop.f32.mrb[204].mxu1 }
 0x375   : > { %v7314_v47 = vpop.f32.mrb[207].mxu0  ;;  %v7211_v59 = vpop.f32.mrb[205].mxu1 }
 0x376   : > { %v7315_v46 = vadd.f32 %v7314_v47, %v7313_v16  ;;  %5814 = vst [vmem:[%s9711_s7 + $0x18] sm:$0xff] %v5786_v53  ;;  %v7212_v21 = vadd.f32 %v7211_v59, %v7210_v27  ;;  %v7213_v26 = vpop.f32.mrb[206].mxu1 }
 0x377   : > { %v7214_v61 = vpop.f32.mrb[207].mxu1 }
 0x378   : > { %v5361_v17 = vadd.f32 %v7212_v21, %v9636_v10  ;;  %v7215_v34 = vadd.f32 %v7214_v61, %v7213_v26 }
 0x37a   : > { %v7316_v1 = vpop.f32.mrb[208].mxu0  ;;  %v5787_v9 = vadd.f32 %v7312_v32, %v5361_v17  ;;  %v5362_v33 = vadd.f32 %v7215_v34, %v9639_v31 }
 0x37b   : > { %v7317_v60 = vpop.f32.mrb[209].mxu0 }
 0x37c   : > { %v7318_v24 = vadd.f32 %v7317_v60, %v7316_v1  ;;  %v7319_v37 = vpop.f32.mrb[210].mxu0  ;;  %5815 = vst [vmem:[%s9711_s7 + $0x20] sm:$0xff] %v5787_v9  ;;  %v5788_v55 = vadd.f32 %v7315_v46, %v5362_v33  ;;  %v7216_v8 = vpop.f32.mrb[208].mxu1 }
 0x37d   : > { %v7320_v18 = vpop.f32.mrb[211].mxu0  ;;  %v7217_v62 = vpop.f32.mrb[209].mxu1 }
 0x37e   : > { %v7321_v3 = vadd.f32 %v7320_v18, %v7319_v37  ;;  %5816 = vst [vmem:[%s9711_s7 + $0x28] sm:$0xff] %v5788_v55  ;;  %v7218_v63 = vadd.f32 %v7217_v62, %v7216_v8  ;;  %v7219_v7 = vpop.f32.mrb[210].mxu1 }
 0x37f   : > { %v7220_v23 = vpop.f32.mrb[211].mxu1 }
 0x380   : > { %v5363_v58 = vadd.f32 %v7218_v63, %v9642_v43  ;;  %v7221_v13 = vadd.f32 %v7220_v23, %v7219_v7 }
 0x382   : > { %v7322_v10 = vpop.f32.mrb[212].mxu0  ;;  %v5789_v31 = vadd.f32 %v7318_v24, %v5363_v58  ;;  %v5364_v51 = vadd.f32 %v7221_v13, %v9645_v56 }
 0x383   : > { %v7323_v28 = vpop.f32.mrb[213].mxu0 }
 0x384   : > { %v7324_v38 = vadd.f32 %v7323_v28, %v7322_v10  ;;  %v7325_v4 = vpop.f32.mrb[214].mxu0  ;;  %5817 = vst [vmem:[%s9711_s7 + $0x30] sm:$0xff] %v5789_v31  ;;  %v5790_v50 = vadd.f32 %v7321_v3, %v5364_v51  ;;  %v7222_v14 = vpop.f32.mrb[212].mxu1 }
 0x385   : > { %v7326_v39 = vpop.f32.mrb[215].mxu0  ;;  %v7223_v35 = vpop.f32.mrb[213].mxu1 }
 0x386   : > { %v7327_v42 = vadd.f32 %v7326_v39, %v7325_v4  ;;  %5818 = vst [vmem:[%s9711_s7 + $0x38] sm:$0xff] %v5790_v50  ;;  %v7224_v11 = vadd.f32 %v7223_v35, %v7222_v14  ;;  %v7225_v32 = vpop.f32.mrb[214].mxu1 }
 0x387   : > { %v7226_v16 = vpop.f32.mrb[215].mxu1 }
 0x388   : > { %v5365_v57 = vadd.f32 %v7224_v11, %v9648_v6  ;;  %v7227_v45 = vadd.f32 %v7226_v16, %v7225_v32 }
 0x38a   : > { %v7328_v43 = vpop.f32.mrb[216].mxu0  ;;  %v5791_v56 = vadd.f32 %v7324_v38, %v5365_v57  ;;  %v5366_v27 = vadd.f32 %v7227_v45, %v9651_v25 }
 0x38b   : > { %v7329_v47 = vpop.f32.mrb[217].mxu0 }
 0x38c   : > { %v7330_v46 = vadd.f32 %v7329_v47, %v7328_v43  ;;  %v7331_v53 = vpop.f32.mrb[218].mxu0  ;;  %5819 = vst [vmem:[%s9711_s7 + $0x40] sm:$0xff] %v5791_v56  ;;  %v5792_v26 = vadd.f32 %v7327_v42, %v5366_v27  ;;  %v7228_v61 = vpop.f32.mrb[216].mxu1 }
 0x38d   : > { %v7332_v59 = vpop.f32.mrb[219].mxu0  ;;  %v7229_v1 = vpop.f32.mrb[217].mxu1 }
 0x38e   : > { %v7333_v21 = vadd.f32 %v7332_v59, %v7331_v53  ;;  %5820 = vst [vmem:[%s9711_s7 + $0x48] sm:$0xff] %v5792_v26  ;;  %v7230_v17 = vadd.f32 %v7229_v1, %v7228_v61  ;;  %v7231_v34 = vpop.f32.mrb[218].mxu1 }
 0x38f   : > { %v7232_v60 = vpop.f32.mrb[219].mxu1 }
 0x390   : > { %v5367_v24 = vadd.f32 %v7230_v17, %v9654_v54  ;;  %v7233_v37 = vadd.f32 %v7232_v60, %v7231_v34 }
 0x392   : > { %v7334_v6 = vpop.f32.mrb[220].mxu0  ;;  %v5793_v25 = vadd.f32 %v7330_v46, %v5367_v24  ;;  %v5368_v3 = vadd.f32 %v7233_v37, %v9657_v40 }
 0x393   : > { %v7335_v9 = vpop.f32.mrb[221].mxu0 }
 0x394   : > { %v7336_v33 = vadd.f32 %v7335_v9, %v7334_v6  ;;  %v7337_v18 = vpop.f32.mrb[222].mxu0  ;;  %5821 = vst [vmem:[%s9711_s7 + $0x50] sm:$0xff] %v5793_v25  ;;  %v5794_v62 = vadd.f32 %v7333_v21, %v5368_v3  ;;  %v7234_v63 = vpop.f32.mrb[220].mxu1 }
 0x395   : > { %v7338_v55 = vpop.f32.mrb[223].mxu0  ;;  %v7235_v7 = vpop.f32.mrb[221].mxu1 }
 0x396   : > { %v7339_v8 = vadd.f32 %v7338_v55, %v7337_v18  ;;  %5822 = vst [vmem:[%s9711_s7 + $0x58] sm:$0xff] %v5794_v62  ;;  %v7236_v23 = vadd.f32 %v7235_v7, %v7234_v63  ;;  %v7237_v10 = vpop.f32.mrb[222].mxu1 }
 0x397   : > { %v7238_v58 = vpop.f32.mrb[223].mxu1 }
 0x398   : > { %v5369_v13 = vadd.f32 %v7236_v23, %v9660_v44  ;;  %v7239_v28 = vadd.f32 %v7238_v58, %v7237_v10 }
 0x39a   : > { %v7340_v54 = vpop.f32.mrb[224].mxu0  ;;  %v5795_v40 = vadd.f32 %v7336_v33, %v5369_v13  ;;  %v5370_v51 = vadd.f32 %v7239_v28, %v9663_v30 }
 0x39b   : > { %v7341_v38 = vpop.f32.mrb[225].mxu0 }
 0x39c   : > { %v7342_v4 = vadd.f32 %v7341_v38, %v7340_v54  ;;  %v7343_v31 = vpop.f32.mrb[226].mxu0  ;;  %5823 = vst [vmem:[%s9711_s7 + $0x60] sm:$0xff] %v5795_v40  ;;  %v5796_v50 = vadd.f32 %v7339_v8, %v5370_v51  ;;  %v7240_v14 = vpop.f32.mrb[224].mxu1 }
 0x39d   : > { %v7344_v39 = vpop.f32.mrb[227].mxu0  ;;  %v7241_v35 = vpop.f32.mrb[225].mxu1 }
 0x39e   : > { %v7345_v42 = vadd.f32 %v7344_v39, %v7343_v31  ;;  %5824 = vst [vmem:[%s9711_s7 + $0x68] sm:$0xff] %v5796_v50  ;;  %v7242_v11 = vadd.f32 %v7241_v35, %v7240_v14  ;;  %v7243_v32 = vpop.f32.mrb[226].mxu1 }
 0x39f   : > { %v7244_v16 = vpop.f32.mrb[227].mxu1 }
 0x3a0   : > { %v5371_v43 = vadd.f32 %v7242_v11, %v9666_v19  ;;  %v7245_v57 = vadd.f32 %v7244_v16, %v7243_v32 }
 0x3a2   : > { %v7346_v44 = vpop.f32.mrb[228].mxu0  ;;  %v5797_v30 = vadd.f32 %v7342_v4, %v5371_v43  ;;  %v5372_v53 = vadd.f32 %v7245_v57, %v9669_v22 }
 0x3a3   : > { %v7347_v45 = vpop.f32.mrb[229].mxu0 }
 0x3a4   : > { %v7348_v47 = vadd.f32 %v7347_v45, %v7346_v44  ;;  %v7349_v46 = vpop.f32.mrb[230].mxu0  ;;  %5825 = vst [vmem:[%s9711_s7 + $0x70] sm:$0xff] %v5797_v30  ;;  %v5798_v59 = vadd.f32 %v7345_v42, %v5372_v53  ;;  %v7246_v21 = vpop.f32.mrb[228].mxu1 }
 0x3a5   : > { %v7350_v56 = vpop.f32.mrb[231].mxu0  ;;  %v7247_v26 = vpop.f32.mrb[229].mxu1 }
 0x3a6   : > { %v7351_v27 = vadd.f32 %v7350_v56, %v7349_v46  ;;  %5826 = vst [vmem:[%s9711_s7 + $0x78] sm:$0xff] %v5798_v59  ;;  %v7248_v61 = vadd.f32 %v7247_v26, %v7246_v21  ;;  %v7249_v1 = vpop.f32.mrb[230].mxu1 }
 0x3a7   : > { %v7250_v17 = vpop.f32.mrb[231].mxu1 }
 0x3a8   : > { %v5373_v34 = vadd.f32 %v7248_v61, %v9672_v29  ;;  %v7251_v60 = vadd.f32 %v7250_v17, %v7249_v1 }
 0x3aa   : > { %v7352_v19 = vpop.f32.mrb[232].mxu0  ;;  %v5799_v22 = vadd.f32 %v7348_v47, %v5373_v34  ;;  %v5374_v9 = vadd.f32 %v7251_v60, %v9675_v49 }
 0x3ab   : > { %v7353_v6 = vpop.f32.mrb[233].mxu0 }
 0x3ac   : > { %v7354_v24 = vadd.f32 %v7353_v6, %v7352_v19  ;;  %v7355_v37 = vpop.f32.mrb[234].mxu0  ;;  %5827 = vst [vmem:[%s9711_s7 + $0x80] sm:$0xff] %v5799_v22  ;;  %v5800_v25 = vadd.f32 %v7351_v27, %v5374_v9  ;;  %v7252_v3 = vpop.f32.mrb[232].mxu1 }
 0x3ad   : > { %v7356_v33 = vpop.f32.mrb[235].mxu0  ;;  %v7253_v55 = vpop.f32.mrb[233].mxu1 }
 0x3ae   : > { %v7357_v18 = vadd.f32 %v7356_v33, %v7355_v37  ;;  %5828 = vst [vmem:[%s9711_s7 + $0x88] sm:$0xff] %v5800_v25  ;;  %v7254_v8 = vadd.f32 %v7253_v55, %v7252_v3  ;;  %v7255_v62 = vpop.f32.mrb[234].mxu1 }
 0x3af   : > { %v7256_v63 = vpop.f32.mrb[235].mxu1 }
 0x3b0   : > { %v5375_v7 = vadd.f32 %v7254_v8, %v9678_v20  ;;  %v7257_v23 = vadd.f32 %v7256_v63, %v7255_v62 }
 0x3b2   : > { %v7358_v29 = vpop.f32.mrb[236].mxu0  ;;  %v5801_v49 = vadd.f32 %v7354_v24, %v5375_v7  ;;  %v5376_v13 = vadd.f32 %v7257_v23, %v9681_v15 }
 0x3b3   : > { %v7359_v10 = vpop.f32.mrb[237].mxu0 }
 0x3b4   : > { %v7360_v58 = vadd.f32 %v7359_v10, %v7358_v29  ;;  %v7361_v54 = vpop.f32.mrb[238].mxu0  ;;  %5829 = vst [vmem:[%s9711_s7 + $0x90] sm:$0xff] %v5801_v49  ;;  %v5802_v4 = vadd.f32 %v7357_v18, %v5376_v13  ;;  %v7258_v31 = vpop.f32.mrb[236].mxu1 }
 0x3b5   : > { %v7362_v28 = vpop.f32.mrb[239].mxu0  ;;  %v7259_v40 = vpop.f32.mrb[237].mxu1 }
 0x3b6   : > { %v7363_v38 = vadd.f32 %v7362_v28, %v7361_v54  ;;  %5830 = vst [vmem:[%s9711_s7 + $0x98] sm:$0xff] %v5802_v4  ;;  %v7260_v51 = vadd.f32 %v7259_v40, %v7258_v31  ;;  %v7261_v39 = vpop.f32.mrb[238].mxu1  ;;  %v5937_v28 = vld [vmem:[%s9711_s7 + $0x18] sm:$0xff] (%p7681_p6)  ;;  %v5941_v4 = vld [vmem:[%s9711_s7 + $0x28] sm:$0xff] (%p7681_p6)  ;;  %v5943_v31 = vld [vmem:[%s9711_s7 + $0x30] sm:$0xff] (%p7681_p6) }
 0x3b7   : > { %v7262_v42 = vpop.f32.mrb[239].mxu1  ;;  %5938 = vst [vmem:[%s9776_s15 + $0x30] sm:$0xff] (%p7681_p6), %v5937_v28  ;;  %5942 = vst [vmem:[%s9776_s15 + $0x50] sm:$0xff] (%p7681_p6), %v5941_v4  ;;  %v5945_v40 = vld [vmem:[%s9711_s7 + $0x38] sm:$0xff] (%p7681_p6) }
 0x3b8   : > { %v5377_v50 = vadd.f32 %v7260_v51, %v9684_v5  ;;  %v7263_v14 = vadd.f32 %v7262_v42, %v7261_v39  ;;  %v5947_v51 = vld [vmem:[%s9711_s7 + $0x40] sm:$0xff] (%p7681_p6)  ;;  %5944 = vst [vmem:[%s9776_s15 + $0x60] sm:$0xff] (%p7681_p6), %v5943_v31  ;;  %5946 = vst [vmem:[%s9776_s15 + $0x70] sm:$0xff] (%p7681_p6), %v5945_v40  ;;  %v5949_v39 = vld [vmem:[%s9711_s7 + $0x48] sm:$0xff] (%p7681_p6) }
 0x3b9   : > { %5948 = vst [vmem:[%s9776_s15 + $0x80] sm:$0xff] (%p7681_p6), %v5947_v51  ;;  %v5951_v42 = vld [vmem:[%s9711_s7 + $0x50] sm:$0xff] (%p7681_p6)  ;;  %5950 = vst [vmem:[%s9776_s15 + $0x90] sm:$0xff] (%p7681_p6), %v5949_v39 }
 0x3ba   : > { %v7364_v20 = vpop.f32.mrb[240].mxu0  ;;  %v5803_v15 = vadd.f32 %v7360_v58, %v5377_v50  ;;  %v5378_v16 = vadd.f32 %v7263_v14, %v9687_v2  ;;  %5952 = vst [vmem:[%s9776_s15 + $0xa0] sm:$0xff] (%p7681_p6), %v5951_v42  ;;  %v5955_v50 = vld [vmem:[%s9711_s7 + $0x60] sm:$0xff] (%p7681_p6)  ;;  %v5957_v14 = vld [vmem:[%s9711_s7 + $0x68] sm:$0xff] (%p7681_p6) }
 0x3bb   : > { %v7365_v35 = vpop.f32.mrb[241].mxu0  ;;  %5956 = vst [vmem:[%s9776_s15 + $0xc0] sm:$0xff] (%p7681_p6), %v5955_v50  ;;  %5958 = vst [vmem:[%s9776_s15 + $0xd0] sm:$0xff] (%p7681_p6), %v5957_v14 }
 0x3bc   : > { %v7366_v11 = vadd.f32 %v7365_v35, %v7364_v20  ;;  %v7367_v32 = vpop.f32.mrb[242].mxu0  ;;  %5831 = vst [vmem:[%s9711_s7 + $0xa0] sm:$0xff] %v5803_v15  ;;  %v5804_v57 = vadd.f32 %v7363_v38, %v5378_v16  ;;  %v7264_v45 = vpop.f32.mrb[240].mxu1  ;;  %v5939_v38 = vld [vmem:[%s9711_s7 + $0x20] sm:$0xff] (%p7681_p6)  ;;  %v5953_v20 = vld [vmem:[%s9711_s7 + $0x58] sm:$0xff] (%p7681_p6)  ;;  %v5959_v35 = vld [vmem:[%s9711_s7 + $0x70] sm:$0xff] (%p7681_p6) }
 0x3bd   : > { %v7368_v44 = vpop.f32.mrb[243].mxu0  ;;  %v7265_v47 = vpop.f32.mrb[241].mxu1  ;;  %5940 = vst [vmem:[%s9776_s15 + $0x40] sm:$0xff] (%p7681_p6), %v5939_v38  ;;  %5954 = vst [vmem:[%s9776_s15 + $0xb0] sm:$0xff] (%p7681_p6), %v5953_v20  ;;  %v5965_v15 = vld [vmem:[%s9711_s7 + $0x88] sm:$0xff] (%p7681_p6)  ;;  %v5967_v16 = vld [vmem:[%s9711_s7 + $0x90] sm:$0xff] (%p7681_p6) }
 0x3be   : > { %v7369_v43 = vadd.f32 %v7368_v44, %v7367_v32  ;;  %5832 = vst [vmem:[%s9711_s7 + $0xa8] sm:$0xff] %v5804_v57  ;;  %v7266_v46 = vadd.f32 %v7265_v47, %v7264_v45  ;;  %v7267_v30 = vpop.f32.mrb[242].mxu1  ;;  %5960 = vst [vmem:[%s9776_s15 + $0xe0] sm:$0xff] (%p7681_p6), %v5959_v35  ;;  %v5963_v32 = vld [vmem:[%s9711_s7 + $0x80] sm:$0xff] (%p7681_p6)  ;;  %v5969_v44 = vld [vmem:[%s9711_s7 + $0x98] sm:$0xff] (%p7681_p6) }
 0x3bf   : > { %v7268_v53 = vpop.f32.mrb[243].mxu1  ;;  %5964 = vst [vmem:[%s9776_s15 + $0x100] sm:$0xff] (%p7681_p6), %v5963_v32  ;;  %5966 = vst [vmem:[%s9776_s15 + $0x110] sm:$0xff] (%p7681_p6), %v5965_v15 }
 0x3c0   : > { %v5379_v56 = vadd.f32 %v7266_v46, %v9690_v36  ;;  %v7269_v27 = vadd.f32 %v7268_v53, %v7267_v30  ;;  %5968 = vst [vmem:[%s9776_s15 + $0x120] sm:$0xff] (%p7681_p6), %v5967_v16  ;;  %5970 = vst [vmem:[%s9776_s15 + $0x130] sm:$0xff] (%p7681_p6), %v5969_v44 }
 0x3c2   : > { %v7370_v5 = vpop.f32.mrb[244].mxu0  ;;  %v5805_v2 = vadd.f32 %v7366_v11, %v5379_v56  ;;  %v5380_v61 = vadd.f32 %v7269_v27, %v9693_v12  ;;  %v5961_v11 = vld [vmem:[%s9711_s7 + $0x78] sm:$0xff] (%p7681_p6) }
 0x3c3   : > { %v7371_v59 = vpop.f32.mrb[245].mxu0  ;;  %5962 = vst [vmem:[%s9776_s15 + $0xf0] sm:$0xff] (%p7681_p6), %v5961_v11 }
 0x3c4   : > { %v7372_v21 = vadd.f32 %v7371_v59, %v7370_v5  ;;  %v7373_v26 = vpop.f32.mrb[246].mxu0  ;;  %5833 = vst [vmem:[%s9711_s7 + $0xb0] sm:$0xff] %v5805_v2  ;;  %v5806_v19 = vadd.f32 %v7369_v43, %v5380_v61  ;;  %v7270_v34 = vpop.f32.mrb[244].mxu1  ;;  %v5971_v43 = vld [vmem:[%s9711_s7 + $0xa0] sm:$0xff] (%p7681_p6) }
 0x3c5   : > { %v7374_v1 = vpop.f32.mrb[247].mxu0  ;;  %v7271_v60 = vpop.f32.mrb[245].mxu1  ;;  %5972 = vst [vmem:[%s9776_s15 + $0x140] sm:$0xff] (%p7681_p6), %v5971_v43  ;;  %v5973_v57 = vld [vmem:[%s9711_s7 + $0xa8] sm:$0xff] (%p7681_p6) }
 0x3c6   : > { %v7375_v17 = vadd.f32 %v7374_v1, %v7373_v26  ;;  %5834 = vst [vmem:[%s9711_s7 + $0xb8] sm:$0xff] %v5806_v19  ;;  %v7272_v6 = vadd.f32 %v7271_v60, %v7270_v34  ;;  %v7273_v24 = vpop.f32.mrb[246].mxu1  ;;  %5974 = vst [vmem:[%s9776_s15 + $0x150] sm:$0xff] (%p7681_p6), %v5973_v57 }
 0x3c7   : > { %v7274_v37 = vpop.f32.mrb[247].mxu1 }
 0x3c8   : > { %v5381_v22 = vadd.f32 %v7272_v6, %v9696_v41  ;;  %v7275_v9 = vadd.f32 %v7274_v37, %v7273_v24 }
 0x3ca   : > { %v7376_v36 = vpop.f32.mrb[248].mxu0  ;;  %v5807_v12 = vadd.f32 %v7372_v21, %v5381_v22  ;;  %v5382_v3 = vadd.f32 %v7275_v9, %v9699_v52  ;;  %v5931_v52 = vld [vmem:[%s9711_s7] sm:$0xff] (%p7681_p6) }
 0x3cb   : > { %v7377_v33 = vpop.f32.mrb[249].mxu0  ;;  %5932 = vst [vmem:[%s9776_s15] sm:$0xff] (%p7681_p6), %v5931_v52  ;;  %v5975_v45 = vld [vmem:[%s9711_s7 + $0xb0] sm:$0xff] (%p7681_p6) }
 0x3cc   : > { %v7378_v18 = vadd.f32 %v7377_v33, %v7376_v36  ;;  %v7379_v25 = vpop.f32.mrb[250].mxu0  ;;  %5835 = vst [vmem:[%s9711_s7 + $0xc0] sm:$0xff] %v5807_v12  ;;  %v5808_v62 = vadd.f32 %v7375_v17, %v5382_v3  ;;  %v7276_v63 = vpop.f32.mrb[248].mxu1  ;;  %5976 = vst [vmem:[%s9776_s15 + $0x160] sm:$0xff] (%p7681_p6), %v5975_v45 }
 0x3cd   : > { %v7380_v55 = vpop.f32.mrb[251].mxu0  ;;  %v7277_v29 = vpop.f32.mrb[249].mxu1  ;;  %v5977_v47 = vld [vmem:[%s9711_s7 + $0xb8] sm:$0xff] (%p7681_p6) }
 0x3ce   : > { %v7381_v8 = vadd.f32 %v7380_v55, %v7379_v25  ;;  %5836 = vst [vmem:[%s9711_s7 + $0xc8] sm:$0xff] %v5808_v62  ;;  %v7278_v7 = vadd.f32 %v7277_v29, %v7276_v63  ;;  %v7279_v23 = vpop.f32.mrb[250].mxu1  ;;  %5978 = vst [vmem:[%s9776_s15 + $0x170] sm:$0xff] (%p7681_p6), %v5977_v47 }
 0x3cf   : > { %v7280_v10 = vpop.f32.mrb[251].mxu1 }
 0x3d0   : > { %v5383_v41 = vadd.f32 %v7278_v7, %v9702_v0  ;;  %v7281_v58 = vadd.f32 %v7280_v10, %v7279_v23  ;;  %5845 = sbr.rel (!%p7681_p6) target bundleno = 991 (0x3df), region = 73  ;;  %v5933_v0 = vld [vmem:[%s9711_s7 + $0x8] sm:$0xff] (%p7681_p6) }
 0x3d1   : > { %5934 = vst [vmem:[%s9776_s15 + $0x10] sm:$0xff] (%p7681_p6), %v5933_v0 }
 0x3d2   : > { %v5809_v54 = vadd.f32 %v7378_v18, %v5383_v41  ;;  %v5384_v49 = vadd.f32 %v7281_v58, %v9705_v48  ;;  %v5935_v48 = vld [vmem:[%s9711_s7 + $0x10] sm:$0xff] (%p7681_p6) }
 0x3d3   : > { %5936 = vst [vmem:[%s9776_s15 + $0x20] sm:$0xff] (%p7681_p6), %v5935_v48  ;;  %v5979_v46 = vld [vmem:[%s9711_s7 + $0xc0] sm:$0xff] (%p7681_p6) }
 0x3d4   : > { %5837 = vst [vmem:[%s9711_s7 + $0xd0] sm:$0xff] %v5809_v54  ;;  %v5810_v13 = vadd.f32 %v7381_v8, %v5384_v49  ;;  %5980 = vst [vmem:[%s9776_s15 + $0x180] sm:$0xff] (%p7681_p6), %v5979_v46 }
 0x3d5   : > { %v5981_v30 = vld [vmem:[%s9711_s7 + $0xc8] sm:$0xff] (%p7681_p6) }
 0x3d6   : > { %5838 = vst [vmem:[%s9711_s7 + $0xd8] sm:$0xff] %v5810_v13  ;;  %5982 = vst [vmem:[%s9776_s15 + $0x190] sm:$0xff] (%p7681_p6), %v5981_v30 }
 0x3db   : > { %v5983_v53 = vld [vmem:[%s9711_s7 + $0xd0] sm:$0xff] }
 0x3dc   : > { %5984 = vst [vmem:[%s9776_s15 + $0x1a0] sm:$0xff] %v5983_v53 }
 0x3dd   : > { %v5985_v5 = vld [vmem:[%s9711_s7 + $0xd8] sm:$0xff] }
 0x3de   : > { %5986 = vst [vmem:[%s9776_s15 + $0x1b0] sm:$0xff] %v5985_v5 }
 0x3df PF: > { %s12_s13 = sadd.s32 1, %s7629_s13   ;;  %s9913_s9 = smov %s7617_s10 }
 0x3e0   : > { %p9_p11 = scmp.ge.s32.totalorder %s12_s13, 4   ;;  %s9914_s10 = smov %s7686_s19 }
 0x3e1   : > { %s9915_s11 = smov %s7625_s12  ;;  %s9916_s12 = smov %s9918_s14 }
 0x3e2   :  { %11 = sbr.rel (!%p9_p11) target bundleno = 3 (0x3), region = 153 }

</bundles_post_ra>
